<compile_context>
chip_gen: v7x
topology: tpu7x:2x2x1
jax: 0.10.0
libtpu: 0.0.40
codegen_flags: <defaults>
</compile_context>

<pallas_src>
import jax
import jax.numpy as jnp
from jax import lax
from jax.experimental import pallas as pl
from jax.experimental.pallas import tpu as pltpu


@jax.jit
def context_encoder_forward(x, w_conv, b_conv, w_fc, b_fc):
    """x: [T, B, C, H, W] (PyTorch layout). Returns (h_out, c_out): [B, OUT]."""
    T, B, C, H, W = x.shape
    F = w_conv.shape[0] // 4
    KH, KW = w_conv.shape[2], w_conv.shape[3]
    PH, PW = KH // 2, KW // 2                 # 'same' padding
    OUT = w_fc.shape[0]
    Hp, Wp = H + 2 * PH, W + 2 * PW
    WF = W * F
    N = 4 * WF                                # lane-dense gates width (=256 here)
    KX = Wp * C                               # banded-matmul K, x part
    KHH = Wp * F                              # banded-matmul K, h part
    h_lo = PW * F                             # interior lane offset in padded-h rows
    assert KH % 2 == 1 and KW % 2 == 1, "'same' conv assumes odd kernel"

    # ---------------- host-side layout prep (weights + padded x) -------------
    # x: NCHW -> NHWC, zero-pad the spatial ring, flatten (W, C) into lanes.
    x_nhwc = jnp.transpose(x, (0, 1, 3, 4, 2))                       # [T,B,H,W,C]
    x_pad = jnp.pad(x_nhwc, ((0, 0), (0, 0), (PH, PH), (PW, PW), (0, 0)))
    x_flat = x_pad.reshape(T, B, Hp, KX)                             # [T,B,Hp,Wp*C]

    # Banded conv weights: one (Wp*Cin, W*4F) matrix per vertical tap dy, so the
    # per-row conv over (dx, cin) is a single lane-dense matmul.  Output lane
    # layout: n = gate*(W*F) + w*F + f, gate order i|f|o|g (torch convention).
    w_x = w_conv[:, :C]                       # (4F, C, KH, KW)  x-channel part
    w_h = w_conv[:, C:]                       # (4F, F, KH, KW)  h-channel part
    dx = jnp.arange(Wp)[:, None] - jnp.arange(W)[None, :]            # (Wp, W)
    valid = ((dx >= 0) & (dx < KW)).astype(w_conv.dtype)
    dx_c = jnp.clip(dx, 0, KW - 1)

    def band(wpart, Cin):
        wg = wpart.reshape(4, F, Cin, KH, KW)                        # gate,f,cin,dy,dx
        g = jnp.take(wg, dx_c.reshape(-1), axis=4)
        g = g.reshape(4, F, Cin, KH, Wp, W) * valid[None, None, None, None]
        g = jnp.transpose(g, (3, 4, 2, 0, 5, 1))                     # dy,wp,cin,gate,w,f
        return g.reshape(KH, Wp * Cin, N)

    wx_band = band(w_x, C)                                           # (KH, Wp*C, N)
    wh_band = band(w_h, F)                                           # (KH, Wp*F, N)
    b_band = jnp.broadcast_to(b_conv.reshape(4, 1, F), (4, W, F)).reshape(1, N)

    # FC weight re-indexed from torch's channel-major flatten (f*HW + h*W + w)
    # to per-row (W*F, OUT) blocks consuming h/c in their native (w*F+f) layout.
    wfc_r = jnp.transpose(w_fc.reshape(OUT, F, H, W), (2, 3, 1, 0)).reshape(H, WF, OUT)
    b_fc2 = b_fc.reshape(1, OUT)

    def kernel(x_ref, wx_ref, wh_ref, bconv_ref, wfc_ref, bfc_ref,
               out_ref, hpad_ref, c_ref):
        # Zero the padded-h scratch once: the ring (pad rows / pad lanes) is read
        # by the vertical taps but never written again; the interior is fully
        # overwritten at t==0 before it is first read.
        hpad_ref[...] = jnp.zeros_like(hpad_ref)
        bconv = bconv_ref[...]                                       # (1, N)

        # ----------------- recurrence: static unroll over (T, B) -------------
        for t in range(T):
            x_t = x_ref[t]                                           # (B, Hp, Wp*C)
            h_prev = hpad_ref[...] if t > 0 else None                # (B, Hp, Wp*F)
            for b in range(B):
                acc = jnp.dot(x_t[b, 0:H, :], wx_ref[0],
                              preferred_element_type=jnp.float32)
                for dy in range(1, KH):
                    acc = acc + jnp.dot(x_t[b, dy:dy + H, :], wx_ref[dy],
                                        preferred_element_type=jnp.float32)
                if t > 0:                    # h_{-1} == 0: skip h taps at t==0
                    for dy in range(KH):
                        acc = acc + jnp.dot(h_prev[b, dy:dy + H, :], wh_ref[dy],
                                            preferred_element_type=jnp.float32)
                gates = acc + bconv                                  # (H, 4*WF)
                i_g = jax.nn.sigmoid(gates[:, 0 * WF:1 * WF])
                f_g = jax.nn.sigmoid(gates[:, 1 * WF:2 * WF])
                o_g = jax.nn.sigmoid(gates[:, 2 * WF:3 * WF])
                g_g = jnp.tanh(gates[:, 3 * WF:4 * WF])
                if t == 0:                                           # c_{-1} == 0
                    c_new = i_g * g_g
                else:
                    c_new = f_g * c_ref[b] + i_g * g_g
                h_new = o_g * jnp.tanh(c_new)                        # (H, WF)
                c_ref[b] = c_new
                hpad_ref[b, PH:PH + H, h_lo:h_lo + WF] = h_new

        # ----------------------- fused FC + ReLU head ------------------------
        h_all = hpad_ref[:, PH:PH + H, h_lo:h_lo + WF]               # (B, H, WF)
        c_all = c_ref[...]                                           # (B, H, WF)
        acc_h = jnp.dot(h_all[:, 0, :], wfc_ref[0], preferred_element_type=jnp.float32)
        acc_c = jnp.dot(c_all[:, 0, :], wfc_ref[0], preferred_element_type=jnp.float32)
        for hh in range(1, H):
            wblk = wfc_ref[hh]                                       # (WF, OUT)
            acc_h = acc_h + jnp.dot(h_all[:, hh, :], wblk,
                                    preferred_element_type=jnp.float32)
            acc_c = acc_c + jnp.dot(c_all[:, hh, :], wblk,
                                    preferred_element_type=jnp.float32)
        bfc = bfc_ref[...]
        out_ref[0] = jnp.maximum(acc_h + bfc, 0.0)   # use_LeakyRelu=False -> ReLU
        out_ref[1] = jnp.maximum(acc_c + bfc, 0.0)

    out = pl.pallas_call(
        kernel,
        out_shape=jax.ShapeDtypeStruct((2, B, OUT), jnp.float32),
        grid_spec=pltpu.PrefetchScalarGridSpec(
            num_scalar_prefetch=0,
            grid=(1,),                         # whole sequence, one invocation
            in_specs=[
                pl.BlockSpec((T, B, Hp, KX), lambda i: (0, 0, 0, 0)),
                pl.BlockSpec((KH, KX, N), lambda i: (0, 0, 0)),
                pl.BlockSpec((KH, KHH, N), lambda i: (0, 0, 0)),
                pl.BlockSpec((1, N), lambda i: (0, 0)),
                pl.BlockSpec((H, WF, OUT), lambda i: (0, 0, 0)),
                pl.BlockSpec((1, OUT), lambda i: (0, 0)),
            ],
            out_specs=pl.BlockSpec((2, B, OUT), lambda i: (0, 0, 0)),
            scratch_shapes=[
                pltpu.VMEM((B, Hp, KHH), jnp.float32),  # zero-ringed padded h state
                pltpu.VMEM((B, H, WF), jnp.float32),    # cell state c
            ]),
        compiler_params=pltpu.CompilerParams(
            dimension_semantics=("arbitrary",)),
    )(x_flat, wx_band, wh_band, b_band, wfc_r, b_fc2)

    return out[0], out[1]


def reference_forward(x, w_conv, b_conv, w_fc, b_fc):
    """Pure-JAX reference mirroring the PyTorch ConvLSTM + FC semantics."""
    T, B, C, H, Wd = x.shape
    F = w_conv.shape[0] // 4
    h = jnp.zeros((B, F, H, Wd), jnp.float32)
    c = jnp.zeros((B, F, H, Wd), jnp.float32)
    for t in range(T):
        inp = jnp.concatenate([x[t], h], axis=1)                 # (B, C+F, H, W)
        gates = jax.lax.conv_general_dilated(
            inp, w_conv, window_strides=(1, 1), padding="SAME",
            dimension_numbers=("NCHW", "OIHW", "NCHW"),
            precision=jax.lax.Precision.HIGHEST)
        gates = gates + b_conv[None, :, None, None]
        i_g, f_g, o_g, g_g = jnp.split(gates, 4, axis=1)
        i_g, f_g, o_g = jax.nn.sigmoid(i_g), jax.nn.sigmoid(f_g), jax.nn.sigmoid(o_g)
        g_g = jnp.tanh(g_g)
        c = f_g * c + i_g * g_g
        h = o_g * jnp.tanh(c)
    h_flat = h.reshape(B, -1)
    c_flat = c.reshape(B, -1)
    h_out = jnp.maximum(
        jnp.dot(h_flat, w_fc.T, precision=jax.lax.Precision.HIGHEST) + b_fc[None, :], 0.0)
    c_out = jnp.maximum(
        jnp.dot(c_flat, w_fc.T, precision=jax.lax.Precision.HIGHEST) + b_fc[None, :], 0.0)
    return h_out, c_out


if __name__ == "__main__":
    # Shapes consistent with the module: image_size=(C,H,W)=(4,8,8),
    # num_filters=[8], convLSTM_kernel_size=(3,3), output_size=32, T=4, B=2.
    T, B, C, H, Wd = 4, 2, 4, 8, 8
    F, KH, KW, OUT = 8, 3, 3, 32

    key = jax.random.PRNGKey(0)
    kx, kw1, kb1, kw2, kb2 = jax.random.split(key, 5)
    x = jax.random.normal(kx, (T, B, C, H, Wd), jnp.float32)
    # Deterministic synthetic parameters (PyTorch layouts):
    w_conv = 0.1 * jax.random.normal(kw1, (4 * F, C + F, KH, KW), jnp.float32)
    b_conv = 0.1 * jax.random.normal(kb1, (4 * F,), jnp.float32)
    w_fc = 0.1 * jax.random.normal(kw2, (OUT, F * H * Wd), jnp.float32)
    b_fc = 0.1 * jax.random.normal(kb2, (OUT,), jnp.float32)

    h_out, c_out = context_encoder_forward(x, w_conv, b_conv, w_fc, b_fc)
    jax.block_until_ready((h_out, c_out))

    h_ref, c_ref = reference_forward(x, w_conv, b_conv, w_fc, b_fc)
    assert h_out.shape == (B, OUT) and c_out.shape == (B, OUT)
    assert bool(jnp.allclose(h_out, h_ref, atol=1e-3, rtol=1e-3))
    assert bool(jnp.allclose(c_out, c_ref, atol=1e-3, rtol=1e-3))
    print("KERNEL_OK")
</pallas_src>

<mosaic_0001>
module attributes {stable_mosaic.version = 11 : i64} {
  func.func @kernel(%arg0: i32, %arg1: memref<4x2x10x40xf32, #tpu.memory_space<vmem>>, %arg2: memref<3x40x256xf32, #tpu.memory_space<vmem>>, %arg3: memref<3x80x256xf32, #tpu.memory_space<vmem>>, %arg4: memref<1x256xf32, #tpu.memory_space<vmem>>, %arg5: memref<8x64x32xf32, #tpu.memory_space<vmem>>, %arg6: memref<1x32xf32, #tpu.memory_space<vmem>>, %arg7: memref<2x2x32xf32, #tpu.memory_space<vmem>>, %arg8: memref<2x10x80xf32, #tpu.memory_space<vmem>>, %arg9: memref<2x8x64xf32, #tpu.memory_space<vmem>>) attributes {dimension_semantics = [#tpu.dimension_semantics<arbitrary>], iteration_bounds = array<i64: 1>, scalar_prefetch = 0 : i64, scratch_operands = 2 : i64, tpu.core_type = #tpu.core_type<tc>, window_params = [{pipeline_mode = #tpu.pipeline_mode<synchronous>, transform_indices = @transform_0, window_bounds = array<i64: 4, 2, 10, 40>}, {pipeline_mode = #tpu.pipeline_mode<synchronous>, transform_indices = @transform_1, window_bounds = array<i64: 3, 40, 256>}, {pipeline_mode = #tpu.pipeline_mode<synchronous>, transform_indices = @transform_2, window_bounds = array<i64: 3, 80, 256>}, {pipeline_mode = #tpu.pipeline_mode<synchronous>, transform_indices = @transform_3, window_bounds = array<i64: 1, 256>}, {pipeline_mode = #tpu.pipeline_mode<synchronous>, transform_indices = @transform_4, window_bounds = array<i64: 8, 64, 32>}, {pipeline_mode = #tpu.pipeline_mode<synchronous>, transform_indices = @transform_5, window_bounds = array<i64: 1, 32>}, {pipeline_mode = #tpu.pipeline_mode<synchronous>, transform_indices = @transform_6, window_bounds = array<i64: 2, 2, 32>}]} {
    %cst = arith.constant 0.000000e+00 : f32
    %0 = vector.broadcast %cst : f32 to vector<2x10x80xf32>
    %c0 = arith.constant 0 : index
    %c0_0 = arith.constant 0 : index
    %c0_1 = arith.constant 0 : index
    %1 = vector.load %arg8[%c0, %c0_0, %c0_1] : memref<2x10x80xf32, #tpu.memory_space<vmem>>, vector<2x10x80xf32>
    tpu.vector_store %arg8[%c0, %c0_0, %c0_1], %0 {strides = array<i32>} : memref<2x10x80xf32, #tpu.memory_space<vmem>>, vector<2x10x80xf32>,
    %c0_2 = arith.constant 0 : index
    %c0_3 = arith.constant 0 : index
    %2 = vector.load %arg4[%c0_2, %c0_3] : memref<1x256xf32, #tpu.memory_space<vmem>>, vector<1x256xf32>
    %c0_4 = arith.constant 0 : index
    %c0_5 = arith.constant 0 : index
    %c0_6 = arith.constant 0 : index
    %c0_7 = arith.constant 0 : index
    %3 = vector.load %arg1[%c0_4, %c0_5, %c0_6, %c0_7] : memref<4x2x10x40xf32, #tpu.memory_space<vmem>>, vector<1x2x10x40xf32>
    %4 = vector.shape_cast %3 : vector<1x2x10x40xf32> to vector<2x10x40xf32>
    %5 = vector.extract_strided_slice %4 {offsets = [0, 0, 0], sizes = [1, 8, 40], strides = [1, 1, 1]} : vector<2x10x40xf32> to vector<1x8x40xf32>
    %6 = vector.shape_cast %5 : vector<1x8x40xf32> to vector<8x40xf32>
    %c0_8 = arith.constant 0 : index
    %c0_9 = arith.constant 0 : index
    %c0_10 = arith.constant 0 : index
    %7 = vector.load %arg2[%c0_8, %c0_9, %c0_10] : memref<3x40x256xf32, #tpu.memory_space<vmem>>, vector<1x40x256xf32>
    %8 = vector.shape_cast %7 : vector<1x40x256xf32> to vector<40x256xf32>
    %cst_11 = arith.constant dense<0.000000e+00> : vector<8x256xf32>
    %9 = tpu.matmul %6, %8, %cst_11 {dimension_numbers = #tpu.dot_dimension_numbers<[1], [0], [0], [1], [0, 0, 1, 1], [], []>} : vector<8x40xf32>, vector<40x256xf32>, vector<8x256xf32> -> vector<8x256xf32>
    %10 = vector.extract_strided_slice %4 {offsets = [0, 1, 0], sizes = [1, 8, 40], strides = [1, 1, 1]} : vector<2x10x40xf32> to vector<1x8x40xf32>
    %11 = vector.shape_cast %10 : vector<1x8x40xf32> to vector<8x40xf32>
    %c1 = arith.constant 1 : index
    %c0_12 = arith.constant 0 : index
    %c0_13 = arith.constant 0 : index
    %12 = vector.load %arg2[%c1, %c0_12, %c0_13] : memref<3x40x256xf32, #tpu.memory_space<vmem>>, vector<1x40x256xf32>
    %13 = vector.shape_cast %12 : vector<1x40x256xf32> to vector<40x256xf32>
    %cst_14 = arith.constant dense<0.000000e+00> : vector<8x256xf32>
    %14 = tpu.matmul %11, %13, %cst_14 {dimension_numbers = #tpu.dot_dimension_numbers<[1], [0], [0], [1], [0, 0, 1, 1], [], []>} : vector<8x40xf32>, vector<40x256xf32>, vector<8x256xf32> -> vector<8x256xf32>
    %15 = arith.addf %9, %14 : vector<8x256xf32>
    %16 = vector.extract_strided_slice %4 {offsets = [0, 2, 0], sizes = [1, 8, 40], strides = [1, 1, 1]} : vector<2x10x40xf32> to vector<1x8x40xf32>
    %17 = vector.shape_cast %16 : vector<1x8x40xf32> to vector<8x40xf32>
    %c2 = arith.constant 2 : index
    %c0_15 = arith.constant 0 : index
    %c0_16 = arith.constant 0 : index
    %18 = vector.load %arg2[%c2, %c0_15, %c0_16] : memref<3x40x256xf32, #tpu.memory_space<vmem>>, vector<1x40x256xf32>
    %19 = vector.shape_cast %18 : vector<1x40x256xf32> to vector<40x256xf32>
    %cst_17 = arith.constant dense<0.000000e+00> : vector<8x256xf32>
    %20 = tpu.matmul %17, %19, %cst_17 {dimension_numbers = #tpu.dot_dimension_numbers<[1], [0], [0], [1], [0, 0, 1, 1], [], []>} : vector<8x40xf32>, vector<40x256xf32>, vector<8x256xf32> -> vector<8x256xf32>
    %21 = arith.addf %15, %20 : vector<8x256xf32>
    %22 = vector.broadcast %2 : vector<1x256xf32> to vector<8x256xf32>
    %23 = arith.addf %21, %22 : vector<8x256xf32>
    %24 = vector.extract_strided_slice %23 {offsets = [0, 0], sizes = [8, 64], strides = [1, 1]} : vector<8x256xf32> to vector<8x64xf32>
    %25 = arith.negf %24 : vector<8x64xf32>
    %26 = math.exp %25 : vector<8x64xf32>
    %cst_18 = arith.constant 1.000000e+00 : f32
    %27 = vector.broadcast %cst_18 : f32 to vector<8x64xf32>
    %28 = arith.addf %27, %26 : vector<8x64xf32>
    %29 = arith.divf %27, %28 : vector<8x64xf32>
    %30 = vector.extract_strided_slice %23 {offsets = [0, 128], sizes = [8, 64], strides = [1, 1]} : vector<8x256xf32> to vector<8x64xf32>
    %31 = arith.negf %30 : vector<8x64xf32>
    %32 = math.exp %31 : vector<8x64xf32>
    %cst_19 = arith.constant 1.000000e+00 : f32
    %33 = vector.broadcast %cst_19 : f32 to vector<8x64xf32>
    %34 = arith.addf %33, %32 : vector<8x64xf32>
    %35 = arith.divf %33, %34 : vector<8x64xf32>
    %36 = vector.extract_strided_slice %23 {offsets = [0, 192], sizes = [8, 64], strides = [1, 1]} : vector<8x256xf32> to vector<8x64xf32>
    %37 = math.tanh %36 : vector<8x64xf32>
    %38 = arith.mulf %29, %37 : vector<8x64xf32>
    %39 = math.tanh %38 : vector<8x64xf32>
    %40 = arith.mulf %35, %39 : vector<8x64xf32>
    %c0_20 = arith.constant 0 : index
    %c0_21 = arith.constant 0 : index
    %c0_22 = arith.constant 0 : index
    %41 = vector.load %arg9[%c0_20, %c0_21, %c0_22] : memref<2x8x64xf32, #tpu.memory_space<vmem>>, vector<1x8x64xf32>
    %42 = vector.shape_cast %41 : vector<1x8x64xf32> to vector<8x64xf32>
    %43 = vector.shape_cast %38 : vector<8x64xf32> to vector<1x8x64xf32>
    tpu.vector_store %arg9[%c0_20, %c0_21, %c0_22], %43 {strides = array<i32>} : memref<2x8x64xf32, #tpu.memory_space<vmem>>, vector<1x8x64xf32>,
    %c0_23 = arith.constant 0 : index
    %c1_24 = arith.constant 1 : index
    %c8 = arith.constant 8 : index
    %44 = vector.load %arg8[%c0_23, %c1_24, %c8] : memref<2x10x80xf32, #tpu.memory_space<vmem>>, vector<1x8x64xf32>
    %45 = vector.shape_cast %44 : vector<1x8x64xf32> to vector<8x64xf32>
    %46 = vector.shape_cast %40 : vector<8x64xf32> to vector<1x8x64xf32>
    tpu.vector_store %arg8[%c0_23, %c1_24, %c8], %46 {strides = array<i32>} : memref<2x10x80xf32, #tpu.memory_space<vmem>>, vector<1x8x64xf32>,
    %47 = vector.extract_strided_slice %4 {offsets = [1, 0, 0], sizes = [1, 8, 40], strides = [1, 1, 1]} : vector<2x10x40xf32> to vector<1x8x40xf32>
    %48 = vector.shape_cast %47 : vector<1x8x40xf32> to vector<8x40xf32>
    %c0_25 = arith.constant 0 : index
    %c0_26 = arith.constant 0 : index
    %c0_27 = arith.constant 0 : index
    %49 = vector.load %arg2[%c0_25, %c0_26, %c0_27] : memref<3x40x256xf32, #tpu.memory_space<vmem>>, vector<1x40x256xf32>
    %50 = vector.shape_cast %49 : vector<1x40x256xf32> to vector<40x256xf32>
    %cst_28 = arith.constant dense<0.000000e+00> : vector<8x256xf32>
    %51 = tpu.matmul %48, %50, %cst_28 {dimension_numbers = #tpu.dot_dimension_numbers<[1], [0], [0], [1], [0, 0, 1, 1], [], []>} : vector<8x40xf32>, vector<40x256xf32>, vector<8x256xf32> -> vector<8x256xf32>
    %52 = vector.extract_strided_slice %4 {offsets = [1, 1, 0], sizes = [1, 8, 40], strides = [1, 1, 1]} : vector<2x10x40xf32> to vector<1x8x40xf32>
    %53 = vector.shape_cast %52 : vector<1x8x40xf32> to vector<8x40xf32>
    %c1_29 = arith.constant 1 : index
    %c0_30 = arith.constant 0 : index
    %c0_31 = arith.constant 0 : index
    %54 = vector.load %arg2[%c1_29, %c0_30, %c0_31] : memref<3x40x256xf32, #tpu.memory_space<vmem>>, vector<1x40x256xf32>
    %55 = vector.shape_cast %54 : vector<1x40x256xf32> to vector<40x256xf32>
    %cst_32 = arith.constant dense<0.000000e+00> : vector<8x256xf32>
    %56 = tpu.matmul %53, %55, %cst_32 {dimension_numbers = #tpu.dot_dimension_numbers<[1], [0], [0], [1], [0, 0, 1, 1], [], []>} : vector<8x40xf32>, vector<40x256xf32>, vector<8x256xf32> -> vector<8x256xf32>
    %57 = arith.addf %51, %56 : vector<8x256xf32>
    %58 = vector.extract_strided_slice %4 {offsets = [1, 2, 0], sizes = [1, 8, 40], strides = [1, 1, 1]} : vector<2x10x40xf32> to vector<1x8x40xf32>
    %59 = vector.shape_cast %58 : vector<1x8x40xf32> to vector<8x40xf32>
    %c2_33 = arith.constant 2 : index
    %c0_34 = arith.constant 0 : index
    %c0_35 = arith.constant 0 : index
    %60 = vector.load %arg2[%c2_33, %c0_34, %c0_35] : memref<3x40x256xf32, #tpu.memory_space<vmem>>, vector<1x40x256xf32>
    %61 = vector.shape_cast %60 : vector<1x40x256xf32> to vector<40x256xf32>
    %cst_36 = arith.constant dense<0.000000e+00> : vector<8x256xf32>
    %62 = tpu.matmul %59, %61, %cst_36 {dimension_numbers = #tpu.dot_dimension_numbers<[1], [0], [0], [1], [0, 0, 1, 1], [], []>} : vector<8x40xf32>, vector<40x256xf32>, vector<8x256xf32> -> vector<8x256xf32>
    %63 = arith.addf %57, %62 : vector<8x256xf32>
    %64 = vector.broadcast %2 : vector<1x256xf32> to vector<8x256xf32>
    %65 = arith.addf %63, %64 : vector<8x256xf32>
    %66 = vector.extract_strided_slice %65 {offsets = [0, 0], sizes = [8, 64], strides = [1, 1]} : vector<8x256xf32> to vector<8x64xf32>
    %67 = arith.negf %66 : vector<8x64xf32>
    %68 = math.exp %67 : vector<8x64xf32>
    %cst_37 = arith.constant 1.000000e+00 : f32
    %69 = vector.broadcast %cst_37 : f32 to vector<8x64xf32>
    %70 = arith.addf %69, %68 : vector<8x64xf32>
    %71 = arith.divf %69, %70 : vector<8x64xf32>
    %72 = vector.extract_strided_slice %65 {offsets = [0, 128], sizes = [8, 64], strides = [1, 1]} : vector<8x256xf32> to vector<8x64xf32>
    %73 = arith.negf %72 : vector<8x64xf32>
    %74 = math.exp %73 : vector<8x64xf32>
    %cst_38 = arith.constant 1.000000e+00 : f32
    %75 = vector.broadcast %cst_38 : f32 to vector<8x64xf32>
    %76 = arith.addf %75, %74 : vector<8x64xf32>
    %77 = arith.divf %75, %76 : vector<8x64xf32>
    %78 = vector.extract_strided_slice %65 {offsets = [0, 192], sizes = [8, 64], strides = [1, 1]} : vector<8x256xf32> to vector<8x64xf32>
    %79 = math.tanh %78 : vector<8x64xf32>
    %80 = arith.mulf %71, %79 : vector<8x64xf32>
    %81 = math.tanh %80 : vector<8x64xf32>
    %82 = arith.mulf %77, %81 : vector<8x64xf32>
    %c1_39 = arith.constant 1 : index
    %c0_40 = arith.constant 0 : index
    %c0_41 = arith.constant 0 : index
    %83 = vector.load %arg9[%c1_39, %c0_40, %c0_41] : memref<2x8x64xf32, #tpu.memory_space<vmem>>, vector<1x8x64xf32>
    %84 = vector.shape_cast %83 : vector<1x8x64xf32> to vector<8x64xf32>
    %85 = vector.shape_cast %80 : vector<8x64xf32> to vector<1x8x64xf32>
    tpu.vector_store %arg9[%c1_39, %c0_40, %c0_41], %85 {strides = array<i32>} : memref<2x8x64xf32, #tpu.memory_space<vmem>>, vector<1x8x64xf32>,
    %c1_42 = arith.constant 1 : index
    %c1_43 = arith.constant 1 : index
    %c8_44 = arith.constant 8 : index
    %86 = vector.load %arg8[%c1_42, %c1_43, %c8_44] : memref<2x10x80xf32, #tpu.memory_space<vmem>>, vector<1x8x64xf32>
    %87 = vector.shape_cast %86 : vector<1x8x64xf32> to vector<8x64xf32>
    %88 = vector.shape_cast %82 : vector<8x64xf32> to vector<1x8x64xf32>
    tpu.vector_store %arg8[%c1_42, %c1_43, %c8_44], %88 {strides = array<i32>} : memref<2x10x80xf32, #tpu.memory_space<vmem>>, vector<1x8x64xf32>,
    %c1_45 = arith.constant 1 : index
    %c0_46 = arith.constant 0 : index
    %c0_47 = arith.constant 0 : index
    %c0_48 = arith.constant 0 : index
    %89 = vector.load %arg1[%c1_45, %c0_46, %c0_47, %c0_48] : memref<4x2x10x40xf32, #tpu.memory_space<vmem>>, vector<1x2x10x40xf32>
    %90 = vector.shape_cast %89 : vector<1x2x10x40xf32> to vector<2x10x40xf32>
    %c0_49 = arith.constant 0 : index
    %c0_50 = arith.constant 0 : index
    %c0_51 = arith.constant 0 : index
    %91 = vector.load %arg8[%c0_49, %c0_50, %c0_51] : memref<2x10x80xf32, #tpu.memory_space<vmem>>, vector<2x10x80xf32>
    %92 = vector.extract_strided_slice %90 {offsets = [0, 0, 0], sizes = [1, 8, 40], strides = [1, 1, 1]} : vector<2x10x40xf32> to vector<1x8x40xf32>
    %93 = vector.shape_cast %92 : vector<1x8x40xf32> to vector<8x40xf32>
    %c0_52 = arith.constant 0 : index
    %c0_53 = arith.constant 0 : index
    %c0_54 = arith.constant 0 : index
    %94 = vector.load %arg2[%c0_52, %c0_53, %c0_54] : memref<3x40x256xf32, #tpu.memory_space<vmem>>, vector<1x40x256xf32>
    %95 = vector.shape_cast %94 : vector<1x40x256xf32> to vector<40x256xf32>
    %cst_55 = arith.constant dense<0.000000e+00> : vector<8x256xf32>
    %96 = tpu.matmul %93, %95, %cst_55 {dimension_numbers = #tpu.dot_dimension_numbers<[1], [0], [0], [1], [0, 0, 1, 1], [], []>} : vector<8x40xf32>, vector<40x256xf32>, vector<8x256xf32> -> vector<8x256xf32>
    %97 = vector.extract_strided_slice %90 {offsets = [0, 1, 0], sizes = [1, 8, 40], strides = [1, 1, 1]} : vector<2x10x40xf32> to vector<1x8x40xf32>
    %98 = vector.shape_cast %97 : vector<1x8x40xf32> to vector<8x40xf32>
    %c1_56 = arith.constant 1 : index
    %c0_57 = arith.constant 0 : index
    %c0_58 = arith.constant 0 : index
    %99 = vector.load %arg2[%c1_56, %c0_57, %c0_58] : memref<3x40x256xf32, #tpu.memory_space<vmem>>, vector<1x40x256xf32>
    %100 = vector.shape_cast %99 : vector<1x40x256xf32> to vector<40x256xf32>
    %cst_59 = arith.constant dense<0.000000e+00> : vector<8x256xf32>
    %101 = tpu.matmul %98, %100, %cst_59 {dimension_numbers = #tpu.dot_dimension_numbers<[1], [0], [0], [1], [0, 0, 1, 1], [], []>} : vector<8x40xf32>, vector<40x256xf32>, vector<8x256xf32> -> vector<8x256xf32>
    %102 = arith.addf %96, %101 : vector<8x256xf32>
    %103 = vector.extract_strided_slice %90 {offsets = [0, 2, 0], sizes = [1, 8, 40], strides = [1, 1, 1]} : vector<2x10x40xf32> to vector<1x8x40xf32>
    %104 = vector.shape_cast %103 : vector<1x8x40xf32> to vector<8x40xf32>
    %c2_60 = arith.constant 2 : index
    %c0_61 = arith.constant 0 : index
    %c0_62 = arith.constant 0 : index
    %105 = vector.load %arg2[%c2_60, %c0_61, %c0_62] : memref<3x40x256xf32, #tpu.memory_space<vmem>>, vector<1x40x256xf32>
    %106 = vector.shape_cast %105 : vector<1x40x256xf32> to vector<40x256xf32>
    %cst_63 = arith.constant dense<0.000000e+00> : vector<8x256xf32>
    %107 = tpu.matmul %104, %106, %cst_63 {dimension_numbers = #tpu.dot_dimension_numbers<[1], [0], [0], [1], [0, 0, 1, 1], [], []>} : vector<8x40xf32>, vector<40x256xf32>, vector<8x256xf32> -> vector<8x256xf32>
    %108 = arith.addf %102, %107 : vector<8x256xf32>
    %109 = vector.extract_strided_slice %91 {offsets = [0, 0, 0], sizes = [1, 8, 80], strides = [1, 1, 1]} : vector<2x10x80xf32> to vector<1x8x80xf32>
    %110 = vector.shape_cast %109 : vector<1x8x80xf32> to vector<8x80xf32>
    %c0_64 = arith.constant 0 : index
    %c0_65 = arith.constant 0 : index
    %c0_66 = arith.constant 0 : index
    %111 = vector.load %arg3[%c0_64, %c0_65, %c0_66] : memref<3x80x256xf32, #tpu.memory_space<vmem>>, vector<1x80x256xf32>
    %112 = vector.shape_cast %111 : vector<1x80x256xf32> to vector<80x256xf32>
    %cst_67 = arith.constant dense<0.000000e+00> : vector<8x256xf32>
    %113 = tpu.matmul %110, %112, %cst_67 {dimension_numbers = #tpu.dot_dimension_numbers<[1], [0], [0], [1], [0, 0, 1, 1], [], []>} : vector<8x80xf32>, vector<80x256xf32>, vector<8x256xf32> -> vector<8x256xf32>
    %114 = arith.addf %108, %113 : vector<8x256xf32>
    %115 = vector.extract_strided_slice %91 {offsets = [0, 1, 0], sizes = [1, 8, 80], strides = [1, 1, 1]} : vector<2x10x80xf32> to vector<1x8x80xf32>
    %116 = vector.shape_cast %115 : vector<1x8x80xf32> to vector<8x80xf32>
    %c1_68 = arith.constant 1 : index
    %c0_69 = arith.constant 0 : index
    %c0_70 = arith.constant 0 : index
    %117 = vector.load %arg3[%c1_68, %c0_69, %c0_70] : memref<3x80x256xf32, #tpu.memory_space<vmem>>, vector<1x80x256xf32>
    %118 = vector.shape_cast %117 : vector<1x80x256xf32> to vector<80x256xf32>
    %cst_71 = arith.constant dense<0.000000e+00> : vector<8x256xf32>
    %119 = tpu.matmul %116, %118, %cst_71 {dimension_numbers = #tpu.dot_dimension_numbers<[1], [0], [0], [1], [0, 0, 1, 1], [], []>} : vector<8x80xf32>, vector<80x256xf32>, vector<8x256xf32> -> vector<8x256xf32>
    %120 = arith.addf %114, %119 : vector<8x256xf32>
    %121 = vector.extract_strided_slice %91 {offsets = [0, 2, 0], sizes = [1, 8, 80], strides = [1, 1, 1]} : vector<2x10x80xf32> to vector<1x8x80xf32>
    %122 = vector.shape_cast %121 : vector<1x8x80xf32> to vector<8x80xf32>
    %c2_72 = arith.constant 2 : index
    %c0_73 = arith.constant 0 : index
    %c0_74 = arith.constant 0 : index
    %123 = vector.load %arg3[%c2_72, %c0_73, %c0_74] : memref<3x80x256xf32, #tpu.memory_space<vmem>>, vector<1x80x256xf32>
    %124 = vector.shape_cast %123 : vector<1x80x256xf32> to vector<80x256xf32>
    %cst_75 = arith.constant dense<0.000000e+00> : vector<8x256xf32>
    %125 = tpu.matmul %122, %124, %cst_75 {dimension_numbers = #tpu.dot_dimension_numbers<[1], [0], [0], [1], [0, 0, 1, 1], [], []>} : vector<8x80xf32>, vector<80x256xf32>, vector<8x256xf32> -> vector<8x256xf32>
    %126 = arith.addf %120, %125 : vector<8x256xf32>
    %127 = vector.broadcast %2 : vector<1x256xf32> to vector<8x256xf32>
    %128 = arith.addf %126, %127 : vector<8x256xf32>
    %129 = vector.extract_strided_slice %128 {offsets = [0, 0], sizes = [8, 64], strides = [1, 1]} : vector<8x256xf32> to vector<8x64xf32>
    %130 = arith.negf %129 : vector<8x64xf32>
    %131 = math.exp %130 : vector<8x64xf32>
    %cst_76 = arith.constant 1.000000e+00 : f32
    %132 = vector.broadcast %cst_76 : f32 to vector<8x64xf32>
    %133 = arith.addf %132, %131 : vector<8x64xf32>
    %134 = arith.divf %132, %133 : vector<8x64xf32>
    %135 = vector.extract_strided_slice %128 {offsets = [0, 64], sizes = [8, 64], strides = [1, 1]} : vector<8x256xf32> to vector<8x64xf32>
    %136 = arith.negf %135 : vector<8x64xf32>
    %137 = math.exp %136 : vector<8x64xf32>
    %cst_77 = arith.constant 1.000000e+00 : f32
    %138 = vector.broadcast %cst_77 : f32 to vector<8x64xf32>
    %139 = arith.addf %138, %137 : vector<8x64xf32>
    %140 = arith.divf %138, %139 : vector<8x64xf32>
    %141 = vector.extract_strided_slice %128 {offsets = [0, 128], sizes = [8, 64], strides = [1, 1]} : vector<8x256xf32> to vector<8x64xf32>
    %142 = arith.negf %141 : vector<8x64xf32>
    %143 = math.exp %142 : vector<8x64xf32>
    %cst_78 = arith.constant 1.000000e+00 : f32
    %144 = vector.broadcast %cst_78 : f32 to vector<8x64xf32>
    %145 = arith.addf %144, %143 : vector<8x64xf32>
    %146 = arith.divf %144, %145 : vector<8x64xf32>
    %147 = vector.extract_strided_slice %128 {offsets = [0, 192], sizes = [8, 64], strides = [1, 1]} : vector<8x256xf32> to vector<8x64xf32>
    %148 = math.tanh %147 : vector<8x64xf32>
    %c0_79 = arith.constant 0 : index
    %c0_80 = arith.constant 0 : index
    %c0_81 = arith.constant 0 : index
    %149 = vector.load %arg9[%c0_79, %c0_80, %c0_81] : memref<2x8x64xf32, #tpu.memory_space<vmem>>, vector<1x8x64xf32>
    %150 = vector.shape_cast %149 : vector<1x8x64xf32> to vector<8x64xf32>
    %151 = arith.mulf %140, %150 : vector<8x64xf32>
    %152 = arith.mulf %134, %148 : vector<8x64xf32>
    %153 = arith.addf %151, %152 : vector<8x64xf32>
    %154 = math.tanh %153 : vector<8x64xf32>
    %155 = arith.mulf %146, %154 : vector<8x64xf32>
    %c0_82 = arith.constant 0 : index
    %c0_83 = arith.constant 0 : index
    %c0_84 = arith.constant 0 : index
    %156 = vector.load %arg9[%c0_82, %c0_83, %c0_84] : memref<2x8x64xf32, #tpu.memory_space<vmem>>, vector<1x8x64xf32>
    %157 = vector.shape_cast %156 : vector<1x8x64xf32> to vector<8x64xf32>
    %158 = vector.shape_cast %153 : vector<8x64xf32> to vector<1x8x64xf32>
    tpu.vector_store %arg9[%c0_82, %c0_83, %c0_84], %158 {strides = array<i32>} : memref<2x8x64xf32, #tpu.memory_space<vmem>>, vector<1x8x64xf32>,
    %c0_85 = arith.constant 0 : index
    %c1_86 = arith.constant 1 : index
    %c8_87 = arith.constant 8 : index
    %159 = vector.load %arg8[%c0_85, %c1_86, %c8_87] : memref<2x10x80xf32, #tpu.memory_space<vmem>>, vector<1x8x64xf32>
    %160 = vector.shape_cast %159 : vector<1x8x64xf32> to vector<8x64xf32>
    %161 = vector.shape_cast %155 : vector<8x64xf32> to vector<1x8x64xf32>
    tpu.vector_store %arg8[%c0_85, %c1_86, %c8_87], %161 {strides = array<i32>} : memref<2x10x80xf32, #tpu.memory_space<vmem>>, vector<1x8x64xf32>,
    %162 = vector.extract_strided_slice %90 {offsets = [1, 0, 0], sizes = [1, 8, 40], strides = [1, 1, 1]} : vector<2x10x40xf32> to vector<1x8x40xf32>
    %163 = vector.shape_cast %162 : vector<1x8x40xf32> to vector<8x40xf32>
    %c0_88 = arith.constant 0 : index
    %c0_89 = arith.constant 0 : index
    %c0_90 = arith.constant 0 : index
    %164 = vector.load %arg2[%c0_88, %c0_89, %c0_90] : memref<3x40x256xf32, #tpu.memory_space<vmem>>, vector<1x40x256xf32>
    %165 = vector.shape_cast %164 : vector<1x40x256xf32> to vector<40x256xf32>
    %cst_91 = arith.constant dense<0.000000e+00> : vector<8x256xf32>
    %166 = tpu.matmul %163, %165, %cst_91 {dimension_numbers = #tpu.dot_dimension_numbers<[1], [0], [0], [1], [0, 0, 1, 1], [], []>} : vector<8x40xf32>, vector<40x256xf32>, vector<8x256xf32> -> vector<8x256xf32>
    %167 = vector.extract_strided_slice %90 {offsets = [1, 1, 0], sizes = [1, 8, 40], strides = [1, 1, 1]} : vector<2x10x40xf32> to vector<1x8x40xf32>
    %168 = vector.shape_cast %167 : vector<1x8x40xf32> to vector<8x40xf32>
    %c1_92 = arith.constant 1 : index
    %c0_93 = arith.constant 0 : index
    %c0_94 = arith.constant 0 : index
    %169 = vector.load %arg2[%c1_92, %c0_93, %c0_94] : memref<3x40x256xf32, #tpu.memory_space<vmem>>, vector<1x40x256xf32>
    %170 = vector.shape_cast %169 : vector<1x40x256xf32> to vector<40x256xf32>
    %cst_95 = arith.constant dense<0.000000e+00> : vector<8x256xf32>
    %171 = tpu.matmul %168, %170, %cst_95 {dimension_numbers = #tpu.dot_dimension_numbers<[1], [0], [0], [1], [0, 0, 1, 1], [], []>} : vector<8x40xf32>, vector<40x256xf32>, vector<8x256xf32> -> vector<8x256xf32>
    %172 = arith.addf %166, %171 : vector<8x256xf32>
    %173 = vector.extract_strided_slice %90 {offsets = [1, 2, 0], sizes = [1, 8, 40], strides = [1, 1, 1]} : vector<2x10x40xf32> to vector<1x8x40xf32>
    %174 = vector.shape_cast %173 : vector<1x8x40xf32> to vector<8x40xf32>
    %c2_96 = arith.constant 2 : index
    %c0_97 = arith.constant 0 : index
    %c0_98 = arith.constant 0 : index
    %175 = vector.load %arg2[%c2_96, %c0_97, %c0_98] : memref<3x40x256xf32, #tpu.memory_space<vmem>>, vector<1x40x256xf32>
    %176 = vector.shape_cast %175 : vector<1x40x256xf32> to vector<40x256xf32>
    %cst_99 = arith.constant dense<0.000000e+00> : vector<8x256xf32>
    %177 = tpu.matmul %174, %176, %cst_99 {dimension_numbers = #tpu.dot_dimension_numbers<[1], [0], [0], [1], [0, 0, 1, 1], [], []>} : vector<8x40xf32>, vector<40x256xf32>, vector<8x256xf32> -> vector<8x256xf32>
    %178 = arith.addf %172, %177 : vector<8x256xf32>
    %179 = vector.extract_strided_slice %91 {offsets = [1, 0, 0], sizes = [1, 8, 80], strides = [1, 1, 1]} : vector<2x10x80xf32> to vector<1x8x80xf32>
    %180 = vector.shape_cast %179 : vector<1x8x80xf32> to vector<8x80xf32>
    %c0_100 = arith.constant 0 : index
    %c0_101 = arith.constant 0 : index
    %c0_102 = arith.constant 0 : index
    %181 = vector.load %arg3[%c0_100, %c0_101, %c0_102] : memref<3x80x256xf32, #tpu.memory_space<vmem>>, vector<1x80x256xf32>
    %182 = vector.shape_cast %181 : vector<1x80x256xf32> to vector<80x256xf32>
    %cst_103 = arith.constant dense<0.000000e+00> : vector<8x256xf32>
    %183 = tpu.matmul %180, %182, %cst_103 {dimension_numbers = #tpu.dot_dimension_numbers<[1], [0], [0], [1], [0, 0, 1, 1], [], []>} : vector<8x80xf32>, vector<80x256xf32>, vector<8x256xf32> -> vector<8x256xf32>
    %184 = arith.addf %178, %183 : vector<8x256xf32>
    %185 = vector.extract_strided_slice %91 {offsets = [1, 1, 0], sizes = [1, 8, 80], strides = [1, 1, 1]} : vector<2x10x80xf32> to vector<1x8x80xf32>
    %186 = vector.shape_cast %185 : vector<1x8x80xf32> to vector<8x80xf32>
    %c1_104 = arith.constant 1 : index
    %c0_105 = arith.constant 0 : index
    %c0_106 = arith.constant 0 : index
    %187 = vector.load %arg3[%c1_104, %c0_105, %c0_106] : memref<3x80x256xf32, #tpu.memory_space<vmem>>, vector<1x80x256xf32>
    %188 = vector.shape_cast %187 : vector<1x80x256xf32> to vector<80x256xf32>
    %cst_107 = arith.constant dense<0.000000e+00> : vector<8x256xf32>
    %189 = tpu.matmul %186, %188, %cst_107 {dimension_numbers = #tpu.dot_dimension_numbers<[1], [0], [0], [1], [0, 0, 1, 1], [], []>} : vector<8x80xf32>, vector<80x256xf32>, vector<8x256xf32> -> vector<8x256xf32>
    %190 = arith.addf %184, %189 : vector<8x256xf32>
    %191 = vector.extract_strided_slice %91 {offsets = [1, 2, 0], sizes = [1, 8, 80], strides = [1, 1, 1]} : vector<2x10x80xf32> to vector<1x8x80xf32>
    %192 = vector.shape_cast %191 : vector<1x8x80xf32> to vector<8x80xf32>
    %c2_108 = arith.constant 2 : index
    %c0_109 = arith.constant 0 : index
    %c0_110 = arith.constant 0 : index
    %193 = vector.load %arg3[%c2_108, %c0_109, %c0_110] : memref<3x80x256xf32, #tpu.memory_space<vmem>>, vector<1x80x256xf32>
    %194 = vector.shape_cast %193 : vector<1x80x256xf32> to vector<80x256xf32>
    %cst_111 = arith.constant dense<0.000000e+00> : vector<8x256xf32>
    %195 = tpu.matmul %192, %194, %cst_111 {dimension_numbers = #tpu.dot_dimension_numbers<[1], [0], [0], [1], [0, 0, 1, 1], [], []>} : vector<8x80xf32>, vector<80x256xf32>, vector<8x256xf32> -> vector<8x256xf32>
    %196 = arith.addf %190, %195 : vector<8x256xf32>
    %197 = vector.broadcast %2 : vector<1x256xf32> to vector<8x256xf32>
    %198 = arith.addf %196, %197 : vector<8x256xf32>
    %199 = vector.extract_strided_slice %198 {offsets = [0, 0], sizes = [8, 64], strides = [1, 1]} : vector<8x256xf32> to vector<8x64xf32>
    %200 = arith.negf %199 : vector<8x64xf32>
    %201 = math.exp %200 : vector<8x64xf32>
    %cst_112 = arith.constant 1.000000e+00 : f32
    %202 = vector.broadcast %cst_112 : f32 to vector<8x64xf32>
    %203 = arith.addf %202, %201 : vector<8x64xf32>
    %204 = arith.divf %202, %203 : vector<8x64xf32>
    %205 = vector.extract_strided_slice %198 {offsets = [0, 64], sizes = [8, 64], strides = [1, 1]} : vector<8x256xf32> to vector<8x64xf32>
    %206 = arith.negf %205 : vector<8x64xf32>
    %207 = math.exp %206 : vector<8x64xf32>
    %cst_113 = arith.constant 1.000000e+00 : f32
    %208 = vector.broadcast %cst_113 : f32 to vector<8x64xf32>
    %209 = arith.addf %208, %207 : vector<8x64xf32>
    %210 = arith.divf %208, %209 : vector<8x64xf32>
    %211 = vector.extract_strided_slice %198 {offsets = [0, 128], sizes = [8, 64], strides = [1, 1]} : vector<8x256xf32> to vector<8x64xf32>
    %212 = arith.negf %211 : vector<8x64xf32>
    %213 = math.exp %212 : vector<8x64xf32>
    %cst_114 = arith.constant 1.000000e+00 : f32
    %214 = vector.broadcast %cst_114 : f32 to vector<8x64xf32>
    %215 = arith.addf %214, %213 : vector<8x64xf32>
    %216 = arith.divf %214, %215 : vector<8x64xf32>
    %217 = vector.extract_strided_slice %198 {offsets = [0, 192], sizes = [8, 64], strides = [1, 1]} : vector<8x256xf32> to vector<8x64xf32>
    %218 = math.tanh %217 : vector<8x64xf32>
    %c1_115 = arith.constant 1 : index
    %c0_116 = arith.constant 0 : index
    %c0_117 = arith.constant 0 : index
    %219 = vector.load %arg9[%c1_115, %c0_116, %c0_117] : memref<2x8x64xf32, #tpu.memory_space<vmem>>, vector<1x8x64xf32>
    %220 = vector.shape_cast %219 : vector<1x8x64xf32> to vector<8x64xf32>
    %221 = arith.mulf %210, %220 : vector<8x64xf32>
    %222 = arith.mulf %204, %218 : vector<8x64xf32>
    %223 = arith.addf %221, %222 : vector<8x64xf32>
    %224 = math.tanh %223 : vector<8x64xf32>
    %225 = arith.mulf %216, %224 : vector<8x64xf32>
    %c1_118 = arith.constant 1 : index
    %c0_119 = arith.constant 0 : index
    %c0_120 = arith.constant 0 : index
    %226 = vector.load %arg9[%c1_118, %c0_119, %c0_120] : memref<2x8x64xf32, #tpu.memory_space<vmem>>, vector<1x8x64xf32>
    %227 = vector.shape_cast %226 : vector<1x8x64xf32> to vector<8x64xf32>
    %228 = vector.shape_cast %223 : vector<8x64xf32> to vector<1x8x64xf32>
    tpu.vector_store %arg9[%c1_118, %c0_119, %c0_120], %228 {strides = array<i32>} : memref<2x8x64xf32, #tpu.memory_space<vmem>>, vector<1x8x64xf32>,
    %c1_121 = arith.constant 1 : index
    %c1_122 = arith.constant 1 : index
    %c8_123 = arith.constant 8 : index
    %229 = vector.load %arg8[%c1_121, %c1_122, %c8_123] : memref<2x10x80xf32, #tpu.memory_space<vmem>>, vector<1x8x64xf32>
    %230 = vector.shape_cast %229 : vector<1x8x64xf32> to vector<8x64xf32>
    %231 = vector.shape_cast %225 : vector<8x64xf32> to vector<1x8x64xf32>
    tpu.vector_store %arg8[%c1_121, %c1_122, %c8_123], %231 {strides = array<i32>} : memref<2x10x80xf32, #tpu.memory_space<vmem>>, vector<1x8x64xf32>,
    %c2_124 = arith.constant 2 : index
    %c0_125 = arith.constant 0 : index
    %c0_126 = arith.constant 0 : index
    %c0_127 = arith.constant 0 : index
    %232 = vector.load %arg1[%c2_124, %c0_125, %c0_126, %c0_127] : memref<4x2x10x40xf32, #tpu.memory_space<vmem>>, vector<1x2x10x40xf32>
    %233 = vector.shape_cast %232 : vector<1x2x10x40xf32> to vector<2x10x40xf32>
    %c0_128 = arith.constant 0 : index
    %c0_129 = arith.constant 0 : index
    %c0_130 = arith.constant 0 : index
    %234 = vector.load %arg8[%c0_128, %c0_129, %c0_130] : memref<2x10x80xf32, #tpu.memory_space<vmem>>, vector<2x10x80xf32>
    %235 = vector.extract_strided_slice %233 {offsets = [0, 0, 0], sizes = [1, 8, 40], strides = [1, 1, 1]} : vector<2x10x40xf32> to vector<1x8x40xf32>
    %236 = vector.shape_cast %235 : vector<1x8x40xf32> to vector<8x40xf32>
    %c0_131 = arith.constant 0 : index
    %c0_132 = arith.constant 0 : index
    %c0_133 = arith.constant 0 : index
    %237 = vector.load %arg2[%c0_131, %c0_132, %c0_133] : memref<3x40x256xf32, #tpu.memory_space<vmem>>, vector<1x40x256xf32>
    %238 = vector.shape_cast %237 : vector<1x40x256xf32> to vector<40x256xf32>
    %cst_134 = arith.constant dense<0.000000e+00> : vector<8x256xf32>
    %239 = tpu.matmul %236, %238, %cst_134 {dimension_numbers = #tpu.dot_dimension_numbers<[1], [0], [0], [1], [0, 0, 1, 1], [], []>} : vector<8x40xf32>, vector<40x256xf32>, vector<8x256xf32> -> vector<8x256xf32>
    %240 = vector.extract_strided_slice %233 {offsets = [0, 1, 0], sizes = [1, 8, 40], strides = [1, 1, 1]} : vector<2x10x40xf32> to vector<1x8x40xf32>
    %241 = vector.shape_cast %240 : vector<1x8x40xf32> to vector<8x40xf32>
    %c1_135 = arith.constant 1 : index
    %c0_136 = arith.constant 0 : index
    %c0_137 = arith.constant 0 : index
    %242 = vector.load %arg2[%c1_135, %c0_136, %c0_137] : memref<3x40x256xf32, #tpu.memory_space<vmem>>, vector<1x40x256xf32>
    %243 = vector.shape_cast %242 : vector<1x40x256xf32> to vector<40x256xf32>
    %cst_138 = arith.constant dense<0.000000e+00> : vector<8x256xf32>
    %244 = tpu.matmul %241, %243, %cst_138 {dimension_numbers = #tpu.dot_dimension_numbers<[1], [0], [0], [1], [0, 0, 1, 1], [], []>} : vector<8x40xf32>, vector<40x256xf32>, vector<8x256xf32> -> vector<8x256xf32>
    %245 = arith.addf %239, %244 : vector<8x256xf32>
    %246 = vector.extract_strided_slice %233 {offsets = [0, 2, 0], sizes = [1, 8, 40], strides = [1, 1, 1]} : vector<2x10x40xf32> to vector<1x8x40xf32>
    %247 = vector.shape_cast %246 : vector<1x8x40xf32> to vector<8x40xf32>
    %c2_139 = arith.constant 2 : index
    %c0_140 = arith.constant 0 : index
    %c0_141 = arith.constant 0 : index
    %248 = vector.load %arg2[%c2_139, %c0_140, %c0_141] : memref<3x40x256xf32, #tpu.memory_space<vmem>>, vector<1x40x256xf32>
    %249 = vector.shape_cast %248 : vector<1x40x256xf32> to vector<40x256xf32>
    %cst_142 = arith.constant dense<0.000000e+00> : vector<8x256xf32>
    %250 = tpu.matmul %247, %249, %cst_142 {dimension_numbers = #tpu.dot_dimension_numbers<[1], [0], [0], [1], [0, 0, 1, 1], [], []>} : vector<8x40xf32>, vector<40x256xf32>, vector<8x256xf32> -> vector<8x256xf32>
    %251 = arith.addf %245, %250 : vector<8x256xf32>
    %252 = vector.extract_strided_slice %234 {offsets = [0, 0, 0], sizes = [1, 8, 80], strides = [1, 1, 1]} : vector<2x10x80xf32> to vector<1x8x80xf32>
    %253 = vector.shape_cast %252 : vector<1x8x80xf32> to vector<8x80xf32>
    %c0_143 = arith.constant 0 : index
    %c0_144 = arith.constant 0 : index
    %c0_145 = arith.constant 0 : index
    %254 = vector.load %arg3[%c0_143, %c0_144, %c0_145] : memref<3x80x256xf32, #tpu.memory_space<vmem>>, vector<1x80x256xf32>
    %255 = vector.shape_cast %254 : vector<1x80x256xf32> to vector<80x256xf32>
    %cst_146 = arith.constant dense<0.000000e+00> : vector<8x256xf32>
    %256 = tpu.matmul %253, %255, %cst_146 {dimension_numbers = #tpu.dot_dimension_numbers<[1], [0], [0], [1], [0, 0, 1, 1], [], []>} : vector<8x80xf32>, vector<80x256xf32>, vector<8x256xf32> -> vector<8x256xf32>
    %257 = arith.addf %251, %256 : vector<8x256xf32>
    %258 = vector.extract_strided_slice %234 {offsets = [0, 1, 0], sizes = [1, 8, 80], strides = [1, 1, 1]} : vector<2x10x80xf32> to vector<1x8x80xf32>
    %259 = vector.shape_cast %258 : vector<1x8x80xf32> to vector<8x80xf32>
    %c1_147 = arith.constant 1 : index
    %c0_148 = arith.constant 0 : index
    %c0_149 = arith.constant 0 : index
    %260 = vector.load %arg3[%c1_147, %c0_148, %c0_149] : memref<3x80x256xf32, #tpu.memory_space<vmem>>, vector<1x80x256xf32>
    %261 = vector.shape_cast %260 : vector<1x80x256xf32> to vector<80x256xf32>
    %cst_150 = arith.constant dense<0.000000e+00> : vector<8x256xf32>
    %262 = tpu.matmul %259, %261, %cst_150 {dimension_numbers = #tpu.dot_dimension_numbers<[1], [0], [0], [1], [0, 0, 1, 1], [], []>} : vector<8x80xf32>, vector<80x256xf32>, vector<8x256xf32> -> vector<8x256xf32>
    %263 = arith.addf %257, %262 : vector<8x256xf32>
    %264 = vector.extract_strided_slice %234 {offsets = [0, 2, 0], sizes = [1, 8, 80], strides = [1, 1, 1]} : vector<2x10x80xf32> to vector<1x8x80xf32>
    %265 = vector.shape_cast %264 : vector<1x8x80xf32> to vector<8x80xf32>
    %c2_151 = arith.constant 2 : index
    %c0_152 = arith.constant 0 : index
    %c0_153 = arith.constant 0 : index
    %266 = vector.load %arg3[%c2_151, %c0_152, %c0_153] : memref<3x80x256xf32, #tpu.memory_space<vmem>>, vector<1x80x256xf32>
    %267 = vector.shape_cast %266 : vector<1x80x256xf32> to vector<80x256xf32>
    %cst_154 = arith.constant dense<0.000000e+00> : vector<8x256xf32>
    %268 = tpu.matmul %265, %267, %cst_154 {dimension_numbers = #tpu.dot_dimension_numbers<[1], [0], [0], [1], [0, 0, 1, 1], [], []>} : vector<8x80xf32>, vector<80x256xf32>, vector<8x256xf32> -> vector<8x256xf32>
    %269 = arith.addf %263, %268 : vector<8x256xf32>
    %270 = vector.broadcast %2 : vector<1x256xf32> to vector<8x256xf32>
    %271 = arith.addf %269, %270 : vector<8x256xf32>
    %272 = vector.extract_strided_slice %271 {offsets = [0, 0], sizes = [8, 64], strides = [1, 1]} : vector<8x256xf32> to vector<8x64xf32>
    %273 = arith.negf %272 : vector<8x64xf32>
    %274 = math.exp %273 : vector<8x64xf32>
    %cst_155 = arith.constant 1.000000e+00 : f32
    %275 = vector.broadcast %cst_155 : f32 to vector<8x64xf32>
    %276 = arith.addf %275, %274 : vector<8x64xf32>
    %277 = arith.divf %275, %276 : vector<8x64xf32>
    %278 = vector.extract_strided_slice %271 {offsets = [0, 64], sizes = [8, 64], strides = [1, 1]} : vector<8x256xf32> to vector<8x64xf32>
    %279 = arith.negf %278 : vector<8x64xf32>
    %280 = math.exp %279 : vector<8x64xf32>
    %cst_156 = arith.constant 1.000000e+00 : f32
    %281 = vector.broadcast %cst_156 : f32 to vector<8x64xf32>
    %282 = arith.addf %281, %280 : vector<8x64xf32>
    %283 = arith.divf %281, %282 : vector<8x64xf32>
    %284 = vector.extract_strided_slice %271 {offsets = [0, 128], sizes = [8, 64], strides = [1, 1]} : vector<8x256xf32> to vector<8x64xf32>
    %285 = arith.negf %284 : vector<8x64xf32>
    %286 = math.exp %285 : vector<8x64xf32>
    %cst_157 = arith.constant 1.000000e+00 : f32
    %287 = vector.broadcast %cst_157 : f32 to vector<8x64xf32>
    %288 = arith.addf %287, %286 : vector<8x64xf32>
    %289 = arith.divf %287, %288 : vector<8x64xf32>
    %290 = vector.extract_strided_slice %271 {offsets = [0, 192], sizes = [8, 64], strides = [1, 1]} : vector<8x256xf32> to vector<8x64xf32>
    %291 = math.tanh %290 : vector<8x64xf32>
    %c0_158 = arith.constant 0 : index
    %c0_159 = arith.constant 0 : index
    %c0_160 = arith.constant 0 : index
    %292 = vector.load %arg9[%c0_158, %c0_159, %c0_160] : memref<2x8x64xf32, #tpu.memory_space<vmem>>, vector<1x8x64xf32>
    %293 = vector.shape_cast %292 : vector<1x8x64xf32> to vector<8x64xf32>
    %294 = arith.mulf %283, %293 : vector<8x64xf32>
    %295 = arith.mulf %277, %291 : vector<8x64xf32>
    %296 = arith.addf %294, %295 : vector<8x64xf32>
    %297 = math.tanh %296 : vector<8x64xf32>
    %298 = arith.mulf %289, %297 : vector<8x64xf32>
    %c0_161 = arith.constant 0 : index
    %c0_162 = arith.constant 0 : index
    %c0_163 = arith.constant 0 : index
    %299 = vector.load %arg9[%c0_161, %c0_162, %c0_163] : memref<2x8x64xf32, #tpu.memory_space<vmem>>, vector<1x8x64xf32>
    %300 = vector.shape_cast %299 : vector<1x8x64xf32> to vector<8x64xf32>
    %301 = vector.shape_cast %296 : vector<8x64xf32> to vector<1x8x64xf32>
    tpu.vector_store %arg9[%c0_161, %c0_162, %c0_163], %301 {strides = array<i32>} : memref<2x8x64xf32, #tpu.memory_space<vmem>>, vector<1x8x64xf32>,
    %c0_164 = arith.constant 0 : index
    %c1_165 = arith.constant 1 : index
    %c8_166 = arith.constant 8 : index
    %302 = vector.load %arg8[%c0_164, %c1_165, %c8_166] : memref<2x10x80xf32, #tpu.memory_space<vmem>>, vector<1x8x64xf32>
    %303 = vector.shape_cast %302 : vector<1x8x64xf32> to vector<8x64xf32>
    %304 = vector.shape_cast %298 : vector<8x64xf32> to vector<1x8x64xf32>
    tpu.vector_store %arg8[%c0_164, %c1_165, %c8_166], %304 {strides = array<i32>} : memref<2x10x80xf32, #tpu.memory_space<vmem>>, vector<1x8x64xf32>,
    %305 = vector.extract_strided_slice %233 {offsets = [1, 0, 0], sizes = [1, 8, 40], strides = [1, 1, 1]} : vector<2x10x40xf32> to vector<1x8x40xf32>
    %306 = vector.shape_cast %305 : vector<1x8x40xf32> to vector<8x40xf32>
    %c0_167 = arith.constant 0 : index
    %c0_168 = arith.constant 0 : index
    %c0_169 = arith.constant 0 : index
    %307 = vector.load %arg2[%c0_167, %c0_168, %c0_169] : memref<3x40x256xf32, #tpu.memory_space<vmem>>, vector<1x40x256xf32>
    %308 = vector.shape_cast %307 : vector<1x40x256xf32> to vector<40x256xf32>
    %cst_170 = arith.constant dense<0.000000e+00> : vector<8x256xf32>
    %309 = tpu.matmul %306, %308, %cst_170 {dimension_numbers = #tpu.dot_dimension_numbers<[1], [0], [0], [1], [0, 0, 1, 1], [], []>} : vector<8x40xf32>, vector<40x256xf32>, vector<8x256xf32> -> vector<8x256xf32>
    %310 = vector.extract_strided_slice %233 {offsets = [1, 1, 0], sizes = [1, 8, 40], strides = [1, 1, 1]} : vector<2x10x40xf32> to vector<1x8x40xf32>
    %311 = vector.shape_cast %310 : vector<1x8x40xf32> to vector<8x40xf32>
    %c1_171 = arith.constant 1 : index
    %c0_172 = arith.constant 0 : index
    %c0_173 = arith.constant 0 : index
    %312 = vector.load %arg2[%c1_171, %c0_172, %c0_173] : memref<3x40x256xf32, #tpu.memory_space<vmem>>, vector<1x40x256xf32>
    %313 = vector.shape_cast %312 : vector<1x40x256xf32> to vector<40x256xf32>
    %cst_174 = arith.constant dense<0.000000e+00> : vector<8x256xf32>
    %314 = tpu.matmul %311, %313, %cst_174 {dimension_numbers = #tpu.dot_dimension_numbers<[1], [0], [0], [1], [0, 0, 1, 1], [], []>} : vector<8x40xf32>, vector<40x256xf32>, vector<8x256xf32> -> vector<8x256xf32>
    %315 = arith.addf %309, %314 : vector<8x256xf32>
    %316 = vector.extract_strided_slice %233 {offsets = [1, 2, 0], sizes = [1, 8, 40], strides = [1, 1, 1]} : vector<2x10x40xf32> to vector<1x8x40xf32>
    %317 = vector.shape_cast %316 : vector<1x8x40xf32> to vector<8x40xf32>
    %c2_175 = arith.constant 2 : index
    %c0_176 = arith.constant 0 : index
    %c0_177 = arith.constant 0 : index
    %318 = vector.load %arg2[%c2_175, %c0_176, %c0_177] : memref<3x40x256xf32, #tpu.memory_space<vmem>>, vector<1x40x256xf32>
    %319 = vector.shape_cast %318 : vector<1x40x256xf32> to vector<40x256xf32>
    %cst_178 = arith.constant dense<0.000000e+00> : vector<8x256xf32>
    %320 = tpu.matmul %317, %319, %cst_178 {dimension_numbers = #tpu.dot_dimension_numbers<[1], [0], [0], [1], [0, 0, 1, 1], [], []>} : vector<8x40xf32>, vector<40x256xf32>, vector<8x256xf32> -> vector<8x256xf32>
    %321 = arith.addf %315, %320 : vector<8x256xf32>
    %322 = vector.extract_strided_slice %234 {offsets = [1, 0, 0], sizes = [1, 8, 80], strides = [1, 1, 1]} : vector<2x10x80xf32> to vector<1x8x80xf32>
    %323 = vector.shape_cast %322 : vector<1x8x80xf32> to vector<8x80xf32>
    %c0_179 = arith.constant 0 : index
    %c0_180 = arith.constant 0 : index
    %c0_181 = arith.constant 0 : index
    %324 = vector.load %arg3[%c0_179, %c0_180, %c0_181] : memref<3x80x256xf32, #tpu.memory_space<vmem>>, vector<1x80x256xf32>
    %325 = vector.shape_cast %324 : vector<1x80x256xf32> to vector<80x256xf32>
    %cst_182 = arith.constant dense<0.000000e+00> : vector<8x256xf32>
    %326 = tpu.matmul %323, %325, %cst_182 {dimension_numbers = #tpu.dot_dimension_numbers<[1], [0], [0], [1], [0, 0, 1, 1], [], []>} : vector<8x80xf32>, vector<80x256xf32>, vector<8x256xf32> -> vector<8x256xf32>
    %327 = arith.addf %321, %326 : vector<8x256xf32>
    %328 = vector.extract_strided_slice %234 {offsets = [1, 1, 0], sizes = [1, 8, 80], strides = [1, 1, 1]} : vector<2x10x80xf32> to vector<1x8x80xf32>
    %329 = vector.shape_cast %328 : vector<1x8x80xf32> to vector<8x80xf32>
    %c1_183 = arith.constant 1 : index
    %c0_184 = arith.constant 0 : index
    %c0_185 = arith.constant 0 : index
    %330 = vector.load %arg3[%c1_183, %c0_184, %c0_185] : memref<3x80x256xf32, #tpu.memory_space<vmem>>, vector<1x80x256xf32>
    %331 = vector.shape_cast %330 : vector<1x80x256xf32> to vector<80x256xf32>
    %cst_186 = arith.constant dense<0.000000e+00> : vector<8x256xf32>
    %332 = tpu.matmul %329, %331, %cst_186 {dimension_numbers = #tpu.dot_dimension_numbers<[1], [0], [0], [1], [0, 0, 1, 1], [], []>} : vector<8x80xf32>, vector<80x256xf32>, vector<8x256xf32> -> vector<8x256xf32>
    %333 = arith.addf %327, %332 : vector<8x256xf32>
    %334 = vector.extract_strided_slice %234 {offsets = [1, 2, 0], sizes = [1, 8, 80], strides = [1, 1, 1]} : vector<2x10x80xf32> to vector<1x8x80xf32>
    %335 = vector.shape_cast %334 : vector<1x8x80xf32> to vector<8x80xf32>
    %c2_187 = arith.constant 2 : index
    %c0_188 = arith.constant 0 : index
    %c0_189 = arith.constant 0 : index
    %336 = vector.load %arg3[%c2_187, %c0_188, %c0_189] : memref<3x80x256xf32, #tpu.memory_space<vmem>>, vector<1x80x256xf32>
    %337 = vector.shape_cast %336 : vector<1x80x256xf32> to vector<80x256xf32>
    %cst_190 = arith.constant dense<0.000000e+00> : vector<8x256xf32>
    %338 = tpu.matmul %335, %337, %cst_190 {dimension_numbers = #tpu.dot_dimension_numbers<[1], [0], [0], [1], [0, 0, 1, 1], [], []>} : vector<8x80xf32>, vector<80x256xf32>, vector<8x256xf32> -> vector<8x256xf32>
    %339 = arith.addf %333, %338 : vector<8x256xf32>
    %340 = vector.broadcast %2 : vector<1x256xf32> to vector<8x256xf32>
    %341 = arith.addf %339, %340 : vector<8x256xf32>
    %342 = vector.extract_strided_slice %341 {offsets = [0, 0], sizes = [8, 64], strides = [1, 1]} : vector<8x256xf32> to vector<8x64xf32>
    %343 = arith.negf %342 : vector<8x64xf32>
    %344 = math.exp %343 : vector<8x64xf32>
    %cst_191 = arith.constant 1.000000e+00 : f32
    %345 = vector.broadcast %cst_191 : f32 to vector<8x64xf32>
    %346 = arith.addf %345, %344 : vector<8x64xf32>
    %347 = arith.divf %345, %346 : vector<8x64xf32>
    %348 = vector.extract_strided_slice %341 {offsets = [0, 64], sizes = [8, 64], strides = [1, 1]} : vector<8x256xf32> to vector<8x64xf32>
    %349 = arith.negf %348 : vector<8x64xf32>
    %350 = math.exp %349 : vector<8x64xf32>
    %cst_192 = arith.constant 1.000000e+00 : f32
    %351 = vector.broadcast %cst_192 : f32 to vector<8x64xf32>
    %352 = arith.addf %351, %350 : vector<8x64xf32>
    %353 = arith.divf %351, %352 : vector<8x64xf32>
    %354 = vector.extract_strided_slice %341 {offsets = [0, 128], sizes = [8, 64], strides = [1, 1]} : vector<8x256xf32> to vector<8x64xf32>
    %355 = arith.negf %354 : vector<8x64xf32>
    %356 = math.exp %355 : vector<8x64xf32>
    %cst_193 = arith.constant 1.000000e+00 : f32
    %357 = vector.broadcast %cst_193 : f32 to vector<8x64xf32>
    %358 = arith.addf %357, %356 : vector<8x64xf32>
    %359 = arith.divf %357, %358 : vector<8x64xf32>
    %360 = vector.extract_strided_slice %341 {offsets = [0, 192], sizes = [8, 64], strides = [1, 1]} : vector<8x256xf32> to vector<8x64xf32>
    %361 = math.tanh %360 : vector<8x64xf32>
    %c1_194 = arith.constant 1 : index
    %c0_195 = arith.constant 0 : index
    %c0_196 = arith.constant 0 : index
    %362 = vector.load %arg9[%c1_194, %c0_195, %c0_196] : memref<2x8x64xf32, #tpu.memory_space<vmem>>, vector<1x8x64xf32>
    %363 = vector.shape_cast %362 : vector<1x8x64xf32> to vector<8x64xf32>
    %364 = arith.mulf %353, %363 : vector<8x64xf32>
    %365 = arith.mulf %347, %361 : vector<8x64xf32>
    %366 = arith.addf %364, %365 : vector<8x64xf32>
    %367 = math.tanh %366 : vector<8x64xf32>
    %368 = arith.mulf %359, %367 : vector<8x64xf32>
    %c1_197 = arith.constant 1 : index
    %c0_198 = arith.constant 0 : index
    %c0_199 = arith.constant 0 : index
    %369 = vector.load %arg9[%c1_197, %c0_198, %c0_199] : memref<2x8x64xf32, #tpu.memory_space<vmem>>, vector<1x8x64xf32>
    %370 = vector.shape_cast %369 : vector<1x8x64xf32> to vector<8x64xf32>
    %371 = vector.shape_cast %366 : vector<8x64xf32> to vector<1x8x64xf32>
    tpu.vector_store %arg9[%c1_197, %c0_198, %c0_199], %371 {strides = array<i32>} : memref<2x8x64xf32, #tpu.memory_space<vmem>>, vector<1x8x64xf32>,
    %c1_200 = arith.constant 1 : index
    %c1_201 = arith.constant 1 : index
    %c8_202 = arith.constant 8 : index
    %372 = vector.load %arg8[%c1_200, %c1_201, %c8_202] : memref<2x10x80xf32, #tpu.memory_space<vmem>>, vector<1x8x64xf32>
    %373 = vector.shape_cast %372 : vector<1x8x64xf32> to vector<8x64xf32>
    %374 = vector.shape_cast %368 : vector<8x64xf32> to vector<1x8x64xf32>
    tpu.vector_store %arg8[%c1_200, %c1_201, %c8_202], %374 {strides = array<i32>} : memref<2x10x80xf32, #tpu.memory_space<vmem>>, vector<1x8x64xf32>,
    %c3 = arith.constant 3 : index
    %c0_203 = arith.constant 0 : index
    %c0_204 = arith.constant 0 : index
    %c0_205 = arith.constant 0 : index
    %375 = vector.load %arg1[%c3, %c0_203, %c0_204, %c0_205] : memref<4x2x10x40xf32, #tpu.memory_space<vmem>>, vector<1x2x10x40xf32>
    %376 = vector.shape_cast %375 : vector<1x2x10x40xf32> to vector<2x10x40xf32>
    %c0_206 = arith.constant 0 : index
    %c0_207 = arith.constant 0 : index
    %c0_208 = arith.constant 0 : index
    %377 = vector.load %arg8[%c0_206, %c0_207, %c0_208] : memref<2x10x80xf32, #tpu.memory_space<vmem>>, vector<2x10x80xf32>
    %378 = vector.extract_strided_slice %376 {offsets = [0, 0, 0], sizes = [1, 8, 40], strides = [1, 1, 1]} : vector<2x10x40xf32> to vector<1x8x40xf32>
    %379 = vector.shape_cast %378 : vector<1x8x40xf32> to vector<8x40xf32>
    %c0_209 = arith.constant 0 : index
    %c0_210 = arith.constant 0 : index
    %c0_211 = arith.constant 0 : index
    %380 = vector.load %arg2[%c0_209, %c0_210, %c0_211] : memref<3x40x256xf32, #tpu.memory_space<vmem>>, vector<1x40x256xf32>
    %381 = vector.shape_cast %380 : vector<1x40x256xf32> to vector<40x256xf32>
    %cst_212 = arith.constant dense<0.000000e+00> : vector<8x256xf32>
    %382 = tpu.matmul %379, %381, %cst_212 {dimension_numbers = #tpu.dot_dimension_numbers<[1], [0], [0], [1], [0, 0, 1, 1], [], []>} : vector<8x40xf32>, vector<40x256xf32>, vector<8x256xf32> -> vector<8x256xf32>
    %383 = vector.extract_strided_slice %376 {offsets = [0, 1, 0], sizes = [1, 8, 40], strides = [1, 1, 1]} : vector<2x10x40xf32> to vector<1x8x40xf32>
    %384 = vector.shape_cast %383 : vector<1x8x40xf32> to vector<8x40xf32>
    %c1_213 = arith.constant 1 : index
    %c0_214 = arith.constant 0 : index
    %c0_215 = arith.constant 0 : index
    %385 = vector.load %arg2[%c1_213, %c0_214, %c0_215] : memref<3x40x256xf32, #tpu.memory_space<vmem>>, vector<1x40x256xf32>
    %386 = vector.shape_cast %385 : vector<1x40x256xf32> to vector<40x256xf32>
    %cst_216 = arith.constant dense<0.000000e+00> : vector<8x256xf32>
    %387 = tpu.matmul %384, %386, %cst_216 {dimension_numbers = #tpu.dot_dimension_numbers<[1], [0], [0], [1], [0, 0, 1, 1], [], []>} : vector<8x40xf32>, vector<40x256xf32>, vector<8x256xf32> -> vector<8x256xf32>
    %388 = arith.addf %382, %387 : vector<8x256xf32>
    %389 = vector.extract_strided_slice %376 {offsets = [0, 2, 0], sizes = [1, 8, 40], strides = [1, 1, 1]} : vector<2x10x40xf32> to vector<1x8x40xf32>
    %390 = vector.shape_cast %389 : vector<1x8x40xf32> to vector<8x40xf32>
    %c2_217 = arith.constant 2 : index
    %c0_218 = arith.constant 0 : index
    %c0_219 = arith.constant 0 : index
    %391 = vector.load %arg2[%c2_217, %c0_218, %c0_219] : memref<3x40x256xf32, #tpu.memory_space<vmem>>, vector<1x40x256xf32>
    %392 = vector.shape_cast %391 : vector<1x40x256xf32> to vector<40x256xf32>
    %cst_220 = arith.constant dense<0.000000e+00> : vector<8x256xf32>
    %393 = tpu.matmul %390, %392, %cst_220 {dimension_numbers = #tpu.dot_dimension_numbers<[1], [0], [0], [1], [0, 0, 1, 1], [], []>} : vector<8x40xf32>, vector<40x256xf32>, vector<8x256xf32> -> vector<8x256xf32>
    %394 = arith.addf %388, %393 : vector<8x256xf32>
    %395 = vector.extract_strided_slice %377 {offsets = [0, 0, 0], sizes = [1, 8, 80], strides = [1, 1, 1]} : vector<2x10x80xf32> to vector<1x8x80xf32>
    %396 = vector.shape_cast %395 : vector<1x8x80xf32> to vector<8x80xf32>
    %c0_221 = arith.constant 0 : index
    %c0_222 = arith.constant 0 : index
    %c0_223 = arith.constant 0 : index
    %397 = vector.load %arg3[%c0_221, %c0_222, %c0_223] : memref<3x80x256xf32, #tpu.memory_space<vmem>>, vector<1x80x256xf32>
    %398 = vector.shape_cast %397 : vector<1x80x256xf32> to vector<80x256xf32>
    %cst_224 = arith.constant dense<0.000000e+00> : vector<8x256xf32>
    %399 = tpu.matmul %396, %398, %cst_224 {dimension_numbers = #tpu.dot_dimension_numbers<[1], [0], [0], [1], [0, 0, 1, 1], [], []>} : vector<8x80xf32>, vector<80x256xf32>, vector<8x256xf32> -> vector<8x256xf32>
    %400 = arith.addf %394, %399 : vector<8x256xf32>
    %401 = vector.extract_strided_slice %377 {offsets = [0, 1, 0], sizes = [1, 8, 80], strides = [1, 1, 1]} : vector<2x10x80xf32> to vector<1x8x80xf32>
    %402 = vector.shape_cast %401 : vector<1x8x80xf32> to vector<8x80xf32>
    %c1_225 = arith.constant 1 : index
    %c0_226 = arith.constant 0 : index
    %c0_227 = arith.constant 0 : index
    %403 = vector.load %arg3[%c1_225, %c0_226, %c0_227] : memref<3x80x256xf32, #tpu.memory_space<vmem>>, vector<1x80x256xf32>
    %404 = vector.shape_cast %403 : vector<1x80x256xf32> to vector<80x256xf32>
    %cst_228 = arith.constant dense<0.000000e+00> : vector<8x256xf32>
    %405 = tpu.matmul %402, %404, %cst_228 {dimension_numbers = #tpu.dot_dimension_numbers<[1], [0], [0], [1], [0, 0, 1, 1], [], []>} : vector<8x80xf32>, vector<80x256xf32>, vector<8x256xf32> -> vector<8x256xf32>
    %406 = arith.addf %400, %405 : vector<8x256xf32>
    %407 = vector.extract_strided_slice %377 {offsets = [0, 2, 0], sizes = [1, 8, 80], strides = [1, 1, 1]} : vector<2x10x80xf32> to vector<1x8x80xf32>
    %408 = vector.shape_cast %407 : vector<1x8x80xf32> to vector<8x80xf32>
    %c2_229 = arith.constant 2 : index
    %c0_230 = arith.constant 0 : index
    %c0_231 = arith.constant 0 : index
    %409 = vector.load %arg3[%c2_229, %c0_230, %c0_231] : memref<3x80x256xf32, #tpu.memory_space<vmem>>, vector<1x80x256xf32>
    %410 = vector.shape_cast %409 : vector<1x80x256xf32> to vector<80x256xf32>
    %cst_232 = arith.constant dense<0.000000e+00> : vector<8x256xf32>
    %411 = tpu.matmul %408, %410, %cst_232 {dimension_numbers = #tpu.dot_dimension_numbers<[1], [0], [0], [1], [0, 0, 1, 1], [], []>} : vector<8x80xf32>, vector<80x256xf32>, vector<8x256xf32> -> vector<8x256xf32>
    %412 = arith.addf %406, %411 : vector<8x256xf32>
    %413 = vector.broadcast %2 : vector<1x256xf32> to vector<8x256xf32>
    %414 = arith.addf %412, %413 : vector<8x256xf32>
    %415 = vector.extract_strided_slice %414 {offsets = [0, 0], sizes = [8, 64], strides = [1, 1]} : vector<8x256xf32> to vector<8x64xf32>
    %416 = arith.negf %415 : vector<8x64xf32>
    %417 = math.exp %416 : vector<8x64xf32>
    %cst_233 = arith.constant 1.000000e+00 : f32
    %418 = vector.broadcast %cst_233 : f32 to vector<8x64xf32>
    %419 = arith.addf %418, %417 : vector<8x64xf32>
    %420 = arith.divf %418, %419 : vector<8x64xf32>
    %421 = vector.extract_strided_slice %414 {offsets = [0, 64], sizes = [8, 64], strides = [1, 1]} : vector<8x256xf32> to vector<8x64xf32>
    %422 = arith.negf %421 : vector<8x64xf32>
    %423 = math.exp %422 : vector<8x64xf32>
    %cst_234 = arith.constant 1.000000e+00 : f32
    %424 = vector.broadcast %cst_234 : f32 to vector<8x64xf32>
    %425 = arith.addf %424, %423 : vector<8x64xf32>
    %426 = arith.divf %424, %425 : vector<8x64xf32>
    %427 = vector.extract_strided_slice %414 {offsets = [0, 128], sizes = [8, 64], strides = [1, 1]} : vector<8x256xf32> to vector<8x64xf32>
    %428 = arith.negf %427 : vector<8x64xf32>
    %429 = math.exp %428 : vector<8x64xf32>
    %cst_235 = arith.constant 1.000000e+00 : f32
    %430 = vector.broadcast %cst_235 : f32 to vector<8x64xf32>
    %431 = arith.addf %430, %429 : vector<8x64xf32>
    %432 = arith.divf %430, %431 : vector<8x64xf32>
    %433 = vector.extract_strided_slice %414 {offsets = [0, 192], sizes = [8, 64], strides = [1, 1]} : vector<8x256xf32> to vector<8x64xf32>
    %434 = math.tanh %433 : vector<8x64xf32>
    %c0_236 = arith.constant 0 : index
    %c0_237 = arith.constant 0 : index
    %c0_238 = arith.constant 0 : index
    %435 = vector.load %arg9[%c0_236, %c0_237, %c0_238] : memref<2x8x64xf32, #tpu.memory_space<vmem>>, vector<1x8x64xf32>
    %436 = vector.shape_cast %435 : vector<1x8x64xf32> to vector<8x64xf32>
    %437 = arith.mulf %426, %436 : vector<8x64xf32>
    %438 = arith.mulf %420, %434 : vector<8x64xf32>
    %439 = arith.addf %437, %438 : vector<8x64xf32>
    %440 = math.tanh %439 : vector<8x64xf32>
    %441 = arith.mulf %432, %440 : vector<8x64xf32>
    %c0_239 = arith.constant 0 : index
    %c0_240 = arith.constant 0 : index
    %c0_241 = arith.constant 0 : index
    %442 = vector.load %arg9[%c0_239, %c0_240, %c0_241] : memref<2x8x64xf32, #tpu.memory_space<vmem>>, vector<1x8x64xf32>
    %443 = vector.shape_cast %442 : vector<1x8x64xf32> to vector<8x64xf32>
    %444 = vector.shape_cast %439 : vector<8x64xf32> to vector<1x8x64xf32>
    tpu.vector_store %arg9[%c0_239, %c0_240, %c0_241], %444 {strides = array<i32>} : memref<2x8x64xf32, #tpu.memory_space<vmem>>, vector<1x8x64xf32>,
    %c0_242 = arith.constant 0 : index
    %c1_243 = arith.constant 1 : index
    %c8_244 = arith.constant 8 : index
    %445 = vector.load %arg8[%c0_242, %c1_243, %c8_244] : memref<2x10x80xf32, #tpu.memory_space<vmem>>, vector<1x8x64xf32>
    %446 = vector.shape_cast %445 : vector<1x8x64xf32> to vector<8x64xf32>
    %447 = vector.shape_cast %441 : vector<8x64xf32> to vector<1x8x64xf32>
    tpu.vector_store %arg8[%c0_242, %c1_243, %c8_244], %447 {strides = array<i32>} : memref<2x10x80xf32, #tpu.memory_space<vmem>>, vector<1x8x64xf32>,
    %448 = vector.extract_strided_slice %376 {offsets = [1, 0, 0], sizes = [1, 8, 40], strides = [1, 1, 1]} : vector<2x10x40xf32> to vector<1x8x40xf32>
    %449 = vector.shape_cast %448 : vector<1x8x40xf32> to vector<8x40xf32>
    %c0_245 = arith.constant 0 : index
    %c0_246 = arith.constant 0 : index
    %c0_247 = arith.constant 0 : index
    %450 = vector.load %arg2[%c0_245, %c0_246, %c0_247] : memref<3x40x256xf32, #tpu.memory_space<vmem>>, vector<1x40x256xf32>
    %451 = vector.shape_cast %450 : vector<1x40x256xf32> to vector<40x256xf32>
    %cst_248 = arith.constant dense<0.000000e+00> : vector<8x256xf32>
    %452 = tpu.matmul %449, %451, %cst_248 {dimension_numbers = #tpu.dot_dimension_numbers<[1], [0], [0], [1], [0, 0, 1, 1], [], []>} : vector<8x40xf32>, vector<40x256xf32>, vector<8x256xf32> -> vector<8x256xf32>
    %453 = vector.extract_strided_slice %376 {offsets = [1, 1, 0], sizes = [1, 8, 40], strides = [1, 1, 1]} : vector<2x10x40xf32> to vector<1x8x40xf32>
    %454 = vector.shape_cast %453 : vector<1x8x40xf32> to vector<8x40xf32>
    %c1_249 = arith.constant 1 : index
    %c0_250 = arith.constant 0 : index
    %c0_251 = arith.constant 0 : index
    %455 = vector.load %arg2[%c1_249, %c0_250, %c0_251] : memref<3x40x256xf32, #tpu.memory_space<vmem>>, vector<1x40x256xf32>
    %456 = vector.shape_cast %455 : vector<1x40x256xf32> to vector<40x256xf32>
    %cst_252 = arith.constant dense<0.000000e+00> : vector<8x256xf32>
    %457 = tpu.matmul %454, %456, %cst_252 {dimension_numbers = #tpu.dot_dimension_numbers<[1], [0], [0], [1], [0, 0, 1, 1], [], []>} : vector<8x40xf32>, vector<40x256xf32>, vector<8x256xf32> -> vector<8x256xf32>
    %458 = arith.addf %452, %457 : vector<8x256xf32>
    %459 = vector.extract_strided_slice %376 {offsets = [1, 2, 0], sizes = [1, 8, 40], strides = [1, 1, 1]} : vector<2x10x40xf32> to vector<1x8x40xf32>
    %460 = vector.shape_cast %459 : vector<1x8x40xf32> to vector<8x40xf32>
    %c2_253 = arith.constant 2 : index
    %c0_254 = arith.constant 0 : index
    %c0_255 = arith.constant 0 : index
    %461 = vector.load %arg2[%c2_253, %c0_254, %c0_255] : memref<3x40x256xf32, #tpu.memory_space<vmem>>, vector<1x40x256xf32>
    %462 = vector.shape_cast %461 : vector<1x40x256xf32> to vector<40x256xf32>
    %cst_256 = arith.constant dense<0.000000e+00> : vector<8x256xf32>
    %463 = tpu.matmul %460, %462, %cst_256 {dimension_numbers = #tpu.dot_dimension_numbers<[1], [0], [0], [1], [0, 0, 1, 1], [], []>} : vector<8x40xf32>, vector<40x256xf32>, vector<8x256xf32> -> vector<8x256xf32>
    %464 = arith.addf %458, %463 : vector<8x256xf32>
    %465 = vector.extract_strided_slice %377 {offsets = [1, 0, 0], sizes = [1, 8, 80], strides = [1, 1, 1]} : vector<2x10x80xf32> to vector<1x8x80xf32>
    %466 = vector.shape_cast %465 : vector<1x8x80xf32> to vector<8x80xf32>
    %c0_257 = arith.constant 0 : index
    %c0_258 = arith.constant 0 : index
    %c0_259 = arith.constant 0 : index
    %467 = vector.load %arg3[%c0_257, %c0_258, %c0_259] : memref<3x80x256xf32, #tpu.memory_space<vmem>>, vector<1x80x256xf32>
    %468 = vector.shape_cast %467 : vector<1x80x256xf32> to vector<80x256xf32>
    %cst_260 = arith.constant dense<0.000000e+00> : vector<8x256xf32>
    %469 = tpu.matmul %466, %468, %cst_260 {dimension_numbers = #tpu.dot_dimension_numbers<[1], [0], [0], [1], [0, 0, 1, 1], [], []>} : vector<8x80xf32>, vector<80x256xf32>, vector<8x256xf32> -> vector<8x256xf32>
    %470 = arith.addf %464, %469 : vector<8x256xf32>
    %471 = vector.extract_strided_slice %377 {offsets = [1, 1, 0], sizes = [1, 8, 80], strides = [1, 1, 1]} : vector<2x10x80xf32> to vector<1x8x80xf32>
    %472 = vector.shape_cast %471 : vector<1x8x80xf32> to vector<8x80xf32>
    %c1_261 = arith.constant 1 : index
    %c0_262 = arith.constant 0 : index
    %c0_263 = arith.constant 0 : index
    %473 = vector.load %arg3[%c1_261, %c0_262, %c0_263] : memref<3x80x256xf32, #tpu.memory_space<vmem>>, vector<1x80x256xf32>
    %474 = vector.shape_cast %473 : vector<1x80x256xf32> to vector<80x256xf32>
    %cst_264 = arith.constant dense<0.000000e+00> : vector<8x256xf32>
    %475 = tpu.matmul %472, %474, %cst_264 {dimension_numbers = #tpu.dot_dimension_numbers<[1], [0], [0], [1], [0, 0, 1, 1], [], []>} : vector<8x80xf32>, vector<80x256xf32>, vector<8x256xf32> -> vector<8x256xf32>
    %476 = arith.addf %470, %475 : vector<8x256xf32>
    %477 = vector.extract_strided_slice %377 {offsets = [1, 2, 0], sizes = [1, 8, 80], strides = [1, 1, 1]} : vector<2x10x80xf32> to vector<1x8x80xf32>
    %478 = vector.shape_cast %477 : vector<1x8x80xf32> to vector<8x80xf32>
    %c2_265 = arith.constant 2 : index
    %c0_266 = arith.constant 0 : index
    %c0_267 = arith.constant 0 : index
    %479 = vector.load %arg3[%c2_265, %c0_266, %c0_267] : memref<3x80x256xf32, #tpu.memory_space<vmem>>, vector<1x80x256xf32>
    %480 = vector.shape_cast %479 : vector<1x80x256xf32> to vector<80x256xf32>
    %cst_268 = arith.constant dense<0.000000e+00> : vector<8x256xf32>
    %481 = tpu.matmul %478, %480, %cst_268 {dimension_numbers = #tpu.dot_dimension_numbers<[1], [0], [0], [1], [0, 0, 1, 1], [], []>} : vector<8x80xf32>, vector<80x256xf32>, vector<8x256xf32> -> vector<8x256xf32>
    %482 = arith.addf %476, %481 : vector<8x256xf32>
    %483 = vector.broadcast %2 : vector<1x256xf32> to vector<8x256xf32>
    %484 = arith.addf %482, %483 : vector<8x256xf32>
    %485 = vector.extract_strided_slice %484 {offsets = [0, 0], sizes = [8, 64], strides = [1, 1]} : vector<8x256xf32> to vector<8x64xf32>
    %486 = arith.negf %485 : vector<8x64xf32>
    %487 = math.exp %486 : vector<8x64xf32>
    %cst_269 = arith.constant 1.000000e+00 : f32
    %488 = vector.broadcast %cst_269 : f32 to vector<8x64xf32>
    %489 = arith.addf %488, %487 : vector<8x64xf32>
    %490 = arith.divf %488, %489 : vector<8x64xf32>
    %491 = vector.extract_strided_slice %484 {offsets = [0, 64], sizes = [8, 64], strides = [1, 1]} : vector<8x256xf32> to vector<8x64xf32>
    %492 = arith.negf %491 : vector<8x64xf32>
    %493 = math.exp %492 : vector<8x64xf32>
    %cst_270 = arith.constant 1.000000e+00 : f32
    %494 = vector.broadcast %cst_270 : f32 to vector<8x64xf32>
    %495 = arith.addf %494, %493 : vector<8x64xf32>
    %496 = arith.divf %494, %495 : vector<8x64xf32>
    %497 = vector.extract_strided_slice %484 {offsets = [0, 128], sizes = [8, 64], strides = [1, 1]} : vector<8x256xf32> to vector<8x64xf32>
    %498 = arith.negf %497 : vector<8x64xf32>
    %499 = math.exp %498 : vector<8x64xf32>
    %cst_271 = arith.constant 1.000000e+00 : f32
    %500 = vector.broadcast %cst_271 : f32 to vector<8x64xf32>
    %501 = arith.addf %500, %499 : vector<8x64xf32>
    %502 = arith.divf %500, %501 : vector<8x64xf32>
    %503 = vector.extract_strided_slice %484 {offsets = [0, 192], sizes = [8, 64], strides = [1, 1]} : vector<8x256xf32> to vector<8x64xf32>
    %504 = math.tanh %503 : vector<8x64xf32>
    %c1_272 = arith.constant 1 : index
    %c0_273 = arith.constant 0 : index
    %c0_274 = arith.constant 0 : index
    %505 = vector.load %arg9[%c1_272, %c0_273, %c0_274] : memref<2x8x64xf32, #tpu.memory_space<vmem>>, vector<1x8x64xf32>
    %506 = vector.shape_cast %505 : vector<1x8x64xf32> to vector<8x64xf32>
    %507 = arith.mulf %496, %506 : vector<8x64xf32>
    %508 = arith.mulf %490, %504 : vector<8x64xf32>
    %509 = arith.addf %507, %508 : vector<8x64xf32>
    %510 = math.tanh %509 : vector<8x64xf32>
    %511 = arith.mulf %502, %510 : vector<8x64xf32>
    %c1_275 = arith.constant 1 : index
    %c0_276 = arith.constant 0 : index
    %c0_277 = arith.constant 0 : index
    %512 = vector.load %arg9[%c1_275, %c0_276, %c0_277] : memref<2x8x64xf32, #tpu.memory_space<vmem>>, vector<1x8x64xf32>
    %513 = vector.shape_cast %512 : vector<1x8x64xf32> to vector<8x64xf32>
    %514 = vector.shape_cast %509 : vector<8x64xf32> to vector<1x8x64xf32>
    tpu.vector_store %arg9[%c1_275, %c0_276, %c0_277], %514 {strides = array<i32>} : memref<2x8x64xf32, #tpu.memory_space<vmem>>, vector<1x8x64xf32>,
    %c1_278 = arith.constant 1 : index
    %c1_279 = arith.constant 1 : index
    %c8_280 = arith.constant 8 : index
    %515 = vector.load %arg8[%c1_278, %c1_279, %c8_280] : memref<2x10x80xf32, #tpu.memory_space<vmem>>, vector<1x8x64xf32>
    %516 = vector.shape_cast %515 : vector<1x8x64xf32> to vector<8x64xf32>
    %517 = vector.shape_cast %511 : vector<8x64xf32> to vector<1x8x64xf32>
    tpu.vector_store %arg8[%c1_278, %c1_279, %c8_280], %517 {strides = array<i32>} : memref<2x10x80xf32, #tpu.memory_space<vmem>>, vector<1x8x64xf32>,
    %c0_281 = arith.constant 0 : index
    %c1_282 = arith.constant 1 : index
    %c8_283 = arith.constant 8 : index
    %518 = vector.load %arg8[%c0_281, %c1_282, %c8_283] : memref<2x10x80xf32, #tpu.memory_space<vmem>>, vector<2x8x64xf32>
    %c0_284 = arith.constant 0 : index
    %c0_285 = arith.constant 0 : index
    %c0_286 = arith.constant 0 : index
    %519 = vector.load %arg9[%c0_284, %c0_285, %c0_286] : memref<2x8x64xf32, #tpu.memory_space<vmem>>, vector<2x8x64xf32>
    %520 = vector.extract_strided_slice %518 {offsets = [0, 0, 0], sizes = [2, 1, 64], strides = [1, 1, 1]} : vector<2x8x64xf32> to vector<2x1x64xf32>
    %521 = vector.shape_cast %520 : vector<2x1x64xf32> to vector<2x64xf32>
    %c0_287 = arith.constant 0 : index
    %c0_288 = arith.constant 0 : index
    %c0_289 = arith.constant 0 : index
    %522 = vector.load %arg5[%c0_287, %c0_288, %c0_289] : memref<8x64x32xf32, #tpu.memory_space<vmem>>, vector<1x64x32xf32>
    %523 = vector.shape_cast %522 : vector<1x64x32xf32> to vector<64x32xf32>
    %cst_290 = arith.constant dense<0.000000e+00> : vector<2x32xf32>
    %524 = tpu.matmul %521, %523, %cst_290 {dimension_numbers = #tpu.dot_dimension_numbers<[1], [0], [0], [1], [0, 0, 1, 1], [], []>} : vector<2x64xf32>, vector<64x32xf32>, vector<2x32xf32> -> vector<2x32xf32>
    %525 = vector.extract_strided_slice %519 {offsets = [0, 0, 0], sizes = [2, 1, 64], strides = [1, 1, 1]} : vector<2x8x64xf32> to vector<2x1x64xf32>
    %526 = vector.shape_cast %525 : vector<2x1x64xf32> to vector<2x64xf32>
    %c0_291 = arith.constant 0 : index
    %c0_292 = arith.constant 0 : index
    %c0_293 = arith.constant 0 : index
    %527 = vector.load %arg5[%c0_291, %c0_292, %c0_293] : memref<8x64x32xf32, #tpu.memory_space<vmem>>, vector<1x64x32xf32>
    %528 = vector.shape_cast %527 : vector<1x64x32xf32> to vector<64x32xf32>
    %cst_294 = arith.constant dense<0.000000e+00> : vector<2x32xf32>
    %529 = tpu.matmul %526, %528, %cst_294 {dimension_numbers = #tpu.dot_dimension_numbers<[1], [0], [0], [1], [0, 0, 1, 1], [], []>} : vector<2x64xf32>, vector<64x32xf32>, vector<2x32xf32> -> vector<2x32xf32>
    %c1_295 = arith.constant 1 : index
    %c0_296 = arith.constant 0 : index
    %c0_297 = arith.constant 0 : index
    %530 = vector.load %arg5[%c1_295, %c0_296, %c0_297] : memref<8x64x32xf32, #tpu.memory_space<vmem>>, vector<1x64x32xf32>
    %531 = vector.shape_cast %530 : vector<1x64x32xf32> to vector<64x32xf32>
    %532 = vector.extract_strided_slice %518 {offsets = [0, 1, 0], sizes = [2, 1, 64], strides = [1, 1, 1]} : vector<2x8x64xf32> to vector<2x1x64xf32>
    %533 = vector.shape_cast %532 : vector<2x1x64xf32> to vector<2x64xf32>
    %cst_298 = arith.constant dense<0.000000e+00> : vector<2x32xf32>
    %534 = tpu.matmul %533, %531, %cst_298 {dimension_numbers = #tpu.dot_dimension_numbers<[1], [0], [0], [1], [0, 0, 1, 1], [], []>} : vector<2x64xf32>, vector<64x32xf32>, vector<2x32xf32> -> vector<2x32xf32>
    %535 = arith.addf %524, %534 : vector<2x32xf32>
    %536 = vector.extract_strided_slice %519 {offsets = [0, 1, 0], sizes = [2, 1, 64], strides = [1, 1, 1]} : vector<2x8x64xf32> to vector<2x1x64xf32>
    %537 = vector.shape_cast %536 : vector<2x1x64xf32> to vector<2x64xf32>
    %cst_299 = arith.constant dense<0.000000e+00> : vector<2x32xf32>
    %538 = tpu.matmul %537, %531, %cst_299 {dimension_numbers = #tpu.dot_dimension_numbers<[1], [0], [0], [1], [0, 0, 1, 1], [], []>} : vector<2x64xf32>, vector<64x32xf32>, vector<2x32xf32> -> vector<2x32xf32>
    %539 = arith.addf %529, %538 : vector<2x32xf32>
    %c2_300 = arith.constant 2 : index
    %c0_301 = arith.constant 0 : index
    %c0_302 = arith.constant 0 : index
    %540 = vector.load %arg5[%c2_300, %c0_301, %c0_302] : memref<8x64x32xf32, #tpu.memory_space<vmem>>, vector<1x64x32xf32>
    %541 = vector.shape_cast %540 : vector<1x64x32xf32> to vector<64x32xf32>
    %542 = vector.extract_strided_slice %518 {offsets = [0, 2, 0], sizes = [2, 1, 64], strides = [1, 1, 1]} : vector<2x8x64xf32> to vector<2x1x64xf32>
    %543 = vector.shape_cast %542 : vector<2x1x64xf32> to vector<2x64xf32>
    %cst_303 = arith.constant dense<0.000000e+00> : vector<2x32xf32>
    %544 = tpu.matmul %543, %541, %cst_303 {dimension_numbers = #tpu.dot_dimension_numbers<[1], [0], [0], [1], [0, 0, 1, 1], [], []>} : vector<2x64xf32>, vector<64x32xf32>, vector<2x32xf32> -> vector<2x32xf32>
    %545 = arith.addf %535, %544 : vector<2x32xf32>
    %546 = vector.extract_strided_slice %519 {offsets = [0, 2, 0], sizes = [2, 1, 64], strides = [1, 1, 1]} : vector<2x8x64xf32> to vector<2x1x64xf32>
    %547 = vector.shape_cast %546 : vector<2x1x64xf32> to vector<2x64xf32>
    %cst_304 = arith.constant dense<0.000000e+00> : vector<2x32xf32>
    %548 = tpu.matmul %547, %541, %cst_304 {dimension_numbers = #tpu.dot_dimension_numbers<[1], [0], [0], [1], [0, 0, 1, 1], [], []>} : vector<2x64xf32>, vector<64x32xf32>, vector<2x32xf32> -> vector<2x32xf32>
    %549 = arith.addf %539, %548 : vector<2x32xf32>
    %c3_305 = arith.constant 3 : index
    %c0_306 = arith.constant 0 : index
    %c0_307 = arith.constant 0 : index
    %550 = vector.load %arg5[%c3_305, %c0_306, %c0_307] : memref<8x64x32xf32, #tpu.memory_space<vmem>>, vector<1x64x32xf32>
    %551 = vector.shape_cast %550 : vector<1x64x32xf32> to vector<64x32xf32>
    %552 = vector.extract_strided_slice %518 {offsets = [0, 3, 0], sizes = [2, 1, 64], strides = [1, 1, 1]} : vector<2x8x64xf32> to vector<2x1x64xf32>
    %553 = vector.shape_cast %552 : vector<2x1x64xf32> to vector<2x64xf32>
    %cst_308 = arith.constant dense<0.000000e+00> : vector<2x32xf32>
    %554 = tpu.matmul %553, %551, %cst_308 {dimension_numbers = #tpu.dot_dimension_numbers<[1], [0], [0], [1], [0, 0, 1, 1], [], []>} : vector<2x64xf32>, vector<64x32xf32>, vector<2x32xf32> -> vector<2x32xf32>
    %555 = arith.addf %545, %554 : vector<2x32xf32>
    %556 = vector.extract_strided_slice %519 {offsets = [0, 3, 0], sizes = [2, 1, 64], strides = [1, 1, 1]} : vector<2x8x64xf32> to vector<2x1x64xf32>
    %557 = vector.shape_cast %556 : vector<2x1x64xf32> to vector<2x64xf32>
    %cst_309 = arith.constant dense<0.000000e+00> : vector<2x32xf32>
    %558 = tpu.matmul %557, %551, %cst_309 {dimension_numbers = #tpu.dot_dimension_numbers<[1], [0], [0], [1], [0, 0, 1, 1], [], []>} : vector<2x64xf32>, vector<64x32xf32>, vector<2x32xf32> -> vector<2x32xf32>
    %559 = arith.addf %549, %558 : vector<2x32xf32>
    %c4 = arith.constant 4 : index
    %c0_310 = arith.constant 0 : index
    %c0_311 = arith.constant 0 : index
    %560 = vector.load %arg5[%c4, %c0_310, %c0_311] : memref<8x64x32xf32, #tpu.memory_space<vmem>>, vector<1x64x32xf32>
    %561 = vector.shape_cast %560 : vector<1x64x32xf32> to vector<64x32xf32>
    %562 = vector.extract_strided_slice %518 {offsets = [0, 4, 0], sizes = [2, 1, 64], strides = [1, 1, 1]} : vector<2x8x64xf32> to vector<2x1x64xf32>
    %563 = vector.shape_cast %562 : vector<2x1x64xf32> to vector<2x64xf32>
    %cst_312 = arith.constant dense<0.000000e+00> : vector<2x32xf32>
    %564 = tpu.matmul %563, %561, %cst_312 {dimension_numbers = #tpu.dot_dimension_numbers<[1], [0], [0], [1], [0, 0, 1, 1], [], []>} : vector<2x64xf32>, vector<64x32xf32>, vector<2x32xf32> -> vector<2x32xf32>
    %565 = arith.addf %555, %564 : vector<2x32xf32>
    %566 = vector.extract_strided_slice %519 {offsets = [0, 4, 0], sizes = [2, 1, 64], strides = [1, 1, 1]} : vector<2x8x64xf32> to vector<2x1x64xf32>
    %567 = vector.shape_cast %566 : vector<2x1x64xf32> to vector<2x64xf32>
    %cst_313 = arith.constant dense<0.000000e+00> : vector<2x32xf32>
    %568 = tpu.matmul %567, %561, %cst_313 {dimension_numbers = #tpu.dot_dimension_numbers<[1], [0], [0], [1], [0, 0, 1, 1], [], []>} : vector<2x64xf32>, vector<64x32xf32>, vector<2x32xf32> -> vector<2x32xf32>
    %569 = arith.addf %559, %568 : vector<2x32xf32>
    %c5 = arith.constant 5 : index
    %c0_314 = arith.constant 0 : index
    %c0_315 = arith.constant 0 : index
    %570 = vector.load %arg5[%c5, %c0_314, %c0_315] : memref<8x64x32xf32, #tpu.memory_space<vmem>>, vector<1x64x32xf32>
    %571 = vector.shape_cast %570 : vector<1x64x32xf32> to vector<64x32xf32>
    %572 = vector.extract_strided_slice %518 {offsets = [0, 5, 0], sizes = [2, 1, 64], strides = [1, 1, 1]} : vector<2x8x64xf32> to vector<2x1x64xf32>
    %573 = vector.shape_cast %572 : vector<2x1x64xf32> to vector<2x64xf32>
    %cst_316 = arith.constant dense<0.000000e+00> : vector<2x32xf32>
    %574 = tpu.matmul %573, %571, %cst_316 {dimension_numbers = #tpu.dot_dimension_numbers<[1], [0], [0], [1], [0, 0, 1, 1], [], []>} : vector<2x64xf32>, vector<64x32xf32>, vector<2x32xf32> -> vector<2x32xf32>
    %575 = arith.addf %565, %574 : vector<2x32xf32>
    %576 = vector.extract_strided_slice %519 {offsets = [0, 5, 0], sizes = [2, 1, 64], strides = [1, 1, 1]} : vector<2x8x64xf32> to vector<2x1x64xf32>
    %577 = vector.shape_cast %576 : vector<2x1x64xf32> to vector<2x64xf32>
    %cst_317 = arith.constant dense<0.000000e+00> : vector<2x32xf32>
    %578 = tpu.matmul %577, %571, %cst_317 {dimension_numbers = #tpu.dot_dimension_numbers<[1], [0], [0], [1], [0, 0, 1, 1], [], []>} : vector<2x64xf32>, vector<64x32xf32>, vector<2x32xf32> -> vector<2x32xf32>
    %579 = arith.addf %569, %578 : vector<2x32xf32>
    %c6 = arith.constant 6 : index
    %c0_318 = arith.constant 0 : index
    %c0_319 = arith.constant 0 : index
    %580 = vector.load %arg5[%c6, %c0_318, %c0_319] : memref<8x64x32xf32, #tpu.memory_space<vmem>>, vector<1x64x32xf32>
    %581 = vector.shape_cast %580 : vector<1x64x32xf32> to vector<64x32xf32>
    %582 = vector.extract_strided_slice %518 {offsets = [0, 6, 0], sizes = [2, 1, 64], strides = [1, 1, 1]} : vector<2x8x64xf32> to vector<2x1x64xf32>
    %583 = vector.shape_cast %582 : vector<2x1x64xf32> to vector<2x64xf32>
    %cst_320 = arith.constant dense<0.000000e+00> : vector<2x32xf32>
    %584 = tpu.matmul %583, %581, %cst_320 {dimension_numbers = #tpu.dot_dimension_numbers<[1], [0], [0], [1], [0, 0, 1, 1], [], []>} : vector<2x64xf32>, vector<64x32xf32>, vector<2x32xf32> -> vector<2x32xf32>
    %585 = arith.addf %575, %584 : vector<2x32xf32>
    %586 = vector.extract_strided_slice %519 {offsets = [0, 6, 0], sizes = [2, 1, 64], strides = [1, 1, 1]} : vector<2x8x64xf32> to vector<2x1x64xf32>
    %587 = vector.shape_cast %586 : vector<2x1x64xf32> to vector<2x64xf32>
    %cst_321 = arith.constant dense<0.000000e+00> : vector<2x32xf32>
    %588 = tpu.matmul %587, %581, %cst_321 {dimension_numbers = #tpu.dot_dimension_numbers<[1], [0], [0], [1], [0, 0, 1, 1], [], []>} : vector<2x64xf32>, vector<64x32xf32>, vector<2x32xf32> -> vector<2x32xf32>
    %589 = arith.addf %579, %588 : vector<2x32xf32>
    %c7 = arith.constant 7 : index
    %c0_322 = arith.constant 0 : index
    %c0_323 = arith.constant 0 : index
    %590 = vector.load %arg5[%c7, %c0_322, %c0_323] : memref<8x64x32xf32, #tpu.memory_space<vmem>>, vector<1x64x32xf32>
    %591 = vector.shape_cast %590 : vector<1x64x32xf32> to vector<64x32xf32>
    %592 = vector.extract_strided_slice %518 {offsets = [0, 7, 0], sizes = [2, 1, 64], strides = [1, 1, 1]} : vector<2x8x64xf32> to vector<2x1x64xf32>
    %593 = vector.shape_cast %592 : vector<2x1x64xf32> to vector<2x64xf32>
    %cst_324 = arith.constant dense<0.000000e+00> : vector<2x32xf32>
    %594 = tpu.matmul %593, %591, %cst_324 {dimension_numbers = #tpu.dot_dimension_numbers<[1], [0], [0], [1], [0, 0, 1, 1], [], []>} : vector<2x64xf32>, vector<64x32xf32>, vector<2x32xf32> -> vector<2x32xf32>
    %595 = arith.addf %585, %594 : vector<2x32xf32>
    %596 = vector.extract_strided_slice %519 {offsets = [0, 7, 0], sizes = [2, 1, 64], strides = [1, 1, 1]} : vector<2x8x64xf32> to vector<2x1x64xf32>
    %597 = vector.shape_cast %596 : vector<2x1x64xf32> to vector<2x64xf32>
    %cst_325 = arith.constant dense<0.000000e+00> : vector<2x32xf32>
    %598 = tpu.matmul %597, %591, %cst_325 {dimension_numbers = #tpu.dot_dimension_numbers<[1], [0], [0], [1], [0, 0, 1, 1], [], []>} : vector<2x64xf32>, vector<64x32xf32>, vector<2x32xf32> -> vector<2x32xf32>
    %599 = arith.addf %589, %598 : vector<2x32xf32>
    %c0_326 = arith.constant 0 : index
    %c0_327 = arith.constant 0 : index
    %600 = vector.load %arg6[%c0_326, %c0_327] : memref<1x32xf32, #tpu.memory_space<vmem>>, vector<1x32xf32>
    %601 = vector.broadcast %600 : vector<1x32xf32> to vector<2x32xf32>
    %602 = arith.addf %595, %601 : vector<2x32xf32>
    %cst_328 = arith.constant 0.000000e+00 : f32
    %603 = vector.broadcast %cst_328 : f32 to vector<2x32xf32>
    %604 = arith.maximumf %602, %603 : vector<2x32xf32>
    %c0_329 = arith.constant 0 : index
    %c0_330 = arith.constant 0 : index
    %c0_331 = arith.constant 0 : index
    %605 = vector.load %arg7[%c0_329, %c0_330, %c0_331] : memref<2x2x32xf32, #tpu.memory_space<vmem>>, vector<1x2x32xf32>
    %606 = vector.shape_cast %605 : vector<1x2x32xf32> to vector<2x32xf32>
    %607 = vector.shape_cast %604 : vector<2x32xf32> to vector<1x2x32xf32>
    tpu.vector_store %arg7[%c0_329, %c0_330, %c0_331], %607 {strides = array<i32>} : memref<2x2x32xf32, #tpu.memory_space<vmem>>, vector<1x2x32xf32>,
    %608 = vector.broadcast %600 : vector<1x32xf32> to vector<2x32xf32>
    %609 = arith.addf %599, %608 : vector<2x32xf32>
    %cst_332 = arith.constant 0.000000e+00 : f32
    %610 = vector.broadcast %cst_332 : f32 to vector<2x32xf32>
    %611 = arith.maximumf %609, %610 : vector<2x32xf32>
    %c1_333 = arith.constant 1 : index
    %c0_334 = arith.constant 0 : index
    %c0_335 = arith.constant 0 : index
    %612 = vector.load %arg7[%c1_333, %c0_334, %c0_335] : memref<2x2x32xf32, #tpu.memory_space<vmem>>, vector<1x2x32xf32>
    %613 = vector.shape_cast %612 : vector<1x2x32xf32> to vector<2x32xf32>
    %614 = vector.shape_cast %611 : vector<2x32xf32> to vector<1x2x32xf32>
    tpu.vector_store %arg7[%c1_333, %c0_334, %c0_335], %614 {strides = array<i32>} : memref<2x2x32xf32, #tpu.memory_space<vmem>>, vector<1x2x32xf32>,
    return
  }
  func.func @transform_0(%arg0: i32) -> (i32, i32, i32, i32) {
    %c0_i32 = arith.constant 0 : i32
    %c0_i32_0 = arith.constant 0 : i32
    %c0_i32_1 = arith.constant 0 : i32
    %c0_i32_2 = arith.constant 0 : i32
    %c0_i32_3 = arith.constant 0 : i32
    return %c0_i32, %c0_i32_0, %c0_i32_1, %c0_i32_2 : i32, i32, i32, i32
  }
  func.func @transform_1(%arg0: i32) -> (i32, i32, i32) {
    %c0_i32 = arith.constant 0 : i32
    %c0_i32_0 = arith.constant 0 : i32
    %c0_i32_1 = arith.constant 0 : i32
    %c0_i32_2 = arith.constant 0 : i32
    return %c0_i32, %c0_i32_0, %c0_i32_1 : i32, i32, i32
  }
  func.func @transform_2(%arg0: i32) -> (i32, i32, i32) {
    %c0_i32 = arith.constant 0 : i32
    %c0_i32_0 = arith.constant 0 : i32
    %c0_i32_1 = arith.constant 0 : i32
    %c0_i32_2 = arith.constant 0 : i32
    return %c0_i32, %c0_i32_0, %c0_i32_1 : i32, i32, i32
  }
  func.func @transform_3(%arg0: i32) -> (i32, i32) {
    %c0_i32 = arith.constant 0 : i32
    %c0_i32_0 = arith.constant 0 : i32
    %c0_i32_1 = arith.constant 0 : i32
    return %c0_i32, %c0_i32_0 : i32, i32
  }
  func.func @transform_4(%arg0: i32) -> (i32, i32, i32) {
    %c0_i32 = arith.constant 0 : i32
    %c0_i32_0 = arith.constant 0 : i32
    %c0_i32_1 = arith.constant 0 : i32
    %c0_i32_2 = arith.constant 0 : i32
    return %c0_i32, %c0_i32_0, %c0_i32_1 : i32, i32, i32
  }
  func.func @transform_5(%arg0: i32) -> (i32, i32) {
    %c0_i32 = arith.constant 0 : i32
    %c0_i32_0 = arith.constant 0 : i32
    %c0_i32_1 = arith.constant 0 : i32
    return %c0_i32, %c0_i32_0 : i32, i32
  }
  func.func @transform_6(%arg0: i32) -> (i32, i32, i32) {
    %c0_i32 = arith.constant 0 : i32
    %c0_i32_0 = arith.constant 0 : i32
    %c0_i32_1 = arith.constant 0 : i32
    %c0_i32_2 = arith.constant 0 : i32
    return %c0_i32, %c0_i32_0, %c0_i32_1 : i32, i32, i32
  }
}

</mosaic_0001>

<bundles_post_ra>
// kernel: context_encoder_forward.1
= control target key start
LH: loop header
LB: loop body
LE: loop exit
PB: predicated region body
PF: predicated region fallthrough
CT: control target
= control target key end

     0   :  { %v7480_v3 = vmov 0.0   ;;  %vm57_vm0 = vcmask 1046528   ;;  %vm61_vm1 = vcmask 326656   ;;  %vm219_vm2 = vcmask 1045504   ;;  %s7482_s23 = smov 8   ;;  %s7485_s12 = smov 120   ;;  %s9229_s1 = inlined_call_operand.vmem [shape: f32[3,40,256], index: 1, kind: input, shape index: {}]   ;;  %s9230_s0 = inlined_call_operand.vmem [shape: f32[4,2,10,40], index: 0, kind: input, shape index: {}]   ;;  %s9231_s3 = inlined_call_operand.vmem [shape: f32[1,256], index: 3, kind: input, shape index: {}]   ;;  %s9232_s2 = inlined_call_operand.vmem [shape: f32[3,80,256], index: 2, kind: input, shape index: {}]   ;;  %s9233_s4 = inlined_call_operand.vmem [shape: f32[8,64,32], index: 4, kind: input, shape index: {}]   ;;  %s9234_s5 = inlined_call_operand.vmem [shape: f32[1,32], index: 5, kind: input, shape index: {}]   ;;  %s9235_s6 = inlined_call_operand.vmem [shape: f32[2,2,32], index: 6, kind: output, shape index: {}]  }
   0x1   :  { %v5575_v0 = vld [vmem:[%s9229_s1 + $0x58] sm:$0xff]  ;;  %v5577_v1 = vld [vmem:[%s9229_s1 + $0x68] sm:$0xff]  ;;  %v5574_v2 = vld [vmem:[%s9229_s1 + $0x50] sm:$0xff]  ;;  %128 = vmatprep.mubr.f32.mxu0 %v7480_v3  ;;  %430 = vmatprep.mubr.f32.mxu1 %v7480_v3  ;;  %v299_v59 = vlaneseq  ;;  %vm23_vm3 = vcmask 654336   ;;  %vm25_vm4 = vcmask 648192   ;;  %vm331_vm5 = vcmask 523264  }
   0x2   :  { %v7532_v4 = vpack.c.bf16 %v5577_v1, %v5575_v0  ;;  %v5576_v5 = vld [vmem:[%s9229_s1 + $0x60] sm:$0xff]  ;;  %v5579_v6 = vld [vmem:[%s9229_s1 + $0x78] sm:$0xff]  ;;  %v5581_v7 = vld [vmem:[%s9229_s1 + $0x88] sm:$0xff]  ;;  %24 = vst.msk [vmem:[#allocation2] sm:$0xff] %vm23_vm3, %v7480_v3  ;;  %vm337_vm6 = vcmask 588864   ;;  %vm7484_vm7 = vmmov 0  }
   0x3   :  { %v7543_v8 = vpack.c.bf16 %v5576_v5, %v5574_v2  ;;  %v7545_v9 = vpack.c.bf16 %v5581_v7, %v5579_v6  ;;  %v5578_v10 = vld [vmem:[%s9229_s1 + $0x70] sm:$0xff]  ;;  %v5580_v11 = vld [vmem:[%s9229_s1 + $0x80] sm:$0xff]  ;;  %v7567_v14 = vld [vmem:[%s9230_s0 + $0x8] sm:$0x3]  ;;  %v300_v60 = vshrl.u32 %v299_v59, 7  ;;  %27 = vst.msk [vmem:[#allocation2 + $0x10] sm:$0xff] %vm23_vm3, %v7480_v3 }
   0x4   :  { %6567 = vmatprep.subr.bf16.mxu0 %v7532_v4  ;;  %6591 = vmatprep.subr.bf16.mxu1 %v7532_v4  ;;  %v7557_v12 = vpack.c.bf16 %v5580_v11, %v5578_v10  ;;  %v7562_v13 = vld [vmem:[%s9230_s0] sm:$0xff]  ;;  %v7574_v15 = vld [vmem:[%s9229_s1 + $0x98] sm:$0xff]  ;;  %v7579_v16 = vld [vmem:[%s9230_s0 + $0x10] sm:$0xff]  ;;  %v59_v21 = vrot.slane %v7567_v14, 1  ;;  %v221_v51 = vrot.slane %v7567_v14, 2  ;;  %vm4275_vm8 = vcmask 1041409  }
   0x5   :  { %6569 = vmatpush1.bf16.msra.mxu0 %v7543_v8  ;;  %6593 = vmatpush1.bf16.msra.mxu1 %v7543_v8  ;;  %v35_v17 = vld [vmem:[%s9229_s1 + $0x8] sm:$0xff]  ;;  %v37_v18 = vld [vmem:[%s9229_s1 + $0x18] sm:$0xff]  ;;  %v58_v20 = vrot.slane %v7562_v13, 1  ;;  %v361_v22 = vrot.slane %v7579_v16, 1  ;;  %v34_v24 = vld [vmem:[%s9229_s1] sm:$0xff]  ;;  %v220_v54 = vrot.slane %v7562_v13, 2 }
   0x6   :  { %6571 = vmatprep.subr.bf16.mxu0 %v7545_v9  ;;  %6595 = vmatprep.subr.bf16.mxu1 %v7545_v9  ;;  %v7590_v19 = vld [vmem:[%s9230_s0 + $0x18] sm:$0x3]  ;;  %v36_v25 = vld [vmem:[%s9229_s1 + $0x10] sm:$0xff]  ;;  %v7611_v27 = vpack.c.bf16 %v37_v18, %v35_v17  ;;  %v39_v28 = vld [vmem:[%s9229_s1 + $0x28] sm:$0xff]  ;;  %v520_v55 = vrot.slane %v7579_v16, 2  ;;  %v301_v62 = vsub.s32 0, %v300_v60 }
   0x7   :  { %v362_v23 = vrot.slane %v7590_v19, 1  ;;  %v7609_v26 = vld [vmem:[%s9229_s1 + $0x90] sm:$0xff]  ;;  %v41_v29 = vld [vmem:[%s9229_s1 + $0x38] sm:$0xff]  ;;  %v60_v30 = vsel %vm57_vm0, %v58_v20, %v59_v21  ;;  %v7620_v31 = vpack.c.bf16 %v36_v25, %v34_v24  ;;  %v38_v34 = vld [vmem:[%s9229_s1 + $0x20] sm:$0xff]  ;;  %v521_v52 = vrot.slane %v7590_v19, 2 }
   0x8   :  { %v7625_v33 = vpack.c.bf16 %v41_v29, %v39_v28  ;;  %v40_v35 = vld [vmem:[%s9229_s1 + $0x30] sm:$0xff]  ;;  %v7646_v37 = vld [vmem:[%s9229_s1 + $0x48] sm:$0xff]  ;;  %v5589_v39 = vld [vmem:[%s9229_s1 + $0xb8] sm:$0xff]  ;;  %v222_v57 = vsel %vm219_vm2, %v220_v54, %v221_v51  ;;  %v305_v0 = vsub.s32 1, %v300_v60  ;;  %26 = vst.msk [vmem:[#allocation2 + $0x8] sm:$0x3] %vm25_vm4, %v7480_v3 }
   0x9   :  { %6573 = vmatpush1.bf16.msra.mxu0 %v7557_v12  ;;  %6597 = vmatpush1.bf16.msra.mxu1 %v7557_v12  ;;  %v363_v32 = vsel %vm57_vm0, %v361_v22, %v362_v23  ;;  %v7639_v36 = vpack.c.bf16 %v40_v35, %v38_v34  ;;  %v5587_v38 = vld [vmem:[%s9229_s1 + $0xa8] sm:$0xff]  ;;  %v5586_v40 = vld [vmem:[%s9229_s1 + $0xa0] sm:$0xff]  ;;  %v5588_v41 = vld [vmem:[%s9229_s1 + $0xb0] sm:$0xff]  ;;  %v522_v58 = vsel %vm219_vm2, %v520_v55, %v521_v52  ;;  %vm5564_vm9 = vcmask 254976  }
   0xa   :  { %72 = vmatprep.subr.mxu0 %v7574_v15  ;;  %374 = vmatprep.subr.mxu1 %v7574_v15  ;;  %v7669_v42 = vld [vmem:[%s9229_s1 + $0x40] sm:$0xff]  ;;  %v7671_v43 = vpack.c.bf16 %v5589_v39, %v5587_v38  ;;  %v5591_v44 = vld [vmem:[%s9229_s1 + $0xc8] sm:$0xff]  ;;  %v5593_v45 = vld [vmem:[%s9229_s1 + $0xd8] sm:$0xff]  ;;  %v7679_v46 = vpack.c.bf16 %v5588_v41, %v5586_v40  ;;  %28 = vst.msk [vmem:[#allocation2 + $0x18] sm:$0x3] %vm25_vm4, %v7480_v3 }
   0xb   :  { %v7683_v47 = vpack.c.bf16 %v5593_v45, %v5591_v44  ;;  %v5590_v48 = vld [vmem:[%s9229_s1 + $0xc0] sm:$0xff]  ;;  %v5592_v49 = vld [vmem:[%s9229_s1 + $0xd0] sm:$0xff]  ;;  %v7708_v53 = vld [vmem:[%s9229_s1 + $0xe8] sm:$0xff] }
   0xc   :  { %v7699_v50 = vpack.c.bf16 %v5592_v49, %v5590_v48  ;;  %v7721_v56 = vld [vmem:[%s9229_s1 + $0xe0] sm:$0xff]  ;;  %v897_v21 = vld [vmem:[%s9232_s2 + $0x8] sm:$0xff]  ;;  %v899_v22 = vld [vmem:[%s9232_s2 + $0x18] sm:$0xff] }
   0xd   :  { %73 = vmatpush1.msra.mxu0 %v7609_v26  ;;  %375 = vmatpush1.msra.mxu1 %v7609_v26  ;;  %v29_v61 = vld [vmem:[%s9231_s3] sm:$0x3]  ;;  %s7481_s3 = smov 64   ;;  %v903_v28 = vld [vmem:[%s9232_s2 + $0x38] sm:$0xff]  ;;  %v7834_v29 = vpack.c.bf16 %v899_v22, %v897_v21  ;;  %v909_v44 = vld [vmem:[%s9232_s2 + $0x68] sm:$0xff] }
   0xe   :  { %6575 = vmatprep.subr.bf16.mxu0 %v7611_v27  ;;  %6599 = vmatprep.subr.bf16.mxu1 %v7611_v27  ;;  %v7748_v63 = vrot.slane %v29_v61, %v301_v62  ;;  %v7750_v1 = vrot.slane %v29_v61, %v305_v0  ;;  %v5624_v11 = vld [vmem:[%s9230_s0 + $0x20] sm:$0xff]  ;;  %v907_v38 = vld [vmem:[%s9232_s2 + $0x58] sm:$0xff] }
   0xf   :  { %5584 = vmatmul.mubr.msk.f32.vlgmr.msra.gmra.mrb[0].mxu0 %vm61_vm1, %v60_v30  ;;  %5609 = vmatmul.mubr.msk.f32.vlgmr.msra.gmra.mrb[0].mxu1 %vm61_vm1, %v363_v32  ;;  %v659_v14 = vrot.slane %v5624_v11, 1  ;;  %v818_v23 = vrot.slane %v5624_v11, 2  ;;  %v896_v25 = vld [vmem:[%s9232_s2] sm:$0xff]  ;;  %v911_v45 = vld [vmem:[%s9232_s2 + $0x78] sm:$0xff] }
  0x10   :  { %6577 = vmatpush1.bf16.msra.mxu0 %v7620_v31  ;;  %6601 = vmatpush1.bf16.msra.mxu1 %v7620_v31  ;;  %v900_v35 = vld [vmem:[%s9232_s2 + $0x20] sm:$0xff] }
  0x11   :  { %6579 = vmatprep.subr.bf16.mxu0 %v7625_v33  ;;  %6603 = vmatprep.subr.bf16.mxu1 %v7625_v33 }
  0x12   :  { %201 = vmatprep.mubr.f32.mxu0 %v7480_v3  ;;  %503 = vmatprep.mubr.f32.mxu1 %v7480_v3 }
  0x14   :  { %6581 = vmatpush1.bf16.msra.mxu0 %v7639_v36  ;;  %6605 = vmatpush1.bf16.msra.mxu1 %v7639_v36 }
  0x15   :  { %145 = vmatprep.subr.mxu0 %v7646_v37  ;;  %447 = vmatprep.subr.mxu1 %v7646_v37 }
  0x18   :  { %146 = vmatpush1.msra.mxu0 %v7669_v42  ;;  %448 = vmatpush1.msra.mxu1 %v7669_v42 }
  0x19   :  { %6583 = vmatprep.subr.bf16.mxu0 %v7671_v43  ;;  %6607 = vmatprep.subr.bf16.mxu1 %v7671_v43 }
  0x1a   :  { %5585 = vmatmul.mubr.msk.f32.vlgmr.msra.gmra.mrb[0].mxu0 %vm61_vm1, %v7562_v13  ;;  %5610 = vmatmul.mubr.msk.f32.vlgmr.msra.gmra.mrb[0].mxu1 %vm61_vm1, %v7579_v16  ;;  %v7775_v13 = vld [vmem:[%s9230_s0 + $0x30] sm:$0xff]  ;;  %v5627_v16 = vld [vmem:[%s9230_s0 + $0x38] sm:$0x3] }
  0x1b   :  { %6585 = vmatpush1.bf16.msra.mxu0 %v7679_v46  ;;  %6609 = vmatpush1.bf16.msra.mxu1 %v7679_v46  ;;  %v1260_v17 = vrot.slane %v7775_v13, 1  ;;  %v1261_v18 = vrot.slane %v5627_v16, 1  ;;  %v1419_v30 = vrot.slane %v7775_v13, 2 }
  0x1c   :  { %6587 = vmatprep.subr.bf16.mxu0 %v7683_v47  ;;  %6611 = vmatprep.subr.bf16.mxu1 %v7683_v47 }
  0x1d   :  { %289 = vmatprep.mubr.f32.mxu0 %v7480_v3  ;;  %589 = vmatprep.mubr.f32.mxu1 %v7480_v3  ;;  %v1262_v20 = vsel %vm57_vm0, %v1260_v17, %v1261_v18  ;;  %v5655_v17 = vld [vmem:[%s9232_s2 + $0xb8] sm:$0xff] }
  0x1f   :  { %6589 = vmatpush1.bf16.msra.mxu0 %v7699_v50  ;;  %6613 = vmatpush1.bf16.msra.mxu1 %v7699_v50 }
  0x20   :  { %233 = vmatprep.subr.mxu0 %v7708_v53  ;;  %533 = vmatprep.subr.mxu1 %v7708_v53 }
  0x23   :  { %234 = vmatpush1.msra.mxu0 %v7721_v56  ;;  %534 = vmatpush1.msra.mxu1 %v7721_v56 }
  0x24   :  { %5596 = vmatmul.mubr.msk.f32.vlgmr.msra.gmra.mrb[0].mxu0 %vm61_vm1, %v222_v57  ;;  %5621 = vmatmul.mubr.msk.f32.vlgmr.msra.gmra.mrb[0].mxu1 %vm61_vm1, %v522_v58 }
  0x25   :  { %6615 = vmatprep.subr.bf16.mxu0 %v7532_v4  ;;  %6699 = vmatprep.subr.bf16.mxu1 %v7532_v4 }
  0x26   :  { %6617 = vmatpush1.bf16.msra.mxu0 %v7543_v8  ;;  %6701 = vmatpush1.bf16.msra.mxu1 %v7543_v8 }
  0x27   :  { %6619 = vmatprep.subr.bf16.mxu0 %v7545_v9  ;;  %6703 = vmatprep.subr.bf16.mxu1 %v7545_v9 }
  0x28   :  { %728 = vmatprep.mubr.f32.mxu0 %v7480_v3  ;;  %1329 = vmatprep.mubr.f32.mxu1 %v7480_v3 }
  0x2a   :  { %6621 = vmatpush1.bf16.msra.mxu0 %v7557_v12  ;;  %6705 = vmatpush1.bf16.msra.mxu1 %v7557_v12  ;;  %v5625_v12 = vld [vmem:[%s9230_s0 + $0x28] sm:$0x3] }
  0x2b   :  { %672 = vmatprep.subr.mxu0 %v7574_v15  ;;  %1273 = vmatprep.subr.mxu1 %v7574_v15  ;;  %v660_v15 = vrot.slane %v5625_v12, 1  ;;  %v819_v24 = vrot.slane %v5625_v12, 2 }
  0x2d   :  { %v661_v19 = vsel %vm57_vm0, %v659_v14, %v660_v15  ;;  %v820_v32 = vsel %vm219_vm2, %v818_v23, %v819_v24  ;;  %v914_v14 = vld [vmem:[%s9232_s2 + $0x90] sm:$0xff]  ;;  %v5653_v15 = vld [vmem:[%s9232_s2 + $0xa8] sm:$0xff] }
  0x2e   :  { %673 = vmatpush1.msra.mxu0 %v7609_v26  ;;  %1274 = vmatpush1.msra.mxu1 %v7609_v26  ;;  %v898_v26 = vld [vmem:[%s9232_s2 + $0x10] sm:$0xff]  ;;  %v7939_v18 = vpack.c.bf16 %v5655_v17, %v5653_v15 }
  0x2f   :  { %6623 = vmatprep.subr.bf16.mxu0 %v7611_v27  ;;  %6707 = vmatprep.subr.bf16.mxu1 %v7611_v27  ;;  %v901_v27 = vld [vmem:[%s9232_s2 + $0x28] sm:$0xff] }
  0x30   :  { %5638 = vmatmul.mubr.msk.f32.vlgmr.msra.gmra.mrb[2].mxu0 %vm61_vm1, %v661_v19  ;;  %5706 = vmatmul.mubr.msk.f32.vlgmr.msra.gmra.mrb[2].mxu1 %vm61_vm1, %v1262_v20  ;;  %v7841_v34 = vpack.c.bf16 %v903_v28, %v901_v27  ;;  %v5654_v27 = vld [vmem:[%s9232_s2 + $0xb0] sm:$0xff]  ;;  %v5657_v28 = vld [vmem:[%s9232_s2 + $0xc8] sm:$0xff] }
  0x31   :  { %6625 = vmatpush1.bf16.msra.mxu0 %v7620_v31  ;;  %6709 = vmatpush1.bf16.msra.mxu1 %v7620_v31  ;;  %v1420_v31 = vrot.slane %v5627_v16, 2 }
  0x32   :  { %6627 = vmatprep.subr.bf16.mxu0 %v7625_v33  ;;  %6711 = vmatprep.subr.bf16.mxu1 %v7625_v33  ;;  %v7838_v33 = vpack.c.bf16 %v898_v26, %v896_v25  ;;  %v5652_v26 = vld [vmem:[%s9232_s2 + $0xa0] sm:$0xff] }
  0x33   :  { %801 = vmatprep.mubr.f32.mxu0 %v7480_v3  ;;  %1402 = vmatprep.mubr.f32.mxu1 %v7480_v3  ;;  %v1421_v39 = vsel %vm219_vm2, %v1419_v30, %v1420_v31  ;;  %v5659_v30 = vld [vmem:[%s9232_s2 + $0xd8] sm:$0xff] }
  0x35   :  { %6629 = vmatpush1.bf16.msra.mxu0 %v7639_v36  ;;  %6713 = vmatpush1.bf16.msra.mxu1 %v7639_v36  ;;  %v902_v36 = vld [vmem:[%s9232_s2 + $0x30] sm:$0xff] }
  0x36   :  { %745 = vmatprep.subr.mxu0 %v7646_v37  ;;  %1346 = vmatprep.subr.mxu1 %v7646_v37  ;;  %v905_v37 = vld [vmem:[%s9232_s2 + $0x48] sm:$0xff]  ;;  %v7861_v40 = vpack.c.bf16 %v902_v36, %v900_v35  ;;  %v7963_v35 = vpack.c.bf16 %v5659_v30, %v5657_v28  ;;  %v5656_v36 = vld [vmem:[%s9232_s2 + $0xc0] sm:$0xff]  ;;  %v5683_v30 = vld [vmem:[%s9232_s2 + $0x190] sm:$0xff] }
  0x37   :  { %v7866_v41 = vpack.c.bf16 %v907_v38, %v905_v37  ;;  %v5658_v37 = vld [vmem:[%s9232_s2 + $0xd0] sm:$0xff]  ;;  %v5681_v28 = vld [vmem:[%s9232_s2 + $0x180] sm:$0xff] }
  0x39   :  { %746 = vmatpush1.msra.mxu0 %v7669_v42  ;;  %1347 = vmatpush1.msra.mxu1 %v7669_v42  ;;  %v904_v42 = vld [vmem:[%s9232_s2 + $0x40] sm:$0xff] }
  0x3a   :  { %6631 = vmatprep.subr.bf16.mxu0 %v7671_v43  ;;  %5639 = vmatmul.mubr.msk.f32.vlgmr.msra.gmra.mrb[2].mxu0 %vm61_vm1, %v5624_v11 }
  0x3b   :  { %6633 = vmatpush1.bf16.msra.mxu0 %v7679_v46  ;;  %6715 = vmatprep.subr.bf16.mxu1 %v7671_v43  ;;  %v906_v43 = vld [vmem:[%s9232_s2 + $0x50] sm:$0xff] }
  0x3c   :  { %6635 = vmatprep.subr.bf16.mxu0 %v7683_v47  ;;  %5707 = vmatmul.mubr.msk.f32.vlgmr.msra.gmra.mrb[2].mxu1 %vm61_vm1, %v7775_v13  ;;  %v912_v13 = vld [vmem:[%s9232_s2 + $0x80] sm:$0xff] }
  0x3d   :  { %887 = vmatprep.mubr.f32.mxu0 %v7480_v3  ;;  %6717 = vmatpush1.bf16.msra.mxu1 %v7679_v46  ;;  %v7886_v46 = vpack.c.bf16 %v906_v43, %v904_v42  ;;  %v7934_v16 = vpack.c.bf16 %v914_v14, %v912_v13  ;;  %v5663_v42 = vld [vmem:[%s9232_s2 + $0xf8] sm:$0xff]  ;;  %v7982_v43 = vpack.c.bf16 %v5658_v37, %v5656_v36 }
  0x3e   :  { %1488 = vmatprep.mubr.f32.mxu1 %v7480_v3  ;;  %6719 = vmatprep.subr.bf16.mxu1 %v7683_v47  ;;  %v7889_v47 = vpack.c.bf16 %v911_v45, %v909_v44  ;;  %v5660_v45 = vld [vmem:[%s9232_s2 + $0xe0] sm:$0xff]  ;;  %v5680_v13 = vld [vmem:[%s9232_s2 + $0x178] sm:$0xff] }
  0x3f   :  { %6637 = vmatpush1.bf16.msra.mxu0 %v7699_v50  ;;  %v5688_v36 = vld [vmem:[%s9232_s2 + $0x1b8] sm:$0xff] }
  0x40   :  { %831 = vmatprep.subr.mxu0 %v7708_v53 }
  0x41   :  { %6721 = vmatpush1.bf16.msra.mxu1 %v7699_v50 }
  0x42   :  { %1432 = vmatprep.subr.mxu1 %v7708_v53 }
  0x43   :  { %832 = vmatpush1.msra.mxu0 %v7721_v56 }
  0x44   :  { %6639 = vmatprep.subr.bf16.mxu0 %v7834_v29  ;;  %5650 = vmatmul.mubr.msk.f32.vlgmr.msra.gmra.mrb[2].mxu0 %vm61_vm1, %v820_v32  ;;  %v7961_v32 = vpack.c.bf16 %v5654_v27, %v5652_v26 }
  0x45   :  { %6641 = vmatpush1.bf16.msra.mxu0 %v7838_v33  ;;  %983 = vmatprep.mubr.f32.mxu0 %v7480_v3 }
  0x46   :  { %1433 = vmatpush1.msra.mxu1 %v7721_v56  ;;  %6643 = vmatprep.subr.bf16.mxu0 %v7841_v34 }
  0x47   :  { %6723 = vmatprep.subr.bf16.mxu1 %v7834_v29  ;;  %5718 = vmatmul.mubr.msk.f32.vlgmr.msra.gmra.mrb[2].mxu1 %vm61_vm1, %v1421_v39  ;;  %v5661_v39 = vld [vmem:[%s9232_s2 + $0xe8] sm:$0xff] }
  0x48   :  { %6725 = vmatpush1.bf16.msra.mxu1 %v7838_v33  ;;  %1584 = vmatprep.mubr.f32.mxu1 %v7480_v3  ;;  %v7986_v44 = vpack.c.bf16 %v5663_v42, %v5661_v39  ;;  %v8119_v39 = vpack.c.bf16 %v5683_v30, %v5681_v28 }
  0x49   :  { %6645 = vmatpush1.bf16.msra.mxu0 %v7861_v40  ;;  %6727 = vmatprep.subr.bf16.mxu1 %v7841_v34 }
  0x4a   :  { %6647 = vmatprep.subr.bf16.mxu0 %v7866_v41 }
  0x4c   :  { %6729 = vmatpush1.bf16.msra.mxu1 %v7861_v40 }
  0x4d   :  { %6649 = vmatpush1.bf16.msra.mxu0 %v7886_v46  ;;  %6731 = vmatprep.subr.bf16.mxu1 %v7866_v41 }
  0x4e   :  { %6651 = vmatprep.subr.bf16.mxu0 %v7889_v47 }
  0x50   :  { %6733 = vmatpush1.bf16.msra.mxu1 %v7886_v46 }
  0x51   :  { %6735 = vmatprep.subr.bf16.mxu1 %v7889_v47 }
  0xf7   :  { %v7752_v2 = vpop.f32.mrb[0].mxu0  ;;  %v7754_v4 = vpop.f32.mrb[0].mxu1 }
  0xf8   :  { %v293_v5 = vpop.f32.mrb[1].mxu0  ;;  %v593_v6 = vpop.f32.mrb[1].mxu1  ;;  %v309_v48 = vadd.f32 %v7748_v63, %v7752_v2  ;;  %v598_v50 = vadd.f32 %v7754_v4, %v7748_v63  ;;  %v908_v4 = vld [vmem:[%s9232_s2 + $0x60] sm:$0xff] }
  0xf9   :  { %v7757_v7 = vadd.f32 %v7750_v1, %v293_v5  ;;  %v7761_v8 = vadd.f32 %v593_v6, %v7750_v1  ;;  %v910_v5 = vld [vmem:[%s9232_s2 + $0x70] sm:$0xff]  ;;  %v913_v6 = vld [vmem:[%s9232_s2 + $0x88] sm:$0xff] }
  0xfa   :  { %v5597_v49 = vmul.f32 -1.442695, %v309_v48  ;;  %v5622_v51 = vmul.f32 -1.442695, %v598_v50  ;;  %v5662_v48 = vld [vmem:[%s9232_s2 + $0xf0] sm:$0xff]  ;;  %v5667_v50 = vld [vmem:[%s9232_s2 + $0x118] sm:$0xff] }
  0xfb   :  { %7384 = vtanh.f32 %v7757_v7  ;;  %v5598_v52 = vmul.f32 -1.442695, %v7757_v7  ;;  %v5623_v54 = vmul.f32 -1.442695, %v7761_v8  ;;  %v7913_v7 = vpack.c.bf16 %v910_v5, %v908_v4 }
  0xfc   :  { %7386 = vtanh.f32 %v7761_v8  ;;  %v915_v8 = vld [vmem:[%s9232_s2 + $0x98] sm:$0xff] }
  0xfd   :  { %7388 = vpow2.f32 %v5597_v49  ;;  %v7918_v11 = vpack.c.bf16 %v915_v8, %v913_v6  ;;  %6653 = vmatpush1.bf16.msra.mxu0 %v7913_v7  ;;  %6737 = vmatpush1.bf16.msra.mxu1 %v7913_v7  ;;  %v5665_v49 = vld [vmem:[%s9232_s2 + $0x108] sm:$0xff]  ;;  %v5673_v6 = vld [vmem:[%s9232_s2 + $0x140] sm:$0xff]  ;;  %v5675_v8 = vld [vmem:[%s9232_s2 + $0x150] sm:$0xff] }
  0xfe   :  { %7390 = vpow2.f32 %v5622_v51  ;;  %v8070_v14 = vpack.c.bf16 %v5675_v8, %v5673_v6 }
  0xff   :  { %7392 = vpow2.f32 %v5598_v52  ;;  %6655 = vmatprep.subr.bf16.mxu0 %v7918_v11  ;;  %6739 = vmatprep.subr.bf16.mxu1 %v7918_v11  ;;  %v8005_v52 = vpack.c.bf16 %v5662_v48, %v5660_v45  ;;  %v5685_v45 = vld [vmem:[%s9232_s2 + $0x1a0] sm:$0xff]  ;;  %v5687_v48 = vld [vmem:[%s9232_s2 + $0x1b0] sm:$0xff] }
 0x100   :  { %7394 = vpow2.f32 %v5623_v54  ;;  %v5664_v54 = vld [vmem:[%s9232_s2 + $0x100] sm:$0xff] }
 0x101   :  { %6657 = vmatpush1.bf16.msra.mxu0 %v7934_v16  ;;  %6741 = vmatpush1.bf16.msra.mxu1 %v7934_v16 }
 0x102   :  { %6659 = vmatprep.subr.bf16.mxu0 %v7939_v18  ;;  %6743 = vmatprep.subr.bf16.mxu1 %v7939_v18 }
 0x105   :  { %v7385_v9 = vpop.eup %7384 }
 0x106   :  { %325 = vrot.lane.b32.xlu0 %v7385_v9, %s7481_s3  ;;  %v7387_v10 = vpop.eup %7386 }
 0x107   :  { %v7389_v53 = vpop.eup %7388 }
 0x108   :  { %v314_v55 = vadd.f32 1.0, %v7389_v53  ;;  %v7391_v56 = vpop.eup %7390  ;;  %v8009_v53 = vpack.c.bf16 %v5667_v50, %v5665_v49  ;;  %v5690_v49 = vld [vmem:[%s9232_s2 + $0x1c8] sm:$0xff]  ;;  %v5692_v50 = vld [vmem:[%s9232_s2 + $0x1d8] sm:$0xff] }
 0x109   :  { %v603_v57 = vadd.f32 1.0, %v7391_v56  ;;  %v7393_v58 = vpop.eup %7392  ;;  %v5669_v56 = vld [vmem:[%s9232_s2 + $0x128] sm:$0xff] }
 0x10a   :  { %614 = vrot.lane.b32.xlu0 %v7387_v10, %s7481_s3  ;;  %7396 = vrcp.f32 %v314_v55  ;;  %v320_v59 = vadd.f32 1.0, %v7393_v58  ;;  %v7395_v60 = vpop.eup %7394  ;;  %v5666_v55 = vld [vmem:[%s9232_s2 + $0x110] sm:$0xff] }
 0x10b   :  { %7398 = vrcp.f32 %v603_v57  ;;  %v609_v2 = vadd.f32 1.0, %v7395_v60  ;;  %v5671_v57 = vld [vmem:[%s9232_s2 + $0x138] sm:$0xff]  ;;  %v8026_v58 = vpack.c.bf16 %v5666_v55, %v5664_v54  ;;  %v5668_v60 = vld [vmem:[%s9232_s2 + $0x120] sm:$0xff]  ;;  %v8140_v54 = vpack.c.bf16 %v5687_v48, %v5685_v45 }
 0x10c   :  { %7400 = vrcp.f32 %v320_v59  ;;  %v8030_v59 = vpack.c.bf16 %v5671_v57, %v5669_v56  ;;  %v8144_v55 = vpack.c.bf16 %v5692_v50, %v5690_v49  ;;  %v5689_v56 = vld [vmem:[%s9232_s2 + $0x1c0] sm:$0xff]  ;;  %v5691_v57 = vld [vmem:[%s9232_s2 + $0x1d0] sm:$0xff] }
 0x114   :  { %v7397_v61 = vpop.eup %7396 }
 0x115   :  { %v7399_v9 = vpop.eup %7398 }
 0x116   :  { %v7401_v19 = vpop.eup %7400 }
 0x178   :  { %v326_v62 = vpop.permute.xlu0 %325 }
 0x179   :  { %v328_v0 = vmul.f32 %v7397_v61, %v326_v62  ;;  %v5670_v61 = vld [vmem:[%s9232_s2 + $0x130] sm:$0xff]  ;;  %v5674_v62 = vld [vmem:[%s9232_s2 + $0x148] sm:$0xff] }
 0x17a   :  { %v8048_v4 = vpack.c.bf16 %v5670_v61, %v5668_v60  ;;  %v8154_v60 = vpack.c.bf16 %v5691_v57, %v5689_v56 }
 0x17b   :  { %7402 = vtanh.f32 %v328_v0  ;;  %332 = vst.msk [vmem:[#allocation3] sm:$0xff] %vm331_vm5, %v328_v0  ;;  %v5676_v0 = vld [vmem:[%s9232_s2 + $0x158] sm:$0xff] }
 0x17c   :  { %v615_v10 = vpop.permute.xlu0 %614  ;;  %7404 = vrcp.f32 %v609_v2  ;;  %v8052_v5 = vpack.c.bf16 %v5676_v0, %v5674_v62 }
 0x17d   :  { %v617_v12 = vmul.f32 %v7399_v9, %v615_v10 }
 0x17f   :  { %7406 = vtanh.f32 %v617_v12  ;;  %621 = vst.msk [vmem:[#allocation3 + $0x8] sm:$0xff] %vm331_vm5, %v617_v12  ;;  %v5678_v12 = vld [vmem:[%s9232_s2 + $0x168] sm:$0xff] }
 0x180   :  { %v8076_v17 = vpack.c.bf16 %v5680_v13, %v5678_v12 }
 0x185   :  { %v7403_v20 = vpop.eup %7402 }
 0x186   :  { %v330_v21 = vmul.f32 %v7403_v20, %v7401_v19  ;;  %v7405_v22 = vpop.eup %7404  ;;  %v5677_v19 = vld [vmem:[%s9232_s2 + $0x160] sm:$0xff]  ;;  %v5679_v20 = vld [vmem:[%s9232_s2 + $0x170] sm:$0xff] }
 0x187   :  { %v8096_v26 = vpack.c.bf16 %v5679_v20, %v5677_v19  ;;  %v1206_v19 = vld [vmem:[#allocation3] sm:$0xff] }
 0x188   :  { %334 = vrot.lane.b32.xlu1 %v330_v21, %s7482_s23 }
 0x189   :  { %v7407_v23 = vpop.eup %7406 }
 0x18a   :  { %v619_v24 = vmul.f32 %v7407_v23, %v7405_v22  ;;  %v5682_v22 = vld [vmem:[%s9232_s2 + $0x188] sm:$0xff]  ;;  %v5684_v23 = vld [vmem:[%s9232_s2 + $0x198] sm:$0xff] }
 0x18b   :  { %v8101_v27 = vpack.c.bf16 %v5684_v23, %v5682_v22 }
 0x18c   :  { %623 = vrot.lane.b32.xlu1 %v619_v24, %s7482_s23 }
 0x1fa   :  { %v335_v25 = vpop.permute.xlu1 %334 }
 0x1fb   :  { %338 = vst.msk [vmem:[#allocation2 + $0x1] sm:$0xff] %vm337_vm6, %v335_v25 }
 0x1fe   :  { %v624_v31 = vpop.permute.xlu1 %623 }
 0x1ff   :  { %627 = vst.msk [vmem:[#allocation2 + $0x11] sm:$0xff] %vm337_vm6, %v624_v31  ;;  %v5686_v31 = vld [vmem:[%s9232_s2 + $0x1a8] sm:$0xff] }
 0x200   :  { %v8123_v42 = vpack.c.bf16 %v5688_v36, %v5686_v31 }
 0x202   :  { %v7971_v38 = vld [vmem:[#allocation2] sm:$0xff]  ;;  %v8045_v2 = vld [vmem:[#allocation2 + $0x8] sm:$0x3] }
 0x203   :  { %5651 = vmatmul.mubr.msk.f32.vlgmr.msra.gmra.mrb[2].mxu0 %vm23_vm3, %v7971_v38  ;;  %v1014_v9 = vrot.slane %v7971_v38, 1  ;;  %v1015_v10 = vrot.slane %v8045_v2, 1  ;;  %v1113_v61 = vrot.slane %v7971_v38, 2  ;;  %v1114_v62 = vrot.slane %v8045_v2, 2 }
 0x204   :  { %6661 = vmatpush1.bf16.msra.mxu0 %v7961_v32  ;;  %1083 = vmatprep.mubr.f32.mxu0 %v7480_v3 }
 0x205   :  { %6663 = vmatprep.subr.bf16.mxu0 %v7963_v35  ;;  %v1016_v21 = vsel %vm57_vm0, %v1014_v9, %v1015_v10  ;;  %v1115_v0 = vsel %vm219_vm2, %v1113_v61, %v1114_v62 }
 0x206   :  { %v8000_v51 = vld [vmem:[#allocation2 + $0x10] sm:$0xff]  ;;  %v8072_v15 = vld [vmem:[#allocation2 + $0x18] sm:$0x3] }
 0x207   :  { %5719 = vmatmul.mubr.msk.f32.vlgmr.msra.gmra.mrb[2].mxu1 %vm23_vm3, %v8000_v51  ;;  %v1614_v24 = vrot.slane %v8000_v51, 1  ;;  %v1615_v25 = vrot.slane %v8072_v15, 1  ;;  %v1712_v6 = vrot.slane %v8000_v51, 2  ;;  %v1713_v8 = vrot.slane %v8072_v15, 2 }
 0x208   :  { %6665 = vmatpush1.bf16.msra.mxu0 %v7982_v43  ;;  %6745 = vmatpush1.bf16.msra.mxu1 %v7961_v32 }
 0x209   :  { %6667 = vmatprep.subr.bf16.mxu0 %v7986_v44  ;;  %6747 = vmatprep.subr.bf16.mxu1 %v7963_v35  ;;  %v1616_v37 = vsel %vm57_vm0, %v1614_v24, %v1615_v25  ;;  %v1714_v38 = vsel %vm219_vm2, %v1712_v6, %v1713_v8 }
 0x20a   :  { %1683 = vmatprep.mubr.f32.mxu1 %v7480_v3 }
 0x20c   :  { %6669 = vmatpush1.bf16.msra.mxu0 %v8005_v52  ;;  %6749 = vmatpush1.bf16.msra.mxu1 %v7982_v43 }
 0x20d   :  { %6671 = vmatprep.subr.bf16.mxu0 %v8009_v53  ;;  %6751 = vmatprep.subr.bf16.mxu1 %v7986_v44 }
 0x210   :  { %6673 = vmatpush1.bf16.msra.mxu0 %v8026_v58  ;;  %6753 = vmatpush1.bf16.msra.mxu1 %v8005_v52 }
 0x211   :  { %6675 = vmatprep.subr.bf16.mxu0 %v8030_v59  ;;  %6755 = vmatprep.subr.bf16.mxu1 %v8009_v53 }
 0x214   :  { %6677 = vmatpush1.bf16.msra.mxu0 %v8048_v4  ;;  %6757 = vmatpush1.bf16.msra.mxu1 %v8026_v58 }
 0x215   :  { %6679 = vmatprep.subr.bf16.mxu0 %v8052_v5  ;;  %6759 = vmatprep.subr.bf16.mxu1 %v8030_v59 }
 0x217   :  { %5672 = vmatmul.mubr.msk.f32.vlgmr.msra.gmra.mrb[2].mxu0 %vm23_vm3, %v1016_v21  ;;  %v1805_v21 = vld [vmem:[#allocation3 + $0x8] sm:$0xff] }
 0x218   :  { %6681 = vmatpush1.bf16.msra.mxu0 %v8070_v14  ;;  %1182 = vmatprep.mubr.f32.mxu0 %v7480_v3 }
 0x219   :  { %6761 = vmatpush1.bf16.msra.mxu1 %v8048_v4  ;;  %6683 = vmatprep.subr.bf16.mxu0 %v8076_v17 }
 0x21a   :  { %6763 = vmatprep.subr.bf16.mxu1 %v8052_v5 }
 0x21c   :  { %5740 = vmatmul.mubr.msk.f32.vlgmr.msra.gmra.mrb[2].mxu1 %vm23_vm3, %v1616_v37  ;;  %6685 = vmatpush1.bf16.msra.mxu0 %v8096_v26 }
 0x21d   :  { %6765 = vmatpush1.bf16.msra.mxu1 %v8070_v14  ;;  %6687 = vmatprep.subr.bf16.mxu0 %v8101_v27 }
 0x21e   :  { %6767 = vmatprep.subr.bf16.mxu1 %v8076_v17  ;;  %1781 = vmatprep.mubr.f32.mxu1 %v7480_v3 }
 0x220   :  { %6689 = vmatpush1.bf16.msra.mxu0 %v8119_v39 }
 0x221   :  { %6769 = vmatpush1.bf16.msra.mxu1 %v8096_v26  ;;  %6691 = vmatprep.subr.bf16.mxu0 %v8123_v42 }
 0x222   :  { %6771 = vmatprep.subr.bf16.mxu1 %v8101_v27 }
 0x224   :  { %6693 = vmatpush1.bf16.msra.mxu0 %v8140_v54 }
 0x225   :  { %6773 = vmatpush1.bf16.msra.mxu1 %v8119_v39  ;;  %6695 = vmatprep.subr.bf16.mxu0 %v8144_v55 }
 0x226   :  { %6775 = vmatprep.subr.bf16.mxu1 %v8123_v42 }
 0x228   :  { %6697 = vmatpush1.bf16.msra.mxu0 %v8154_v60 }
 0x229   :  { %6777 = vmatpush1.bf16.msra.mxu1 %v8140_v54 }
 0x22a   :  { %6779 = vmatprep.subr.bf16.mxu1 %v8144_v55 }
 0x22b   :  { %5693 = vmatmul.mubr.msk.f32.vlgmr.msra.gmra.mrb[2].mxu0 %vm23_vm3, %v1115_v0 }
 0x22c   :  { %1937 = vmatprep.mubr.f32.mxu0 %v7480_v3 }
 0x22d   :  { %6781 = vmatpush1.bf16.msra.mxu1 %v8154_v60 }
 0x230   :  { %5761 = vmatmul.mubr.msk.f32.vlgmr.msra.gmra.mrb[2].mxu1 %vm23_vm3, %v1714_v38 }
 0x231   :  { %2536 = vmatprep.mubr.f32.mxu1 %v7480_v3 }
 0x2fe   :  { %v1184_v2 = vpop.f32.mrb[2].mxu0 }
 0x2ff   :  { %v1186_v9 = vpop.f32.mrb[3].mxu0  ;;  %v1191_v22 = vadd.f32 %v1184_v2, %v7748_v63 }
 0x300   :  { %v8174_v10 = vadd.f32 %v1186_v9, %v7750_v1  ;;  %v5769_v9 = vld [vmem:[%s9229_s1 + $0x58] sm:$0xff] }
 0x301   :  { %v5694_v23 = vmul.f32 -1.442695, %v1191_v22  ;;  %v5775_v22 = vld [vmem:[%s9229_s1 + $0x88] sm:$0xff] }
 0x302   :  { %7408 = vtanh.f32 %v8174_v10 }
 0x303   :  { %v1783_v51 = vpop.f32.mrb[2].mxu1 }
 0x304   :  { %v1785_v12 = vpop.f32.mrb[3].mxu1  ;;  %v1790_v24 = vadd.f32 %v1783_v51, %v7748_v63  ;;  %v5771_v51 = vld [vmem:[%s9229_s1 + $0x68] sm:$0xff] }
 0x305   :  { %v8178_v13 = vadd.f32 %v1785_v12, %v7750_v1  ;;  %v5768_v12 = vld [vmem:[%s9229_s1 + $0x50] sm:$0xff] }
 0x306   :  { %v5762_v25 = vmul.f32 -1.442695, %v1790_v24 }
 0x307   :  { %7410 = vtanh.f32 %v8178_v13 }
 0x308   :  { %7412 = vpow2.f32 %v5694_v23 }
 0x309   :  { %7414 = vpow2.f32 %v5762_v25  ;;  %v5772_v25 = vld [vmem:[%s9229_s1 + $0x70] sm:$0xff] }
 0x30c   :  { %v7409_v15 = vpop.eup %7408 }
 0x30d   :  { %1213 = vrot.lane.b32.xlu0 %v7409_v15, %s7481_s3 }
 0x311   :  { %v7411_v20 = vpop.eup %7410  ;;  %1208 = vrot.lane.b32.xlu0 %v1206_v19, %s7481_s3  ;;  %v8204_v19 = vpack.c.bf16 %v5771_v51, %v5769_v9 }
 0x312   :  { %1812 = vrot.lane.b32.xlu1 %v7411_v20, %s7481_s3  ;;  %v7413_v28 = vpop.eup %7412  ;;  %v5770_v20 = vld [vmem:[%s9229_s1 + $0x60] sm:$0xff] }
 0x313   :  { %v1196_v30 = vadd.f32 1.0, %v7413_v28  ;;  %v7415_v31 = vpop.eup %7414  ;;  %v8216_v23 = vpack.c.bf16 %v5770_v20, %v5768_v12  ;;  %v5774_v28 = vld [vmem:[%s9229_s1 + $0x80] sm:$0xff]  ;;  %6783 = vmatprep.subr.bf16.mxu0 %v8204_v19  ;;  %6867 = vmatprep.subr.bf16.mxu1 %v8204_v19  ;;  %v8288_v12 = vld [vmem:[%s9229_s1 + $0x90] sm:$0xff] }
 0x314   :  { %v1795_v36 = vadd.f32 1.0, %v7415_v31  ;;  %v8235_v31 = vld [vmem:[%s9230_s0 + $0x40] sm:$0xff] }
 0x315   :  { %7416 = vrcp.f32 %v1196_v30  ;;  %6785 = vmatpush1.bf16.msra.mxu0 %v8216_v23  ;;  %v8229_v30 = vpack.c.bf16 %v5774_v28, %v5772_v25  ;;  %6869 = vmatpush1.bf16.msra.mxu1 %v8216_v23  ;;  %v1850_v25 = vld [vmem:[%s9229_s1 + $0x20] sm:$0xff]  ;;  %v1852_v28 = vld [vmem:[%s9229_s1 + $0x30] sm:$0xff] }
 0x316   :  { %1807 = vrot.lane.b32.xlu1 %v1805_v21, %s7481_s3  ;;  %7418 = vrcp.f32 %v1795_v36  ;;  %v5773_v21 = vld [vmem:[%s9229_s1 + $0x78] sm:$0xff]  ;;  %v8240_v36 = vld [vmem:[%s9230_s0 + $0x48] sm:$0x3] }
 0x317   :  { %v8218_v24 = vpack.c.bf16 %v5775_v22, %v5773_v21 }
 0x319   :  { %6787 = vmatprep.subr.bf16.mxu0 %v8218_v24  ;;  %6871 = vmatprep.subr.bf16.mxu1 %v8218_v24 }
 0x31a   :  { %6789 = vmatpush1.bf16.msra.mxu0 %v8229_v30  ;;  %6873 = vmatpush1.bf16.msra.mxu1 %v8229_v30 }
 0x31f   :  { %v7417_v37 = vpop.eup %7416 }
 0x320   :  { %v7419_v49 = vpop.eup %7418 }
 0x37f   :  { %v1214_v45 = vpop.permute.xlu0 %1213 }
 0x380   :  { %v1216_v48 = vmul.f32 %v7417_v37, %v1214_v45 }
 0x382   :  { %1218 = vrot.lane.b32.xlu0 %v1216_v48, %s7481_s3  ;;  %v1847_v48 = vld [vmem:[%s9229_s1 + $0x8] sm:$0xff] }
 0x383   :  { %v1209_v57 = vpop.permute.xlu0 %1208 }
 0x384   :  { %v1813_v50 = vpop.permute.xlu1 %1812  ;;  %v1211_v61 = vmul.f32 %v7417_v37, %v1209_v57  ;;  %v8246_v37 = vld [vmem:[%s9229_s1 + $0x98] sm:$0xff]  ;;  %v8260_v57 = vld [vmem:[%s9230_s0 + $0x50] sm:$0xff] }
 0x385   :  { %v1815_v56 = vmul.f32 %v7419_v49, %v1813_v50  ;;  %v1868_v50 = vrot.slane %v8235_v31, 1  ;;  %v2467_v9 = vrot.slane %v8260_v57, 1  ;;  %1881 = vmatprep.subr.mxu0 %v8246_v37  ;;  %2480 = vmatprep.subr.mxu1 %v8246_v37 }
 0x386   :  { %1882 = vmatpush1.msra.mxu0 %v8288_v12  ;;  %2481 = vmatpush1.msra.mxu1 %v8288_v12 }
 0x387   :  { %1817 = vrot.lane.b32.xlu1 %v1815_v56, %s7481_s3  ;;  %v1869_v56 = vrot.slane %v8240_v36, 1 }
 0x388   :  { %v1808_v0 = vpop.permute.xlu1 %1807 }
 0x389   :  { %v1810_v8 = vmul.f32 %v7419_v49, %v1808_v0  ;;  %v1849_v49 = vld [vmem:[%s9229_s1 + $0x18] sm:$0xff]  ;;  %v1870_v20 = vsel %vm57_vm0, %v1868_v50, %v1869_v56  ;;  %v5781_v50 = vld [vmem:[%s9229_s1 + $0xa8] sm:$0xff] }
 0x38a   :  { %v8272_v0 = vld [vmem:[%s9230_s0 + $0x58] sm:$0x3]  ;;  %5778 = vmatmul.mubr.msk.f32.vlgmr.msra.gmra.mrb[4].mxu0 %vm61_vm1, %v1870_v20 }
 0x38b   :  { %v2468_v51 = vrot.slane %v8272_v0, 1  ;;  %2010 = vmatprep.mubr.f32.mxu0 %v7480_v3  ;;  %v5783_v56 = vld [vmem:[%s9229_s1 + $0xb8] sm:$0xff] }
 0x3f4   :  { %v1219_v62 = vpop.permute.xlu0 %1218 }
 0x3f5   :  { %v8189_v6 = vadd.f32 %v1219_v62, %v1211_v61  ;;  %v1846_v61 = vld [vmem:[%s9229_s1] sm:$0xff]  ;;  %v1848_v62 = vld [vmem:[%s9229_s1 + $0x10] sm:$0xff] }
 0x3f6   :  { %v8294_v21 = vpack.c.bf16 %v1848_v62, %v1846_v61  ;;  %v5780_v61 = vld [vmem:[%s9229_s1 + $0xa0] sm:$0xff]  ;;  %v5782_v62 = vld [vmem:[%s9229_s1 + $0xb0] sm:$0xff] }
 0x3f7   :  { %7420 = vtanh.f32 %v8189_v6  ;;  %v8352_v20 = vpack.c.bf16 %v5782_v62, %v5780_v61  ;;  %v2027_v61 = vrot.slane %v8235_v31, 2  ;;  %v2028_v62 = vrot.slane %v8240_v36, 2 }
 0x3f9   :  { %v1818_v38 = vpop.permute.xlu1 %1817  ;;  %v2029_v36 = vsel %vm219_vm2, %v2027_v61, %v2028_v62 }
 0x3fa   :  { %v8192_v2 = vadd.f32 %v1818_v38, %v1810_v8  ;;  %v1851_v8 = vld [vmem:[%s9229_s1 + $0x28] sm:$0xff]  ;;  %v1853_v38 = vld [vmem:[%s9229_s1 + $0x38] sm:$0xff] }
 0x3fb   :  { %v8296_v22 = vpack.c.bf16 %v1853_v38, %v1851_v8  ;;  %v5785_v8 = vld [vmem:[%s9229_s1 + $0xc8] sm:$0xff]  ;;  %v5787_v38 = vld [vmem:[%s9229_s1 + $0xd8] sm:$0xff] }
 0x3fc   :  { %7422 = vtanh.f32 %v8192_v2 }
 0x401   :  { %v7421_v15 = vpop.eup %7420 }
 0x402   :  { %1224 = vrot.lane.b32.xlu0 %v7421_v15, %s7481_s3  ;;  %v8290_v15 = vpack.c.bf16 %v1849_v49, %v1847_v48  ;;  %v8311_v48 = vpack.c.bf16 %v1852_v28, %v1850_v25  ;;  %v8319_v49 = vld [vmem:[%s9229_s1 + $0x48] sm:$0xff]  ;;  %v8355_v25 = vpack.c.bf16 %v5787_v38, %v5785_v8  ;;  %v5784_v28 = vld [vmem:[%s9229_s1 + $0xc0] sm:$0xff]  ;;  %v2626_v38 = vrot.slane %v8260_v57, 2 }
 0x403   :  { %v8391_v8 = vld [vmem:[%s9229_s1 + $0xe0] sm:$0xff] }
 0x404   :  { %6791 = vmatprep.subr.bf16.mxu0 %v8290_v15  ;;  %6875 = vmatprep.subr.bf16.mxu1 %v8290_v15 }
 0x405   :  { %6793 = vmatpush1.bf16.msra.mxu0 %v8294_v21 }
 0x406   :  { %v7423_v45 = vpop.eup %7422  ;;  %6795 = vmatprep.subr.bf16.mxu0 %v8296_v22 }
 0x407   :  { %1823 = vrot.lane.b32.xlu1 %v7423_v45, %s7481_s3  ;;  %v2469_v45 = vsel %vm57_vm0, %v2467_v9, %v2468_v51  ;;  %v8347_v9 = vld [vmem:[%s9229_s1 + $0x40] sm:$0xff]  ;;  %v8349_v51 = vpack.c.bf16 %v5783_v56, %v5781_v50  ;;  %v8378_v56 = vld [vmem:[%s9229_s1 + $0xe8] sm:$0xff] }
 0x408   :  { %5846 = vmatmul.mubr.msk.f32.vlgmr.msra.gmra.mrb[4].mxu1 %vm61_vm1, %v2469_v45  ;;  %v5786_v45 = vld [vmem:[%s9229_s1 + $0xd0] sm:$0xff] }
 0x409   :  { %6877 = vmatpush1.bf16.msra.mxu1 %v8294_v21  ;;  %2609 = vmatprep.mubr.f32.mxu1 %v7480_v3  ;;  %v8369_v50 = vpack.c.bf16 %v5786_v45, %v5784_v28 }
 0x40a   :  { %6879 = vmatprep.subr.bf16.mxu1 %v8296_v22  ;;  %6797 = vmatpush1.bf16.msra.mxu0 %v8311_v48 }
 0x40b   :  { %1954 = vmatprep.subr.mxu0 %v8319_v49 }
 0x40d   :  { %6881 = vmatpush1.bf16.msra.mxu1 %v8311_v48 }
 0x40e   :  { %2553 = vmatprep.subr.mxu1 %v8319_v49  ;;  %1955 = vmatpush1.msra.mxu0 %v8347_v9 }
 0x40f   :  { %6799 = vmatprep.subr.bf16.mxu0 %v8349_v51  ;;  %5779 = vmatmul.mubr.msk.f32.vlgmr.msra.gmra.mrb[4].mxu0 %vm61_vm1, %v8235_v31  ;;  %v2627_v31 = vrot.slane %v8272_v0, 2 }
 0x410   :  { %6801 = vmatpush1.bf16.msra.mxu0 %v8352_v20  ;;  %2096 = vmatprep.mubr.f32.mxu0 %v7480_v3 }
 0x411   :  { %2554 = vmatpush1.msra.mxu1 %v8347_v9  ;;  %6803 = vmatprep.subr.bf16.mxu0 %v8355_v25  ;;  %v2628_v28 = vsel %vm219_vm2, %v2626_v38, %v2627_v31 }
 0x412   :  { %6883 = vmatprep.subr.bf16.mxu1 %v8349_v51  ;;  %5847 = vmatmul.mubr.msk.f32.vlgmr.msra.gmra.mrb[4].mxu1 %vm61_vm1, %v8260_v57 }
 0x413   :  { %6885 = vmatpush1.bf16.msra.mxu1 %v8352_v20  ;;  %2695 = vmatprep.mubr.f32.mxu1 %v7480_v3 }
 0x414   :  { %6805 = vmatpush1.bf16.msra.mxu0 %v8369_v50  ;;  %6887 = vmatprep.subr.bf16.mxu1 %v8355_v25 }
 0x415   :  { %2040 = vmatprep.subr.mxu0 %v8378_v56 }
 0x417   :  { %6889 = vmatpush1.bf16.msra.mxu1 %v8369_v50 }
 0x418   :  { %2041 = vmatpush1.msra.mxu0 %v8391_v8  ;;  %2639 = vmatprep.subr.mxu1 %v8378_v56 }
 0x419   :  { %6807 = vmatprep.subr.bf16.mxu0 %v7834_v29  ;;  %5790 = vmatmul.mubr.msk.f32.vlgmr.msra.gmra.mrb[4].mxu0 %vm61_vm1, %v2029_v36 }
 0x41a   :  { %6809 = vmatpush1.bf16.msra.mxu0 %v7838_v33  ;;  %2192 = vmatprep.mubr.f32.mxu0 %v7480_v3 }
 0x41b   :  { %2640 = vmatpush1.msra.mxu1 %v8391_v8  ;;  %6811 = vmatprep.subr.bf16.mxu0 %v7841_v34 }
 0x41c   :  { %6891 = vmatprep.subr.bf16.mxu1 %v7834_v29  ;;  %5858 = vmatmul.mubr.msk.f32.vlgmr.msra.gmra.mrb[4].mxu1 %vm61_vm1, %v2628_v28  ;;  %v5695_v29 = vmul.f32 -1.442695, %v8174_v10 }
 0x41d   :  { %6893 = vmatpush1.bf16.msra.mxu1 %v7838_v33  ;;  %2791 = vmatprep.mubr.f32.mxu1 %v7480_v3  ;;  %v5763_v33 = vmul.f32 -1.442695, %v8178_v13 }
 0x41e   :  { %6813 = vmatpush1.bf16.msra.mxu0 %v7861_v40  ;;  %6895 = vmatprep.subr.bf16.mxu1 %v7841_v34  ;;  %7424 = vpow2.f32 %v5695_v29 }
 0x41f   :  { %6815 = vmatprep.subr.bf16.mxu0 %v7866_v41  ;;  %7426 = vpow2.f32 %v5763_v33 }
 0x421   :  { %6897 = vmatpush1.bf16.msra.mxu1 %v7861_v40 }
 0x422   :  { %6817 = vmatpush1.bf16.msra.mxu0 %v7886_v46  ;;  %6899 = vmatprep.subr.bf16.mxu1 %v7866_v41 }
 0x423   :  { %6819 = vmatprep.subr.bf16.mxu0 %v7889_v47 }
 0x425   :  { %6901 = vmatpush1.bf16.msra.mxu1 %v7886_v46 }
 0x426   :  { %6821 = vmatpush1.bf16.msra.mxu0 %v7913_v7  ;;  %6903 = vmatprep.subr.bf16.mxu1 %v7889_v47 }
 0x427   :  { %6823 = vmatprep.subr.bf16.mxu0 %v7918_v11 }
 0x428   :  { %v7425_v34 = vpop.eup %7424 }
 0x429   :  { %6905 = vmatpush1.bf16.msra.mxu1 %v7913_v7  ;;  %v1202_v40 = vadd.f32 1.0, %v7425_v34  ;;  %v7427_v41 = vpop.eup %7426 }
 0x42a   :  { %6825 = vmatpush1.bf16.msra.mxu0 %v7934_v16  ;;  %6907 = vmatprep.subr.bf16.mxu1 %v7918_v11  ;;  %v1801_v46 = vadd.f32 1.0, %v7427_v41 }
 0x42b   :  { %6827 = vmatprep.subr.bf16.mxu0 %v7939_v18  ;;  %7428 = vrcp.f32 %v1202_v40 }
 0x42c   :  { %7430 = vrcp.f32 %v1801_v46 }
 0x42d   :  { %6909 = vmatpush1.bf16.msra.mxu1 %v7934_v16 }
 0x42e   :  { %6911 = vmatprep.subr.bf16.mxu1 %v7939_v18 }
 0x435   :  { %v7429_v47 = vpop.eup %7428 }
 0x436   :  { %v7431_v16 = vpop.eup %7430 }
 0x474   :  { %v1225_v7 = vpop.permute.xlu0 %1224 }
 0x475   :  { %v1227_v11 = vmul.f32 %v7429_v47, %v1225_v7 }
 0x477   :  { %1234 = vrot.lane.b32.xlu0 %v1227_v11, %s7482_s23 }
 0x479   :  { %v1824_v57 = vpop.permute.xlu1 %1823 }
 0x47a   :  { %v1826_v18 = vmul.f32 %v7431_v16, %v1824_v57 }
 0x47b   :  { %1229 = vrot.lane.b32.xlu0 %v8189_v6, %s7481_s3 }
 0x47c   :  { %1833 = vrot.lane.b32.xlu1 %v1826_v18, %s7482_s23 }
 0x480   :  { %1828 = vrot.lane.b32.xlu1 %v8192_v2, %s7481_s3 }
 0x4e9   :  { %v1235_v10 = vpop.permute.xlu0 %1234 }
 0x4ea   :  { %1237 = vst.msk [vmem:[#allocation2 + $0x1] sm:$0xff] %vm337_vm6, %v1235_v10 }
 0x4ed   :  { %v1230_v13 = vpop.permute.xlu0 %1229 }
 0x4ee   :  { %1232 = vst.msk [vmem:[#allocation3] sm:$0xff] %vm331_vm5, %v1230_v13  ;;  %v1834_v0 = vpop.permute.xlu1 %1833 }
 0x4ef   :  { %1836 = vst.msk [vmem:[#allocation2 + $0x11] sm:$0xff] %vm337_vm6, %v1834_v0  ;;  %v5904_v0 = vld [vmem:[%s9230_s0 + $0x60] sm:$0xff] }
 0x4f1   :  { %v1842_v45 = vld [vmem:[#allocation2] sm:$0xff]  ;;  %v1843_v2 = vld [vmem:[#allocation2 + $0x8] sm:$0x3] }
 0x4f2   :  { %v1829_v61 = vpop.permute.xlu1 %1828  ;;  %5791 = vmatmul.mubr.msk.f32.vlgmr.msra.gmra.mrb[4].mxu0 %vm23_vm3, %v1842_v45 }
 0x4f3   :  { %1831 = vst.msk [vmem:[#allocation3 + $0x8] sm:$0xff] %vm331_vm5, %v1829_v61  ;;  %6829 = vmatpush1.bf16.msra.mxu0 %v7961_v32  ;;  %2291 = vmatprep.mubr.f32.mxu0 %v7480_v3  ;;  %v8543_v61 = vld [vmem:[%s9230_s0 + $0x70] sm:$0xff] }
 0x4f4   :  { %6831 = vmatprep.subr.bf16.mxu0 %v7963_v35 }
 0x4f6   :  { %v8443_v6 = vld [vmem:[#allocation2 + $0x10] sm:$0xff]  ;;  %v1845_v62 = vld [vmem:[#allocation2 + $0x18] sm:$0x3] }
 0x4f7   :  { %6833 = vmatpush1.bf16.msra.mxu0 %v7982_v43  ;;  %5859 = vmatmul.mubr.msk.f32.vlgmr.msra.gmra.mrb[4].mxu1 %vm23_vm3, %v8443_v6 }
 0x4f8   :  { %6913 = vmatpush1.bf16.msra.mxu1 %v7961_v32  ;;  %6835 = vmatprep.subr.bf16.mxu0 %v7986_v44  ;;  %v2222_v32 = vrot.slane %v1842_v45, 1 }
 0x4f9   :  { %6915 = vmatprep.subr.bf16.mxu1 %v7963_v35  ;;  %2890 = vmatprep.mubr.f32.mxu1 %v7480_v3  ;;  %v2223_v35 = vrot.slane %v1843_v2, 1 }
 0x4fb   :  { %6837 = vmatpush1.bf16.msra.mxu0 %v8005_v52 }
 0x4fc   :  { %6917 = vmatpush1.bf16.msra.mxu1 %v7982_v43  ;;  %6839 = vmatprep.subr.bf16.mxu0 %v8009_v53  ;;  %v2224_v43 = vsel %vm57_vm0, %v2222_v32, %v2223_v35  ;;  %v5907_v35 = vld [vmem:[%s9230_s0 + $0x78] sm:$0x3] }
 0x4fd   :  { %6919 = vmatprep.subr.bf16.mxu1 %v7986_v44  ;;  %v2821_v44 = vrot.slane %v8443_v6, 1 }
 0x4ff   :  { %6841 = vmatpush1.bf16.msra.mxu0 %v8026_v58 }
 0x500   :  { %6921 = vmatpush1.bf16.msra.mxu1 %v8005_v52  ;;  %6843 = vmatprep.subr.bf16.mxu0 %v8030_v59  ;;  %v2822_v52 = vrot.slane %v1845_v62, 1 }
 0x501   :  { %6923 = vmatprep.subr.bf16.mxu1 %v8009_v53 }
 0x502   :  { %v2823_v53 = vsel %vm57_vm0, %v2821_v44, %v2822_v52 }
 0x503   :  { %6845 = vmatpush1.bf16.msra.mxu0 %v8048_v4 }
 0x504   :  { %6925 = vmatpush1.bf16.msra.mxu1 %v8026_v58  ;;  %6847 = vmatprep.subr.bf16.mxu0 %v8052_v5  ;;  %v2320_v58 = vrot.slane %v1842_v45, 2  ;;  %v5905_v45 = vld [vmem:[%s9230_s0 + $0x68] sm:$0x3] }
 0x505   :  { %6927 = vmatprep.subr.bf16.mxu1 %v8030_v59  ;;  %v2321_v59 = vrot.slane %v1843_v2, 2  ;;  %v3075_v2 = vrot.slane %v5904_v0, 1  ;;  %v3076_v32 = vrot.slane %v5905_v45, 1 }
 0x506   :  { %5812 = vmatmul.mubr.msk.f32.vlgmr.msra.gmra.mrb[4].mxu0 %vm23_vm3, %v2224_v43  ;;  %v3675_v43 = vrot.slane %v5907_v35, 1 }
 0x507   :  { %6849 = vmatpush1.bf16.msra.mxu0 %v8070_v14  ;;  %2389 = vmatprep.mubr.f32.mxu0 %v7480_v3  ;;  %v3077_v44 = vsel %vm57_vm0, %v3075_v2, %v3076_v32  ;;  %v5932_v32 = vld [vmem:[%s9232_s2 + $0xa0] sm:$0xff] }
 0x508   :  { %6929 = vmatpush1.bf16.msra.mxu1 %v8048_v4  ;;  %6851 = vmatprep.subr.bf16.mxu0 %v8076_v17  ;;  %v2322_v4 = vsel %vm219_vm2, %v2320_v58, %v2321_v59  ;;  %v3317_v58 = vld [vmem:[%s9232_s2 + $0x28] sm:$0xff] }
 0x509   :  { %6931 = vmatprep.subr.bf16.mxu1 %v8052_v5  ;;  %v2919_v5 = vrot.slane %v8443_v6, 2 }
 0x50b   :  { %5880 = vmatmul.mubr.msk.f32.vlgmr.msra.gmra.mrb[4].mxu1 %vm23_vm3, %v2823_v53  ;;  %6853 = vmatpush1.bf16.msra.mxu0 %v8096_v26 }
 0x50c   :  { %6933 = vmatpush1.bf16.msra.mxu1 %v8070_v14  ;;  %6855 = vmatprep.subr.bf16.mxu0 %v8101_v27  ;;  %v2920_v14 = vrot.slane %v1845_v62, 2  ;;  %v3674_v62 = vrot.slane %v8543_v61, 1 }
 0x50d   :  { %6935 = vmatprep.subr.bf16.mxu1 %v8076_v17  ;;  %2988 = vmatprep.mubr.f32.mxu1 %v7480_v3 }
 0x50e   :  { %v2921_v17 = vsel %vm219_vm2, %v2919_v5, %v2920_v14  ;;  %v3676_v52 = vsel %vm57_vm0, %v3674_v62, %v3675_v43  ;;  %v3834_v5 = vrot.slane %v5907_v35, 2  ;;  %v5934_v35 = vld [vmem:[%s9232_s2 + $0xb0] sm:$0xff] }
 0x50f   :  { %6857 = vmatpush1.bf16.msra.mxu0 %v8119_v39 }
 0x510   :  { %6937 = vmatpush1.bf16.msra.mxu1 %v8096_v26  ;;  %6859 = vmatprep.subr.bf16.mxu0 %v8123_v42 }
 0x511   :  { %6939 = vmatprep.subr.bf16.mxu1 %v8101_v27 }
 0x513   :  { %6861 = vmatpush1.bf16.msra.mxu0 %v8140_v54 }
 0x514   :  { %6941 = vmatpush1.bf16.msra.mxu1 %v8119_v39  ;;  %6863 = vmatprep.subr.bf16.mxu0 %v8144_v55 }
 0x515   :  { %6943 = vmatprep.subr.bf16.mxu1 %v8123_v42 }
 0x517   :  { %6865 = vmatpush1.bf16.msra.mxu0 %v8154_v60 }
 0x518   :  { %6945 = vmatpush1.bf16.msra.mxu1 %v8140_v54  ;;  %6951 = vmatprep.subr.bf16.mxu0 %v8204_v19 }
 0x519   :  { %6947 = vmatprep.subr.bf16.mxu1 %v8144_v55 }
 0x51a   :  { %5833 = vmatmul.mubr.msk.f32.vlgmr.msra.gmra.mrb[4].mxu0 %vm23_vm3, %v2322_v4  ;;  %v3833_v4 = vrot.slane %v8543_v61, 2 }
 0x51b   :  { %6953 = vmatpush1.bf16.msra.mxu0 %v8216_v23  ;;  %3144 = vmatprep.mubr.f32.mxu0 %v7480_v3 }
 0x51c   :  { %6949 = vmatpush1.bf16.msra.mxu1 %v8154_v60  ;;  %6955 = vmatprep.subr.bf16.mxu0 %v8218_v24 }
 0x51d   :  { %7035 = vmatprep.subr.bf16.mxu1 %v8204_v19  ;;  %v2413_v19 = vld [vmem:[#allocation3] sm:$0xff] }
 0x51f   :  { %5901 = vmatmul.mubr.msk.f32.vlgmr.msra.gmra.mrb[4].mxu1 %vm23_vm3, %v2921_v17  ;;  %6957 = vmatpush1.bf16.msra.mxu0 %v8229_v30 }
 0x520   :  { %7037 = vmatpush1.bf16.msra.mxu1 %v8216_v23  ;;  %3088 = vmatprep.subr.mxu0 %v8246_v37 }
 0x521   :  { %7039 = vmatprep.subr.bf16.mxu1 %v8218_v24  ;;  %3743 = vmatprep.mubr.f32.mxu1 %v7480_v3  ;;  %v3012_v24 = vld [vmem:[#allocation3 + $0x8] sm:$0xff] }
 0x523   :  { %3089 = vmatpush1.msra.mxu0 %v8288_v12 }
 0x524   :  { %7041 = vmatpush1.bf16.msra.mxu1 %v8229_v30  ;;  %6959 = vmatprep.subr.bf16.mxu0 %v8290_v15 }
 0x525   :  { %3687 = vmatprep.subr.mxu1 %v8246_v37  ;;  %5918 = vmatmul.mubr.msk.f32.vlgmr.msra.gmra.mrb[6].mxu0 %vm61_vm1, %v3077_v44  ;;  %v6996_v44 = vpack.c.bf16 %v5934_v35, %v5932_v32  ;;  %v5965_v32 = vld [vmem:[%s9232_s2 + $0x1a0] sm:$0xff]  ;;  %v5967_v35 = vld [vmem:[%s9232_s2 + $0x1b0] sm:$0xff] }
 0x526   :  { %6961 = vmatpush1.bf16.msra.mxu0 %v8294_v21  ;;  %3217 = vmatprep.mubr.f32.mxu0 %v7480_v3 }
 0x527   :  { %6963 = vmatprep.subr.bf16.mxu0 %v8296_v22 }
 0x528   :  { %3688 = vmatpush1.msra.mxu1 %v8288_v12 }
 0x529   :  { %7043 = vmatprep.subr.bf16.mxu1 %v8290_v15  ;;  %5986 = vmatmul.mubr.msk.f32.vlgmr.msra.gmra.mrb[6].mxu1 %vm61_vm1, %v3676_v52 }
 0x52a   :  { %7045 = vmatpush1.bf16.msra.mxu1 %v8294_v21  ;;  %3816 = vmatprep.mubr.f32.mxu1 %v7480_v3  ;;  %v3313_v21 = vld [vmem:[%s9232_s2 + $0x8] sm:$0xff] }
 0x52b   :  { %7047 = vmatprep.subr.bf16.mxu1 %v8296_v22  ;;  %6965 = vmatpush1.bf16.msra.mxu0 %v8311_v48  ;;  %v3315_v22 = vld [vmem:[%s9232_s2 + $0x18] sm:$0xff] }
 0x52c   :  { %3161 = vmatprep.subr.mxu0 %v8319_v49  ;;  %v6974_v59 = vpack.c.bf16 %v3315_v22, %v3313_v21  ;;  %v5938_v21 = vld [vmem:[%s9232_s2 + $0xd0] sm:$0xff] }
 0x52e   :  { %7049 = vmatpush1.bf16.msra.mxu1 %v8311_v48  ;;  %v3234_v48 = vrot.slane %v5904_v0, 2 }
 0x52f   :  { %3760 = vmatprep.subr.mxu1 %v8319_v49  ;;  %3162 = vmatpush1.msra.mxu0 %v8347_v9  ;;  %v3235_v49 = vrot.slane %v5905_v45, 2 }
 0x530   :  { %6967 = vmatprep.subr.bf16.mxu0 %v8349_v51  ;;  %5919 = vmatmul.mubr.msk.f32.vlgmr.msra.gmra.mrb[6].mxu0 %vm61_vm1, %v5904_v0 }
 0x531   :  { %6969 = vmatpush1.bf16.msra.mxu0 %v8352_v20  ;;  %3303 = vmatprep.mubr.f32.mxu0 %v7480_v3  ;;  %v3236_v14 = vsel %vm219_vm2, %v3234_v48, %v3235_v49  ;;  %v5941_v48 = vld [vmem:[%s9232_s2 + $0xe8] sm:$0xff]  ;;  %v5943_v49 = vld [vmem:[%s9232_s2 + $0xf8] sm:$0xff] }
 0x532   :  { %3761 = vmatpush1.msra.mxu1 %v8347_v9  ;;  %6971 = vmatprep.subr.bf16.mxu0 %v8355_v25  ;;  %v3312_v9 = vld [vmem:[%s9232_s2] sm:$0xff] }
 0x533   :  { %7051 = vmatprep.subr.bf16.mxu1 %v8349_v51  ;;  %5987 = vmatmul.mubr.msk.f32.vlgmr.msra.gmra.mrb[6].mxu1 %vm61_vm1, %v8543_v61  ;;  %v3314_v51 = vld [vmem:[%s9232_s2 + $0x10] sm:$0xff] }
 0x534   :  { %7053 = vmatpush1.bf16.msra.mxu1 %v8352_v20  ;;  %3902 = vmatprep.mubr.f32.mxu1 %v7480_v3  ;;  %v3319_v20 = vld [vmem:[%s9232_s2 + $0x38] sm:$0xff]  ;;  %v6976_v17 = vpack.c.bf16 %v3314_v51, %v3312_v9 }
 0x535   :  { %6973 = vmatpush1.bf16.msra.mxu0 %v8369_v50  ;;  %7055 = vmatprep.subr.bf16.mxu1 %v8355_v25  ;;  %v6978_v25 = vpack.c.bf16 %v3319_v20, %v3317_v58  ;;  %v7002_v58 = vpack.c.bf16 %v5943_v49, %v5941_v48  ;;  %v5940_v20 = vld [vmem:[%s9232_s2 + $0xe0] sm:$0xff] }
 0x536   :  { %3247 = vmatprep.subr.mxu0 %v8378_v56 }
 0x538   :  { %7057 = vmatpush1.bf16.msra.mxu1 %v8369_v50  ;;  %v3323_v50 = vld [vmem:[%s9232_s2 + $0x58] sm:$0xff] }
 0x539   :  { %3248 = vmatpush1.msra.mxu0 %v8391_v8  ;;  %3846 = vmatprep.subr.mxu1 %v8378_v56 }
 0x53a   :  { %6975 = vmatprep.subr.bf16.mxu0 %v6974_v59  ;;  %5930 = vmatmul.mubr.msk.f32.vlgmr.msra.gmra.mrb[6].mxu0 %vm61_vm1, %v3236_v14 }
 0x53b   :  { %6977 = vmatpush1.bf16.msra.mxu0 %v6976_v17  ;;  %3399 = vmatprep.mubr.f32.mxu0 %v7480_v3 }
 0x53c   :  { %3847 = vmatpush1.msra.mxu1 %v8391_v8  ;;  %6979 = vmatprep.subr.bf16.mxu0 %v6978_v25  ;;  %v3327_v8 = vld [vmem:[%s9232_s2 + $0x78] sm:$0xff] }
 0x53d   :  { %7059 = vmatprep.subr.bf16.mxu1 %v6974_v59  ;;  %v5942_v59 = vld [vmem:[%s9232_s2 + $0xf0] sm:$0xff] }
 0x5ed   :  { %v2391_v26 = vpop.f32.mrb[4].mxu0 }
 0x5ee   :  { %v2393_v27 = vpop.f32.mrb[5].mxu0  ;;  %v2398_v30 = vadd.f32 %v2391_v26, %v7748_v63  ;;  %v3316_v26 = vld [vmem:[%s9232_s2 + $0x20] sm:$0xff] }
 0x5ef   :  { %v8513_v39 = vadd.f32 %v2393_v27, %v7750_v1  ;;  %v3318_v27 = vld [vmem:[%s9232_s2 + $0x30] sm:$0xff] }
 0x5f0   :  { %v5834_v37 = vmul.f32 -1.442695, %v2398_v30 }
 0x5f1   :  { %7432 = vtanh.f32 %v8513_v39 }
 0x5f2   :  { %v2990_v42 = vpop.f32.mrb[4].mxu1 }
 0x5f3   :  { %v2992_v54 = vpop.f32.mrb[5].mxu1  ;;  %v2997_v12 = vadd.f32 %v2990_v42, %v7748_v63  ;;  %v3321_v42 = vld [vmem:[%s9232_s2 + $0x48] sm:$0xff] }
 0x5f4   :  { %v8517_v55 = vadd.f32 %v2992_v54, %v7750_v1  ;;  %v3835_v54 = vsel %vm219_vm2, %v3833_v4, %v3834_v5  ;;  %v6982_v56 = vpack.c.bf16 %v3323_v50, %v3321_v42  ;;  %v5945_v4 = vld [vmem:[%s9232_s2 + $0x108] sm:$0xff]  ;;  %v5947_v5 = vld [vmem:[%s9232_s2 + $0x118] sm:$0xff] }
 0x5f5   :  { %v5902_v15 = vmul.f32 -1.442695, %v2997_v12  ;;  %5998 = vmatmul.mubr.msk.f32.vlgmr.msra.gmra.mrb[6].mxu1 %vm61_vm1, %v3835_v54  ;;  %v5835_v12 = vmul.f32 -1.442695, %v8513_v39  ;;  %v3329_v39 = vld [vmem:[%s9232_s2 + $0x88] sm:$0xff]  ;;  %v5951_v50 = vld [vmem:[%s9232_s2 + $0x138] sm:$0xff] }
 0x5f6   :  { %7434 = vtanh.f32 %v8517_v55  ;;  %7061 = vmatpush1.bf16.msra.mxu1 %v6976_v17  ;;  %3998 = vmatprep.mubr.f32.mxu1 %v7480_v3  ;;  %v7004_v17 = vpack.c.bf16 %v5942_v59, %v5940_v20  ;;  %v5949_v42 = vld [vmem:[%s9232_s2 + $0x128] sm:$0xff] }
 0x5f7   :  { %7436 = vpow2.f32 %v5834_v37  ;;  %7063 = vmatprep.subr.bf16.mxu1 %v6978_v25  ;;  %v7006_v25 = vpack.c.bf16 %v5947_v5, %v5945_v4 }
 0x5f8   :  { %7438 = vpow2.f32 %v5902_v15  ;;  %v5903_v15 = vmul.f32 -1.442695, %v8517_v55  ;;  %v3331_v55 = vld [vmem:[%s9232_s2 + $0x98] sm:$0xff] }
 0x5fb   :  { %v7433_v60 = vpop.eup %7432 }
 0x5fc   :  { %2420 = vrot.lane.b32.xlu0 %v7433_v60, %s7481_s3  ;;  %v6980_v60 = vpack.c.bf16 %v3318_v27, %v3316_v26  ;;  %v5944_v26 = vld [vmem:[%s9232_s2 + $0x100] sm:$0xff]  ;;  %v5946_v27 = vld [vmem:[%s9232_s2 + $0x110] sm:$0xff] }
 0x5fd   :  { %v7008_v54 = vpack.c.bf16 %v5946_v27, %v5944_v26 }
 0x5fe   :  { %6981 = vmatpush1.bf16.msra.mxu0 %v6980_v60  ;;  %7065 = vmatpush1.bf16.msra.mxu1 %v6980_v60  ;;  %v7010_v60 = vpack.c.bf16 %v5951_v50, %v5949_v42 }
 0x5ff   :  { %6983 = vmatprep.subr.bf16.mxu0 %v6982_v56  ;;  %7067 = vmatprep.subr.bf16.mxu1 %v6982_v56  ;;  %v5948_v56 = vld [vmem:[%s9232_s2 + $0x120] sm:$0xff] }
 0x600   :  { %v7435_v23 = vpop.eup %7434  ;;  %2415 = vrot.lane.b32.xlu0 %v2413_v19, %s7481_s3  ;;  %v3320_v19 = vld [vmem:[%s9232_s2 + $0x40] sm:$0xff] }
 0x601   :  { %3019 = vrot.lane.b32.xlu1 %v7435_v23, %s7481_s3  ;;  %v7437_v38 = vpop.eup %7436  ;;  %v3322_v23 = vld [vmem:[%s9232_s2 + $0x50] sm:$0xff] }
 0x602   :  { %v2403_v31 = vadd.f32 1.0, %v7437_v38  ;;  %v7439_v36 = vpop.eup %7438  ;;  %v6984_v30 = vpack.c.bf16 %v3322_v23, %v3320_v19  ;;  %v5950_v19 = vld [vmem:[%s9232_s2 + $0x130] sm:$0xff]  ;;  %v5954_v23 = vld [vmem:[%s9232_s2 + $0x148] sm:$0xff] }
 0x603   :  { %v3002_v28 = vadd.f32 1.0, %v7439_v36 }
 0x604   :  { %7440 = vrcp.f32 %v2403_v31  ;;  %6985 = vmatpush1.bf16.msra.mxu0 %v6984_v30  ;;  %7069 = vmatpush1.bf16.msra.mxu1 %v6984_v30  ;;  %v7012_v30 = vpack.c.bf16 %v5950_v19, %v5948_v56 }
 0x605   :  { %3014 = vrot.lane.b32.xlu1 %v3012_v24, %s7481_s3  ;;  %7442 = vrcp.f32 %v3002_v28  ;;  %v3325_v24 = vld [vmem:[%s9232_s2 + $0x68] sm:$0xff]  ;;  %v3324_v28 = vld [vmem:[%s9232_s2 + $0x60] sm:$0xff] }
 0x606   :  { %v6986_v37 = vpack.c.bf16 %v3327_v8, %v3325_v24  ;;  %v5956_v24 = vld [vmem:[%s9232_s2 + $0x158] sm:$0xff] }
 0x608   :  { %6987 = vmatprep.subr.bf16.mxu0 %v6986_v37  ;;  %7071 = vmatprep.subr.bf16.mxu1 %v6986_v37  ;;  %v7014_v37 = vpack.c.bf16 %v5956_v24, %v5954_v23 }
 0x60e   :  { %v7441_v29 = vpop.eup %7440 }
 0x60f   :  { %v7443_v40 = vpop.eup %7442 }
 0x66e   :  { %v2421_v33 = vpop.permute.xlu0 %2420 }
 0x66f   :  { %v2423_v34 = vmul.f32 %v7441_v29, %v2421_v33 }
 0x671   :  { %2425 = vrot.lane.b32.xlu0 %v2423_v34, %s7481_s3 }
 0x672   :  { %v2416_v47 = vpop.permute.xlu0 %2415 }
 0x673   :  { %v3020_v41 = vpop.permute.xlu1 %3019  ;;  %v2418_v7 = vmul.f32 %v7441_v29, %v2416_v47  ;;  %v3326_v29 = vld [vmem:[%s9232_s2 + $0x70] sm:$0xff] }
 0x674   :  { %v3022_v46 = vmul.f32 %v7443_v40, %v3020_v41  ;;  %v6988_v34 = vpack.c.bf16 %v3326_v29, %v3324_v28  ;;  %v3328_v41 = vld [vmem:[%s9232_s2 + $0x80] sm:$0xff]  ;;  %v5960_v28 = vld [vmem:[%s9232_s2 + $0x178] sm:$0xff] }
 0x676   :  { %3024 = vrot.lane.b32.xlu1 %v3022_v46, %s7481_s3  ;;  %6989 = vmatpush1.bf16.msra.mxu0 %v6988_v34  ;;  %v3330_v46 = vld [vmem:[%s9232_s2 + $0x90] sm:$0xff] }
 0x677   :  { %v3015_v16 = vpop.permute.xlu1 %3014  ;;  %7073 = vmatpush1.bf16.msra.mxu1 %v6988_v34  ;;  %v6992_v47 = vpack.c.bf16 %v3330_v46, %v3328_v41  ;;  %v5957_v34 = vld [vmem:[%s9232_s2 + $0x160] sm:$0xff]  ;;  %v5962_v41 = vld [vmem:[%s9232_s2 + $0x188] sm:$0xff]  ;;  %v5964_v46 = vld [vmem:[%s9232_s2 + $0x198] sm:$0xff] }
 0x678   :  { %v3017_v18 = vmul.f32 %v7443_v40, %v3015_v16  ;;  %v6990_v40 = vpack.c.bf16 %v3331_v55, %v3329_v39  ;;  %v5959_v55 = vld [vmem:[%s9232_s2 + $0x170] sm:$0xff] }
 0x67a   :  { %6991 = vmatprep.subr.bf16.mxu0 %v6990_v40  ;;  %7075 = vmatprep.subr.bf16.mxu1 %v6990_v40 }
 0x67b   :  { %6993 = vmatpush1.bf16.msra.mxu0 %v6992_v47  ;;  %7077 = vmatpush1.bf16.msra.mxu1 %v6992_v47 }
 0x6e3   :  { %v2426_v11 = vpop.permute.xlu0 %2425 }
 0x6e4   :  { %v8528_v57 = vadd.f32 %v2426_v11, %v2418_v7  ;;  %v5933_v7 = vld [vmem:[%s9232_s2 + $0xa8] sm:$0xff]  ;;  %v5935_v11 = vld [vmem:[%s9232_s2 + $0xb8] sm:$0xff] }
 0x6e5   :  { %v6994_v16 = vpack.c.bf16 %v5935_v11, %v5933_v7  ;;  %v7020_v11 = vpack.c.bf16 %v5959_v55, %v5957_v34 }
 0x6e6   :  { %7444 = vtanh.f32 %v8528_v57 }
 0x6e7   :  { %6995 = vmatprep.subr.bf16.mxu0 %v6994_v16  ;;  %7079 = vmatprep.subr.bf16.mxu1 %v6994_v16  ;;  %v7022_v16 = vpack.c.bf16 %v5964_v46, %v5962_v41 }
 0x6e8   :  { %v3025_v10 = vpop.permute.xlu1 %3024 }
 0x6e9   :  { %v8531_v13 = vadd.f32 %v3025_v10, %v3017_v18 }
 0x6eb   :  { %7446 = vtanh.f32 %v8531_v13 }
 0x6ec   :  { %7448 = vpow2.f32 %v5835_v12  ;;  %v5953_v12 = vld [vmem:[%s9232_s2 + $0x140] sm:$0xff] }
 0x6ed   :  { %7450 = vpow2.f32 %v5903_v15  ;;  %v5955_v15 = vld [vmem:[%s9232_s2 + $0x150] sm:$0xff] }
 0x6ee   :  { %v7016_v29 = vpack.c.bf16 %v5955_v15, %v5953_v12 }
 0x6f0   :  { %v7445_v6 = vpop.eup %7444 }
 0x6f1   :  { %2431 = vrot.lane.b32.xlu0 %v7445_v6, %s7481_s3 }
 0x6f5   :  { %v7447_v53 = vpop.eup %7446 }
 0x6f6   :  { %3030 = vrot.lane.b32.xlu1 %v7447_v53, %s7481_s3  ;;  %v7449_v38 = vpop.eup %7448  ;;  %v5936_v53 = vld [vmem:[%s9232_s2 + $0xc0] sm:$0xff] }
 0x6f7   :  { %v2409_v31 = vadd.f32 1.0, %v7449_v38  ;;  %v7451_v36 = vpop.eup %7450  ;;  %v7000_v51 = vpack.c.bf16 %v5938_v21, %v5936_v53 }
 0x6f8   :  { %v3008_v33 = vadd.f32 1.0, %v7451_v36  ;;  %v5958_v36 = vld [vmem:[%s9232_s2 + $0x168] sm:$0xff] }
 0x6f9   :  { %7452 = vrcp.f32 %v2409_v31 }
 0x6fa   :  { %7454 = vrcp.f32 %v3008_v33  ;;  %v7018_v33 = vpack.c.bf16 %v5960_v28, %v5958_v36 }
 0x703   :  { %v7453_v18 = vpop.eup %7452 }
 0x704   :  { %v7455_v45 = vpop.eup %7454 }
 0x763   :  { %v2432_v10 = vpop.permute.xlu0 %2431 }
 0x764   :  { %v2434_v0 = vmul.f32 %v7453_v18, %v2432_v10  ;;  %v5961_v18 = vld [vmem:[%s9232_s2 + $0x180] sm:$0xff]  ;;  %v5963_v10 = vld [vmem:[%s9232_s2 + $0x190] sm:$0xff] }
 0x766   :  { %2441 = vrot.lane.b32.xlu0 %v2434_v0, %s7482_s23  ;;  %v5966_v0 = vld [vmem:[%s9232_s2 + $0x1a8] sm:$0xff] }
 0x768   :  { %v3031_v61 = vpop.permute.xlu1 %3030 }
 0x769   :  { %v3033_v6 = vmul.f32 %v7455_v45, %v3031_v61  ;;  %v5968_v45 = vld [vmem:[%s9232_s2 + $0x1b8] sm:$0xff] }
 0x76a   :  { %2436 = vrot.lane.b32.xlu0 %v8528_v57, %s7481_s3  ;;  %v5937_v57 = vld [vmem:[%s9232_s2 + $0xc8] sm:$0xff] }
 0x76b   :  { %3040 = vrot.lane.b32.xlu1 %v3033_v6, %s7482_s23  ;;  %v7024_v6 = vpack.c.bf16 %v5963_v10, %v5961_v18 }
 0x76f   :  { %3035 = vrot.lane.b32.xlu1 %v8531_v13, %s7481_s3  ;;  %v5939_v13 = vld [vmem:[%s9232_s2 + $0xd8] sm:$0xff] }
 0x770   :  { %v6998_v52 = vpack.c.bf16 %v5939_v13, %v5937_v57  ;;  %v5972_v57 = vld [vmem:[%s9232_s2 + $0x1d8] sm:$0xff]  ;;  %v7028_v13 = vpack.c.bf16 %v5967_v35, %v5965_v32  ;;  %v6045_v32 = vld [vmem:[%s9233_s4 + $0x48] sm:$0xff]  ;;  %v4255_v35 = vld [vmem:[%s9233_s4] sm:$0xff] }
 0x7d8   :  { %v2442_v2 = vpop.permute.xlu0 %2441 }
 0x7d9   :  { %2444 = vst.msk [vmem:[#allocation2 + $0x1] sm:$0xff] %vm337_vm6, %v2442_v2  ;;  %v7026_v2 = vpack.c.bf16 %v5968_v45, %v5966_v0 }
 0x7dc   :  { %v2437_v62 = vpop.permute.xlu0 %2436 }
 0x7dd   :  { %2439 = vst.msk [vmem:[#allocation3] sm:$0xff] %vm331_vm5, %v2437_v62  ;;  %v3041_v43 = vpop.permute.xlu1 %3040  ;;  %v5970_v62 = vld [vmem:[%s9232_s2 + $0x1c8] sm:$0xff] }
 0x7de   :  { %3043 = vst.msk [vmem:[#allocation2 + $0x11] sm:$0xff] %vm337_vm6, %v3041_v43  ;;  %v7030_v43 = vpack.c.bf16 %v5972_v57, %v5970_v62  ;;  %v4256_v57 = vld [vmem:[%s9233_s4 + $0x8] sm:$0xff] }
 0x7e0   :  { %v8686_v22 = vld [vmem:[#allocation2] sm:$0xff]  ;;  %v8739_v8 = vld [vmem:[#allocation2 + $0x8] sm:$0x3] }
 0x7e1   :  { %v3036_v9 = vpop.permute.xlu1 %3035  ;;  %5931 = vmatmul.mubr.msk.f32.vlgmr.msra.gmra.mrb[6].mxu0 %vm23_vm3, %v8686_v22  ;;  %v3429_v38 = vrot.slane %v8686_v22, 1  ;;  %v3430_v31 = vrot.slane %v8739_v8, 1  ;;  %v3527_v21 = vrot.slane %v8686_v22, 2  ;;  %v3528_v48 = vrot.slane %v8739_v8, 2 }
 0x7e2   :  { %3038 = vst.msk [vmem:[#allocation3 + $0x8] sm:$0xff] %vm331_vm5, %v3036_v9  ;;  %6997 = vmatpush1.bf16.msra.mxu0 %v6996_v44  ;;  %3498 = vmatprep.mubr.f32.mxu0 %v7480_v3 }
 0x7e3   :  { %6999 = vmatprep.subr.bf16.mxu0 %v6998_v52  ;;  %v3431_v40 = vsel %vm57_vm0, %v3429_v38, %v3430_v31  ;;  %v3529_v49 = vsel %vm219_vm2, %v3527_v21, %v3528_v48 }
 0x7e5   :  { %v8710_v14 = vld [vmem:[#allocation2 + $0x10] sm:$0xff]  ;;  %v3052_v39 = vld [vmem:[#allocation2 + $0x18] sm:$0x3] }
 0x7e6   :  { %7001 = vmatpush1.bf16.msra.mxu0 %v7000_v51  ;;  %5999 = vmatmul.mubr.msk.f32.vlgmr.msra.gmra.mrb[6].mxu1 %vm23_vm3, %v8710_v14  ;;  %v4028_v47 = vrot.slane %v8710_v14, 1  ;;  %v4029_v7 = vrot.slane %v3052_v39, 1  ;;  %v4126_v9 = vrot.slane %v8710_v14, 2  ;;  %v3620_v14 = vld [vmem:[#allocation3] sm:$0xff] }
 0x7e7   :  { %7081 = vmatpush1.bf16.msra.mxu1 %v6996_v44  ;;  %7003 = vmatprep.subr.bf16.mxu0 %v7002_v58  ;;  %v5969_v44 = vld [vmem:[%s9232_s2 + $0x1c0] sm:$0xff] }
 0x7e8   :  { %7083 = vmatprep.subr.bf16.mxu1 %v6998_v52  ;;  %4097 = vmatprep.mubr.f32.mxu1 %v7480_v3  ;;  %v4030_v61 = vsel %vm57_vm0, %v4028_v47, %v4029_v7  ;;  %v5971_v52 = vld [vmem:[%s9232_s2 + $0x1d0] sm:$0xff] }
 0x7e9   :  { %v7032_v53 = vpack.c.bf16 %v5971_v52, %v5969_v44  ;;  %v4219_v27 = vld [vmem:[#allocation3 + $0x8] sm:$0xff]  ;;  %v8857_v44 = vpack.c.bf16 %v4256_v57, %v4255_v35  ;;  %v4257_v52 = vld [vmem:[%s9233_s4 + $0x10] sm:$0xff] }
 0x7ea   :  { %7005 = vmatpush1.bf16.msra.mxu0 %v7004_v17 }
 0x7eb   :  { %7085 = vmatpush1.bf16.msra.mxu1 %v7000_v51  ;;  %7007 = vmatprep.subr.bf16.mxu0 %v7006_v25  ;;  %v4127_v51 = vrot.slane %v3052_v39, 2 }
 0x7ec   :  { %7087 = vmatprep.subr.bf16.mxu1 %v7002_v58 }
 0x7ed   :  { %v4128_v58 = vsel %vm219_vm2, %v4126_v9, %v4127_v51  ;;  %v6049_v9 = vld [vmem:[%s9233_s4 + $0x68] sm:$0xff]  ;;  %v4259_v51 = vld [vmem:[%s9233_s4 + $0x20] sm:$0xff] }
 0x7ee   :  { %7009 = vmatpush1.bf16.msra.mxu0 %v7008_v54 }
 0x7ef   :  { %7089 = vmatpush1.bf16.msra.mxu1 %v7004_v17  ;;  %7011 = vmatprep.subr.bf16.mxu0 %v7010_v60 }
 0x7f0   :  { %7091 = vmatprep.subr.bf16.mxu1 %v7006_v25 }
 0x7f2   :  { %7013 = vmatpush1.bf16.msra.mxu0 %v7012_v30 }
 0x7f3   :  { %7093 = vmatpush1.bf16.msra.mxu1 %v7008_v54  ;;  %7015 = vmatprep.subr.bf16.mxu0 %v7014_v37 }
 0x7f4   :  { %7095 = vmatprep.subr.bf16.mxu1 %v7010_v60 }
 0x7f5   :  { %5952 = vmatmul.mubr.msk.f32.vlgmr.msra.gmra.mrb[6].mxu0 %vm23_vm3, %v3431_v40 }
 0x7f6   :  { %7017 = vmatpush1.bf16.msra.mxu0 %v7016_v29  ;;  %3596 = vmatprep.mubr.f32.mxu0 %v7480_v3 }
 0x7f7   :  { %7097 = vmatpush1.bf16.msra.mxu1 %v7012_v30  ;;  %7019 = vmatprep.subr.bf16.mxu0 %v7018_v33 }
 0x7f8   :  { %7099 = vmatprep.subr.bf16.mxu1 %v7014_v37 }
 0x7fa   :  { %6020 = vmatmul.mubr.msk.f32.vlgmr.msra.gmra.mrb[6].mxu1 %vm23_vm3, %v4030_v61  ;;  %7021 = vmatpush1.bf16.msra.mxu0 %v7020_v11 }
 0x7fb   :  { %7101 = vmatpush1.bf16.msra.mxu1 %v7016_v29  ;;  %7023 = vmatprep.subr.bf16.mxu0 %v7022_v16 }
 0x7fc   :  { %7103 = vmatprep.subr.bf16.mxu1 %v7018_v33  ;;  %4195 = vmatprep.mubr.f32.mxu1 %v7480_v3 }
 0x7fe   :  { %7025 = vmatpush1.bf16.msra.mxu0 %v7024_v6 }
 0x7ff   :  { %7105 = vmatpush1.bf16.msra.mxu1 %v7020_v11  ;;  %7027 = vmatprep.subr.bf16.mxu0 %v7026_v2 }
 0x800   :  { %7107 = vmatprep.subr.bf16.mxu1 %v7022_v16 }
 0x802   :  { %7029 = vmatpush1.bf16.msra.mxu0 %v7028_v13 }
 0x803   :  { %7109 = vmatpush1.bf16.msra.mxu1 %v7024_v6  ;;  %7031 = vmatprep.subr.bf16.mxu0 %v7030_v43  ;;  %v7483_v6 = vmov 0.0|0.0  }
 0x804   :  { %7111 = vmatprep.subr.bf16.mxu1 %v7026_v2  ;;  %v6044_v2 = vld [vmem:[%s9233_s4 + $0x40] sm:$0xff] }
 0x805   :  { %v8842_v62 = vpack.c.bf16 %v6045_v32, %v6044_v2  ;;  %v6058_v2 = vld [vmem:[%s9233_s4 + $0x90] sm:$0xff]  ;;  %v6059_v32 = vld [vmem:[%s9233_s4 + $0x98] sm:$0xff] }
 0x806   :  { %7033 = vmatpush1.bf16.msra.mxu0 %v7032_v53 }
 0x807   :  { %7113 = vmatpush1.bf16.msra.mxu1 %v7028_v13  ;;  %7118 = vmatprep.subr.bf16.mxu0 %v7483_v6  ;;  %v6046_v13 = vld [vmem:[%s9233_s4 + $0x50] sm:$0xff] }
 0x808   :  { %7115 = vmatprep.subr.bf16.mxu1 %v7030_v43  ;;  %v6047_v43 = vld [vmem:[%s9233_s4 + $0x58] sm:$0xff] }
 0x809   :  { %5973 = vmatmul.mubr.msk.f32.vlgmr.msra.gmra.mrb[6].mxu0 %vm23_vm3, %v3529_v49  ;;  %v8866_v21 = vpack.c.bf16 %v6047_v43, %v6046_v13  ;;  %v6048_v49 = vld [vmem:[%s9233_s4 + $0x60] sm:$0xff] }
 0x80a   :  { %6278 = vmatprep.mubr.msk.f32.mxu0 %vm7484_vm7, %v7480_v3  ;;  %7120 = vmatpush3.bf16.msra.mxu0 %v8842_v62 }
 0x80b   :  { %7117 = vmatpush1.bf16.msra.mxu1 %v7032_v53  ;;  %v4258_v53 = vld [vmem:[%s9233_s4 + $0x18] sm:$0xff]  ;;  %7121 = vmatprep.subr.bf16.mxu0 %v7483_v6 }
 0x80c   :  { %7130 = vmatprep.subr.bf16.mxu1 %v7483_v6  ;;  %v8870_v48 = vpack.c.bf16 %v4258_v53, %v4257_v52  ;;  %v7170_v53 = vpack.c.bf16 %v6059_v32, %v6058_v2  ;;  %v6090_v2 = vld [vmem:[%s9233_s4 + $0x160] sm:$0xff] }
 0x80e   :  { %6041 = vmatmul.mubr.msk.f32.vlgmr.msra.gmra.mrb[6].mxu1 %vm23_vm3, %v4128_v58  ;;  %v4260_v58 = vld [vmem:[%s9233_s4 + $0x28] sm:$0xff]  ;;  %7123 = vmatpush3.bf16.msra.mxu0 %v8866_v21 }
 0x80f   :  { %6297 = vmatprep.mubr.msk.f32.mxu1 %vm7484_vm7, %v7480_v3  ;;  %7132 = vmatpush3.bf16.msra.mxu1 %v8857_v44 }
 0x810   :  { %7133 = vmatprep.subr.bf16.mxu1 %v7483_v6  ;;  %7124 = vmatprep.subr.bf16.mxu0 %v7483_v6 }
 0x813   :  { %7135 = vmatpush3.bf16.msra.mxu1 %v8870_v48 }
 0x814   :  { %7136 = vmatprep.subr.bf16.mxu1 %v7483_v6 }
 0x8dc   :  { %v3598_v20 = vpop.f32.mrb[6].mxu0 }
 0x8dd   :  { %v3600_v22 = vpop.f32.mrb[7].mxu0  ;;  %v3605_v42 = vadd.f32 %v3598_v20, %v7748_v63  ;;  %v8886_v20 = vpack.c.bf16 %v6049_v9, %v6048_v49  ;;  %v6060_v49 = vld [vmem:[%s9233_s4 + $0xa0] sm:$0xff]  ;;  %v6061_v9 = vld [vmem:[%s9233_s4 + $0xa8] sm:$0xff] }
 0x8de   :  { %v3606_v59 = vadd.f32 %v3600_v22, %v7750_v1  ;;  %v8890_v22 = vpack.c.bf16 %v4260_v58, %v4259_v51  ;;  %v7173_v58 = vpack.c.bf16 %v6061_v9, %v6060_v49 }
 0x8df   :  { %v5974_v50 = vmul.f32 -1.442695, %v3605_v42  ;;  %7126 = vmatpush3.bf16.msra.mxu0 %v8886_v20 }
 0x8e0   :  { %7456 = vtanh.f32 %v3606_v59  ;;  %v5975_v40 = vmul.f32 -1.442695, %v3606_v59  ;;  %v6050_v59 = vld [vmem:[%s9233_s4 + $0x70] sm:$0xff]  ;;  %7138 = vmatpush3.bf16.msra.mxu1 %v8890_v22  ;;  %7127 = vmatprep.subr.bf16.mxu0 %v7483_v6 }
 0x8e1   :  { %v4197_v4 = vpop.f32.mrb[6].mxu1  ;;  %7139 = vmatprep.subr.bf16.mxu1 %v7483_v6 }
 0x8e2   :  { %v4199_v5 = vpop.f32.mrb[7].mxu1  ;;  %v4204_v54 = vadd.f32 %v4197_v4, %v7748_v63  ;;  %v6051_v4 = vld [vmem:[%s9233_s4 + $0x78] sm:$0xff] }
 0x8e3   :  { %v4205_v17 = vadd.f32 %v4199_v5, %v7750_v1  ;;  %v4261_v5 = vld [vmem:[%s9233_s4 + $0x30] sm:$0xff] }
 0x8e4   :  { %v6042_v1 = vmul.f32 -1.442695, %v4204_v54 }
 0x8e5   :  { %7458 = vtanh.f32 %v4205_v17  ;;  %v6043_v41 = vmul.f32 -1.442695, %v4205_v17  ;;  %v4262_v17 = vld [vmem:[%s9233_s4 + $0x38] sm:$0xff] }
 0x8e6   :  { %7460 = vpow2.f32 %v5974_v50 }
 0x8e7   :  { %7462 = vpow2.f32 %v6042_v1 }
 0x8ea   :  { %v7457_v25 = vpop.eup %7456 }
 0x8eb   :  { %3627 = vrot.lane.b32.xlu0 %v7457_v25, %s7481_s3  ;;  %v8906_v25 = vpack.c.bf16 %v6051_v4, %v6050_v59  ;;  %v6066_v4 = vld [vmem:[%s9233_s4 + $0xc0] sm:$0xff] }
 0x8ed   :  { %7129 = vmatpush3.bf16.msra.mxu0 %v8906_v25 }
 0x8ee   :  { %7142 = vmatprep.subr.bf16.mxu0 %v7483_v6 }
 0x8ef   :  { %v7459_v26 = vpop.eup %7458  ;;  %3622 = vrot.lane.b32.xlu0 %v3620_v14, %s7481_s3  ;;  %v8910_v14 = vpack.c.bf16 %v4262_v17, %v4261_v5  ;;  %v6067_v5 = vld [vmem:[%s9233_s4 + $0xc8] sm:$0xff] }
 0x8f0   :  { %4226 = vrot.lane.b32.xlu1 %v7459_v26, %s7481_s3  ;;  %v7461_v60 = vpop.eup %7460  ;;  %v7191_v17 = vpack.c.bf16 %v6067_v5, %v6066_v4  ;;  %v6106_v5 = vld [vmem:[%s9233_s4 + $0x1c0] sm:$0xff] }
 0x8f1   :  { %v3610_v56 = vadd.f32 1.0, %v7461_v60  ;;  %v7463_v19 = vpop.eup %7462  ;;  %7141 = vmatpush3.bf16.msra.mxu1 %v8910_v14 }
 0x8f2   :  { %v4209_v23 = vadd.f32 1.0, %v7463_v19  ;;  %7154 = vmatprep.subr.bf16.mxu1 %v7483_v6 }
 0x8f3   :  { %7464 = vrcp.f32 %v3610_v56 }
 0x8f4   :  { %4221 = vrot.lane.b32.xlu1 %v4219_v27, %s7481_s3  ;;  %7466 = vrcp.f32 %v4209_v23 }
 0x8fd   :  { %v7465_v24 = vpop.eup %7464 }
 0x8fe   :  { %v7467_v37 = vpop.eup %7466 }
 0x95d   :  { %v3628_v8 = vpop.permute.xlu0 %3627 }
 0x95e   :  { %v3630_v30 = vmul.f32 %v7465_v24, %v3628_v8 }
 0x960   :  { %3632 = vrot.lane.b32.xlu0 %v3630_v30, %s7481_s3 }
 0x961   :  { %v3623_v63 = vpop.permute.xlu0 %3622 }
 0x962   :  { %v4227_v12 = vpop.permute.xlu1 %4226  ;;  %v3625_v38 = vmul.f32 %v7465_v24, %v3623_v63 }
 0x963   :  { %v4229_v15 = vmul.f32 %v7467_v37, %v4227_v12 }
 0x965   :  { %4231 = vrot.lane.b32.xlu1 %v4229_v15, %s7481_s3 }
 0x966   :  { %v4222_v36 = vpop.permute.xlu1 %4221 }
 0x967   :  { %v4224_v29 = vmul.f32 %v7467_v37, %v4222_v36 }
 0x9d2   :  { %v3633_v31 = vpop.permute.xlu0 %3632 }
 0x9d3   :  { %v8821_v28 = vadd.f32 %v3633_v31, %v3625_v38 }
 0x9d5   :  { %7468 = vtanh.f32 %v8821_v28 }
 0x9d7   :  { %v4232_v39 = vpop.permute.xlu1 %4231 }
 0x9d8   :  { %v8824_v33 = vadd.f32 %v4232_v39, %v4224_v29 }
 0x9da   :  { %7470 = vtanh.f32 %v8824_v33 }
 0x9db   :  { %7472 = vpow2.f32 %v5975_v40 }
 0x9dc   :  { %7474 = vpow2.f32 %v6043_v41 }
 0x9df   :  { %v7469_v34 = vpop.eup %7468 }
 0x9e0   :  { %3638 = vrot.lane.b32.xlu0 %v7469_v34, %s7481_s3 }
 0x9e4   :  { %v7471_v55 = vpop.eup %7470 }
 0x9e5   :  { %4237 = vrot.lane.b32.xlu1 %v7471_v55, %s7481_s3  ;;  %v7473_v46 = vpop.eup %7472 }
 0x9e6   :  { %v3616_v47 = vadd.f32 1.0, %v7473_v46  ;;  %v7475_v7 = vpop.eup %7474 }
 0x9e7   :  { %v4215_v11 = vadd.f32 1.0, %v7475_v7  ;;  %v6056_v7 = vld [vmem:[%s9233_s4 + $0x80] sm:$0xff] }
 0x9e8   :  { %7476 = vrcp.f32 %v3616_v47 }
 0x9e9   :  { %7478 = vrcp.f32 %v4215_v11  ;;  %v6057_v11 = vld [vmem:[%s9233_s4 + $0x88] sm:$0xff] }
 0x9f2   :  { %v7477_v16 = vpop.eup %7476 }
 0x9f3   :  { %v7479_v0 = vpop.eup %7478 }
 0xa52   :  { %v3639_v18 = vpop.permute.xlu0 %3638 }
 0xa53   :  { %v3641_v10 = vmul.f32 %v7477_v16, %v3639_v18 }
 0xa55   :  { %3648 = vrot.lane.b32.xlu0 %v3641_v10, %s7482_s23 }
 0xa57   :  { %v4238_v45 = vpop.permute.xlu1 %4237 }
 0xa58   :  { %v4240_v61 = vmul.f32 %v7479_v0, %v4238_v45  ;;  %v7167_v0 = vpack.c.bf16 %v6057_v11, %v6056_v7  ;;  %v6088_v11 = vld [vmem:[%s9233_s4 + $0x150] sm:$0xff] }
 0xa5a   :  { %4247 = vrot.lane.b32.xlu1 %v4240_v61, %s7482_s23 }
 0xac7   :  { %v3649_v26 = vpop.permute.xlu0 %3648 }
 0xac8   :  { %3651 = vst.msk [vmem:[#allocation2 + $0x1] sm:$0xff] %vm337_vm6, %v3649_v26  ;;  %v6069_v26 = vld [vmem:[%s9233_s4 + $0xd8] sm:$0xff] }
 0xacc   :  { %v4248_v27 = vpop.permute.xlu1 %4247 }
 0xacd   :  { %4250 = vst.msk [vmem:[#allocation2 + $0x11] sm:$0xff] %vm337_vm6, %v4248_v27 }
 0xacf   :  { %v4251_v42 = vld [vmem:[#allocation2 + $0x1] sm:$0xff] }
 0xad0   :  { %v4274_v50 = vrot.slane %v4251_v42, 1  ;;  %v4586_v23 = vrot.slane %v4251_v42, 2  ;;  %v4749_v30 = vrot.slane %v4251_v42, 3  ;;  %v4912_v15 = vrot.slane %v4251_v42, 4 }
 0xad1   :  { %v5075_v31 = vrot.slane %v4251_v42, 5  ;;  %v5238_v29 = vrot.slane %v4251_v42, 6  ;;  %v5401_v34 = vrot.slane %v4251_v42, 7 }
 0xad4   :  { %v4252_v54 = vld [vmem:[#allocation2 + $0x11] sm:$0xff] }
 0xad5   :  { %v4276_v1 = vsel %vm4275_vm8, %v4252_v54, %v4274_v50  ;;  %v4351_v60 = vrot.slane %v4252_v54, 7  ;;  %v4587_v19 = vrot.slane %v4252_v54, 1  ;;  %v4750_v24 = vrot.slane %v4252_v54, 2 }
 0xad6   :  { %4277 = vrot.lane.b32.xlu0 %v4276_v1, %s7485_s12  ;;  %v4913_v37 = vrot.slane %v4252_v54, 3  ;;  %v5076_v63 = vrot.slane %v4252_v54, 4  ;;  %v5239_v36 = vrot.slane %v4252_v54, 5  ;;  %v5402_v39 = vrot.slane %v4252_v54, 6  ;;  %v6070_v1 = vld [vmem:[%s9233_s4 + $0xe0] sm:$0xff] }
 0xad7   :  { %v4352_v56 = vsel %vm4275_vm8, %v4351_v60, %v4251_v42  ;;  %v4588_v8 = vsel %vm4275_vm8, %v4587_v19, %v4586_v23  ;;  %v4751_v12 = vsel %vm4275_vm8, %v4750_v24, %v4749_v30  ;;  %v6071_v60 = vld [vmem:[%s9233_s4 + $0xe8] sm:$0xff]  ;;  %v6072_v19 = vld [vmem:[%s9233_s4 + $0xf0] sm:$0xff]  ;;  %v6073_v23 = vld [vmem:[%s9233_s4 + $0xf8] sm:$0xff] }
 0xad8   :  { %4353 = vrot.lane.b32.xlu1 %v4352_v56, %s7485_s12  ;;  %v4914_v38 = vsel %vm4275_vm8, %v4913_v37, %v4912_v15  ;;  %v5403_v55 = vsel %vm4275_vm8, %v5402_v39, %v5401_v34  ;;  %v7197_v56 = vpack.c.bf16 %v6071_v60, %v6070_v1  ;;  %v7200_v24 = vpack.c.bf16 %v6073_v23, %v6072_v19  ;;  %v6077_v30 = vld [vmem:[%s9233_s4 + $0x108] sm:$0xff]  ;;  %v6078_v15 = vld [vmem:[%s9233_s4 + $0x110] sm:$0xff]  ;;  %v6113_v60 = vld [vmem:[%s9233_s4 + $0x1f8] sm:$0xff] }
 0xad9   :  { %v6081_v39 = vld [vmem:[%s9233_s4 + $0x128] sm:$0xff]  ;;  %v6082_v34 = vld [vmem:[%s9233_s4 + $0x130] sm:$0xff] }
 0xada   :  { %3643 = vrot.lane.b32.xlu0 %v8821_v28, %s7481_s3  ;;  %v5077_v28 = vsel %vm4275_vm8, %v5076_v63, %v5075_v31  ;;  %v6079_v63 = vld [vmem:[%s9233_s4 + $0x118] sm:$0xff] }
 0xadc   :  { %4242 = vrot.lane.b32.xlu1 %v8824_v33, %s7481_s3  ;;  %v5240_v33 = vsel %vm4275_vm8, %v5239_v36, %v5238_v29  ;;  %v6080_v29 = vld [vmem:[%s9233_s4 + $0x120] sm:$0xff] }
 0xade   :  { %4589 = vrot.lane.b32.xlu0 %v4588_v8, %s7485_s12  ;;  %v6076_v8 = vld [vmem:[%s9233_s4 + $0x100] sm:$0xff] }
 0xadf   :  { %v7215_v37 = vpack.c.bf16 %v6077_v30, %v6076_v8 }
 0xae0   :  { %4752 = vrot.lane.b32.xlu1 %v4751_v12, %s7485_s12 }
 0xae2   :  { %4915 = vrot.lane.b32.xlu0 %v4914_v38, %s7485_s12 }
 0xae4   :  { %5078 = vrot.lane.b32.xlu1 %v5077_v28, %s7485_s12  ;;  %v7218_v28 = vpack.c.bf16 %v6079_v63, %v6078_v15 }
 0xae6   :  { %5241 = vrot.lane.b32.xlu0 %v5240_v33, %s7485_s12  ;;  %v7221_v33 = vpack.c.bf16 %v6081_v39, %v6080_v29 }
 0xae8   :  { %5404 = vrot.lane.b32.xlu1 %v5403_v55, %s7485_s12  ;;  %v6083_v55 = vld [vmem:[%s9233_s4 + $0x138] sm:$0xff] }
 0xb48   :  { %v4278_v40 = vpop.permute.xlu0 %4277 }
 0xb49   :  { %6279 = vmatmul.mubr.msk.f32.vlgmr.msra.gmra.mrb[8].mxu0 %vm331_vm5, %v4278_v40  ;;  %v7224_v40 = vpack.c.bf16 %v6083_v55, %v6082_v34 }
 0xb4a   :  { %7144 = vmatpush3.bf16.msra.mxu0 %v8842_v62  ;;  %v4354_v41 = vpop.permute.xlu1 %4353  ;;  %6316 = vmatprep.mubr.msk.f32.mxu0 %vm7484_vm7, %v7480_v3 }
 0xb4b   :  { %6298 = vmatmul.mubr.msk.f32.vlgmr.msra.gmra.mrb[8].mxu1 %vm331_vm5, %v4354_v41  ;;  %7145 = vmatprep.subr.bf16.mxu0 %v7483_v6  ;;  %v6086_v41 = vld [vmem:[%s9233_s4 + $0x140] sm:$0xff] }
 0xb4c   :  { %7156 = vmatpush3.bf16.msra.mxu1 %v8857_v44  ;;  %v3644_v46 = vpop.permute.xlu0 %3643  ;;  %6335 = vmatprep.mubr.msk.f32.mxu1 %vm7484_vm7, %v7480_v3 }
 0xb4d   :  { %3646 = vst.msk [vmem:[#allocation3] sm:$0xff] %vm331_vm5, %v3644_v46  ;;  %7157 = vmatprep.subr.bf16.mxu1 %v7483_v6  ;;  %v6087_v46 = vld [vmem:[%s9233_s4 + $0x148] sm:$0xff] }
 0xb4e   :  { %7147 = vmatpush3.bf16.msra.mxu0 %v8866_v21  ;;  %v4243_v47 = vpop.permute.xlu1 %4242 }
 0xb4f   :  { %4245 = vst.msk [vmem:[#allocation3 + $0x8] sm:$0xff] %vm331_vm5, %v4243_v47  ;;  %7148 = vmatprep.subr.bf16.mxu0 %v7483_v6  ;;  %v7239_v47 = vpack.c.bf16 %v6087_v46, %v6086_v41 }
 0xb50   :  { %7159 = vmatpush3.bf16.msra.mxu1 %v8870_v48  ;;  %v4590_v27 = vpop.permute.xlu0 %4589 }
 0xb51   :  { %7160 = vmatprep.subr.bf16.mxu1 %v7483_v6 }
 0xb52   :  { %7150 = vmatpush3.bf16.msra.mxu0 %v8886_v20  ;;  %v6062_v20 = vld [vmem:[%s9233_s4 + $0xb0] sm:$0xff]  ;;  %v4753_v38 = vpop.permute.xlu1 %4752 }
 0xb53   :  { %7151 = vmatprep.subr.bf16.mxu0 %v7483_v6 }
 0xb54   :  { %7162 = vmatpush3.bf16.msra.mxu1 %v8890_v22  ;;  %v8956_v16 = vld [vmem:[#allocation3] sm:$0xff]  ;;  %v6063_v22 = vld [vmem:[%s9233_s4 + $0xb8] sm:$0xff] }
 0xb55   :  { %7163 = vmatprep.subr.bf16.mxu1 %v7483_v6  ;;  %v4429_v18 = vrot.slane %v8956_v16, 1  ;;  %v5153_v35 = vrot.slane %v8956_v16, 5  ;;  %v5316_v57 = vrot.slane %v8956_v16, 6  ;;  %v5479_v52 = vrot.slane %v8956_v16, 7 }
 0xb56   :  { %7153 = vmatpush3.bf16.msra.mxu0 %v8906_v25  ;;  %v8961_v10 = vld [vmem:[#allocation3 + $0x8] sm:$0xff]  ;;  %v7176_v59 = vpack.c.bf16 %v6063_v22, %v6062_v20  ;;  %v4664_v42 = vrot.slane %v8956_v16, 2  ;;  %v4827_v31 = vrot.slane %v8956_v16, 3  ;;  %v5079_v49 = vpop.permute.xlu1 %5078 }
 0xb57   :  { %v4430_v45 = vsel %vm4275_vm8, %v8961_v10, %v4429_v18  ;;  %7166 = vmatprep.subr.bf16.mxu0 %v7483_v6  ;;  %v4503_v61 = vrot.slane %v8961_v10, 7  ;;  %v5154_v62 = vrot.slane %v8961_v10, 4  ;;  %v5317_v13 = vrot.slane %v8961_v10, 5  ;;  %v6089_v18 = vld [vmem:[%s9233_s4 + $0x158] sm:$0xff]  ;;  %v6101_v20 = vld [vmem:[%s9233_s4 + $0x1a8] sm:$0xff] }
 0xb58   :  { %7165 = vmatpush3.bf16.msra.mxu1 %v8910_v14  ;;  %v5480_v43 = vrot.slane %v8961_v10, 6  ;;  %v4665_v25 = vrot.slane %v8961_v10, 1  ;;  %v6068_v14 = vld [vmem:[%s9233_s4 + $0xd0] sm:$0xff]  ;;  %v4828_v12 = vrot.slane %v8961_v10, 2  ;;  %v4991_v7 = vrot.slane %v8961_v10, 3 }
 0xb59   :  { %6317 = vmatmul.mubr.msk.f32.vlgmr.msra.gmra.mrb[10].mxu0 %vm331_vm5, %v4430_v45  ;;  %7178 = vmatprep.subr.bf16.mxu1 %v7483_v6  ;;  %v4504_v44 = vsel %vm4275_vm8, %v4503_v61, %v8956_v16  ;;  %v8987_v21 = vsel %vm4275_vm8, %v5154_v62, %v5153_v35  ;;  %v8990_v48 = vsel %vm4275_vm8, %v5317_v13, %v5316_v57  ;;  %v4990_v45 = vrot.slane %v8956_v16, 4  ;;  %v6091_v16 = vld [vmem:[%s9233_s4 + $0x168] sm:$0xff]  ;;  %v6092_v35 = vld [vmem:[%s9233_s4 + $0x170] sm:$0xff]  ;;  %v6093_v62 = vld [vmem:[%s9233_s4 + $0x178] sm:$0xff] }
 0xb5a   :  { %7168 = vmatpush3.bf16.msra.mxu0 %v7167_v0  ;;  %6354 = vmatprep.mubr.msk.f32.mxu0 %vm7484_vm7, %v7480_v3  ;;  %v9001_v51 = vsel %vm4275_vm8, %v5480_v43, %v5479_v52  ;;  %v4666_v50 = vsel %vm4275_vm8, %v4665_v25, %v4664_v42  ;;  %v7194_v54 = vpack.c.bf16 %v6069_v26, %v6068_v14  ;;  %v6096_v13 = vld [vmem:[%s9233_s4 + $0x180] sm:$0xff]  ;;  %v6097_v43 = vld [vmem:[%s9233_s4 + $0x188] sm:$0xff]  ;;  %v6098_v52 = vld [vmem:[%s9233_s4 + $0x190] sm:$0xff] }
 0xb5b   :  { %6336 = vmatmul.mubr.msk.f32.vlgmr.msra.gmra.mrb[10].mxu1 %vm331_vm5, %v4504_v44  ;;  %7169 = vmatprep.subr.bf16.mxu0 %v7483_v6  ;;  %v4829_v36 = vsel %vm4275_vm8, %v4828_v12, %v4827_v31  ;;  %v4992_v10 = vsel %vm4275_vm8, %v4991_v7, %v4990_v45  ;;  %v7242_v61 = vpack.c.bf16 %v6089_v18, %v6088_v11  ;;  %v6108_v14 = vld [vmem:[%s9233_s4 + $0x1d0] sm:$0xff]  ;;  %v6109_v26 = vld [vmem:[%s9233_s4 + $0x1d8] sm:$0xff] }
 0xb5c   :  { %7180 = vmatpush3.bf16.msra.mxu1 %v7167_v0  ;;  %6373 = vmatprep.mubr.msk.f32.mxu1 %vm7484_vm7, %v7480_v3  ;;  %v4916_v0 = vpop.permute.xlu0 %4915  ;;  %v7245_v32 = vpack.c.bf16 %v6091_v16, %v6090_v2  ;;  %v7248_v57 = vpack.c.bf16 %v6093_v62, %v6092_v35  ;;  %v7263_v44 = vpack.c.bf16 %v6097_v43, %v6096_v13 }
 0xb5d   :  { %7181 = vmatprep.subr.bf16.mxu1 %v7483_v6  ;;  %v7290_v42 = vpack.c.bf16 %v6109_v26, %v6108_v14 }
 0xb5e   :  { %7171 = vmatpush3.bf16.msra.mxu0 %v7170_v53 }
 0xb5f   :  { %7172 = vmatprep.subr.bf16.mxu0 %v7483_v6 }
 0xb60   :  { %7183 = vmatpush3.bf16.msra.mxu1 %v7170_v53  ;;  %v6099_v53 = vld [vmem:[%s9233_s4 + $0x198] sm:$0xff] }
 0xb61   :  { %7184 = vmatprep.subr.bf16.mxu1 %v7483_v6  ;;  %v7266_v9 = vpack.c.bf16 %v6099_v53, %v6098_v52  ;;  %v6116_v53 = vld [vmem:[%s9234_s5] ss:$0 sm:$0xff] }
 0xb62   :  { %7174 = vmatpush3.bf16.msra.mxu0 %v7173_v58 }
 0xb63   :  { %7175 = vmatprep.subr.bf16.mxu0 %v7483_v6 }
 0xb64   :  { %7186 = vmatpush3.bf16.msra.mxu1 %v7173_v58  ;;  %v6100_v58 = vld [vmem:[%s9233_s4 + $0x1a0] sm:$0xff] }
 0xb65   :  { %7187 = vmatprep.subr.bf16.mxu1 %v7483_v6  ;;  %v7269_v22 = vpack.c.bf16 %v6101_v20, %v6100_v58 }
 0xb66   :  { %7177 = vmatpush3.bf16.msra.mxu0 %v7176_v59 }
 0xb67   :  { %7190 = vmatprep.subr.bf16.mxu0 %v7483_v6 }
 0xb68   :  { %7189 = vmatpush3.bf16.msra.mxu1 %v7176_v59  ;;  %v6103_v59 = vld [vmem:[%s9233_s4 + $0x1b8] sm:$0xff] }
 0xb69   :  { %6355 = vmatmul.mubr.msk.f32.vlgmr.msra.gmra.mrb[12].mxu0 %vm331_vm5, %v4590_v27  ;;  %7202 = vmatprep.subr.bf16.mxu1 %v7483_v6  ;;  %v5242_v27 = vpop.permute.xlu0 %5241 }
 0xb6a   :  { %7192 = vmatpush3.bf16.msra.mxu0 %v7191_v17  ;;  %6392 = vmatprep.mubr.msk.f32.mxu0 %vm7484_vm7, %v7480_v3 }
 0xb6b   :  { %6374 = vmatmul.mubr.msk.f32.vlgmr.msra.gmra.mrb[12].mxu1 %vm331_vm5, %v4666_v50  ;;  %7193 = vmatprep.subr.bf16.mxu0 %v7483_v6  ;;  %v6110_v50 = vld [vmem:[%s9233_s4 + $0x1e0] sm:$0xff] }
 0xb6c   :  { %7204 = vmatpush3.bf16.msra.mxu1 %v7191_v17  ;;  %6411 = vmatprep.mubr.msk.f32.mxu1 %vm7484_vm7, %v7480_v3  ;;  %v6107_v17 = vld [vmem:[%s9233_s4 + $0x1c8] sm:$0xff] }
 0xb6d   :  { %7205 = vmatprep.subr.bf16.mxu1 %v7483_v6  ;;  %v7287_v25 = vpack.c.bf16 %v6107_v17, %v6106_v5 }
 0xb6e   :  { %7195 = vmatpush3.bf16.msra.mxu0 %v7194_v54 }
 0xb6f   :  { %7196 = vmatprep.subr.bf16.mxu0 %v7483_v6 }
 0xb70   :  { %7207 = vmatpush3.bf16.msra.mxu1 %v7194_v54  ;;  %v6111_v54 = vld [vmem:[%s9233_s4 + $0x1e8] sm:$0xff] }
 0xb71   :  { %7208 = vmatprep.subr.bf16.mxu1 %v7483_v6  ;;  %v7293_v1 = vpack.c.bf16 %v6111_v54, %v6110_v50 }
 0xb72   :  { %7198 = vmatpush3.bf16.msra.mxu0 %v7197_v56 }
 0xb73   :  { %7199 = vmatprep.subr.bf16.mxu0 %v7483_v6 }
 0xb74   :  { %7210 = vmatpush3.bf16.msra.mxu1 %v7197_v56 }
 0xb75   :  { %7211 = vmatprep.subr.bf16.mxu1 %v7483_v6 }
 0xb76   :  { %7201 = vmatpush3.bf16.msra.mxu0 %v7200_v24 }
 0xb77   :  { %7214 = vmatprep.subr.bf16.mxu0 %v7483_v6 }
 0xb78   :  { %7213 = vmatpush3.bf16.msra.mxu1 %v7200_v24 }
 0xb79   :  { %6393 = vmatmul.mubr.msk.f32.vlgmr.msra.gmra.mrb[14].mxu0 %vm331_vm5, %v4753_v38  ;;  %7226 = vmatprep.subr.bf16.mxu1 %v7483_v6 }
 0xb7a   :  { %7216 = vmatpush3.bf16.msra.mxu0 %v7215_v37  ;;  %6430 = vmatprep.mubr.msk.f32.mxu0 %vm7484_vm7, %v7480_v3 }
 0xb7b   :  { %6412 = vmatmul.mubr.msk.f32.vlgmr.msra.gmra.mrb[14].mxu1 %vm331_vm5, %v4829_v36  ;;  %7217 = vmatprep.subr.bf16.mxu0 %v7483_v6 }
 0xb7c   :  { %7228 = vmatpush3.bf16.msra.mxu1 %v7215_v37  ;;  %6449 = vmatprep.mubr.msk.f32.mxu1 %vm7484_vm7, %v7480_v3 }
 0xb7d   :  { %7229 = vmatprep.subr.bf16.mxu1 %v7483_v6 }
 0xb7e   :  { %7219 = vmatpush3.bf16.msra.mxu0 %v7218_v28 }
 0xb7f   :  { %7220 = vmatprep.subr.bf16.mxu0 %v7483_v6 }
 0xb80   :  { %7231 = vmatpush3.bf16.msra.mxu1 %v7218_v28 }
 0xb81   :  { %7232 = vmatprep.subr.bf16.mxu1 %v7483_v6 }
 0xb82   :  { %7222 = vmatpush3.bf16.msra.mxu0 %v7221_v33 }
 0xb83   :  { %7223 = vmatprep.subr.bf16.mxu0 %v7483_v6 }
 0xb84   :  { %7234 = vmatpush3.bf16.msra.mxu1 %v7221_v33 }
 0xb85   :  { %7235 = vmatprep.subr.bf16.mxu1 %v7483_v6 }
 0xb86   :  { %7225 = vmatpush3.bf16.msra.mxu0 %v7224_v40 }
 0xb87   :  { %7238 = vmatprep.subr.bf16.mxu0 %v7483_v6 }
 0xb88   :  { %7237 = vmatpush3.bf16.msra.mxu1 %v7224_v40 }
 0xb89   :  { %6431 = vmatmul.mubr.msk.f32.vlgmr.msra.gmra.mrb[16].mxu0 %vm331_vm5, %v4916_v0  ;;  %7250 = vmatprep.subr.bf16.mxu1 %v7483_v6 }
 0xb8a   :  { %7240 = vmatpush3.bf16.msra.mxu0 %v7239_v47  ;;  %6468 = vmatprep.mubr.msk.f32.mxu0 %vm7484_vm7, %v7480_v3 }
 0xb8b   :  { %6450 = vmatmul.mubr.msk.f32.vlgmr.msra.gmra.mrb[16].mxu1 %vm331_vm5, %v4992_v10  ;;  %7241 = vmatprep.subr.bf16.mxu0 %v7483_v6 }
 0xb8c   :  { %7252 = vmatpush3.bf16.msra.mxu1 %v7239_v47  ;;  %6487 = vmatprep.mubr.msk.f32.mxu1 %vm7484_vm7, %v7480_v3 }
 0xb8d   :  { %7253 = vmatprep.subr.bf16.mxu1 %v7483_v6 }
 0xb8e   :  { %7243 = vmatpush3.bf16.msra.mxu0 %v7242_v61 }
 0xb8f   :  { %7244 = vmatprep.subr.bf16.mxu0 %v7483_v6 }
 0xb90   :  { %7255 = vmatpush3.bf16.msra.mxu1 %v7242_v61 }
 0xb91   :  { %7256 = vmatprep.subr.bf16.mxu1 %v7483_v6 }
 0xb92   :  { %7246 = vmatpush3.bf16.msra.mxu0 %v7245_v32 }
 0xb93   :  { %7247 = vmatprep.subr.bf16.mxu0 %v7483_v6 }
 0xb94   :  { %7258 = vmatpush3.bf16.msra.mxu1 %v7245_v32 }
 0xb95   :  { %7259 = vmatprep.subr.bf16.mxu1 %v7483_v6 }
 0xb96   :  { %7249 = vmatpush3.bf16.msra.mxu0 %v7248_v57 }
 0xb97   :  { %7262 = vmatprep.subr.bf16.mxu0 %v7483_v6 }
 0xb98   :  { %7261 = vmatpush3.bf16.msra.mxu1 %v7248_v57 }
 0xb99   :  { %6469 = vmatmul.mubr.msk.f32.vlgmr.msra.gmra.mrb[18].mxu0 %vm331_vm5, %v5079_v49  ;;  %7274 = vmatprep.subr.bf16.mxu1 %v7483_v6 }
 0xb9a   :  { %7264 = vmatpush3.bf16.msra.mxu0 %v7263_v44  ;;  %6506 = vmatprep.mubr.msk.f32.mxu0 %vm7484_vm7, %v7480_v3 }
 0xb9b   :  { %6488 = vmatmul.mubr.msk.f32.vlgmr.msra.gmra.mrb[18].mxu1 %vm331_vm5, %v8987_v21  ;;  %7265 = vmatprep.subr.bf16.mxu0 %v7483_v6  ;;  %v6102_v21 = vld [vmem:[%s9233_s4 + $0x1b0] sm:$0xff] }
 0xb9c   :  { %7276 = vmatpush3.bf16.msra.mxu1 %v7263_v44  ;;  %6525 = vmatprep.mubr.msk.f32.mxu1 %vm7484_vm7, %v7480_v3  ;;  %v7272_v4 = vpack.c.bf16 %v6103_v59, %v6102_v21 }
 0xb9d   :  { %7277 = vmatprep.subr.bf16.mxu1 %v7483_v6 }
 0xb9e   :  { %7267 = vmatpush3.bf16.msra.mxu0 %v7266_v9 }
 0xb9f   :  { %7268 = vmatprep.subr.bf16.mxu0 %v7483_v6 }
 0xba0   :  { %7279 = vmatpush3.bf16.msra.mxu1 %v7266_v9 }
 0xba1   :  { %7280 = vmatprep.subr.bf16.mxu1 %v7483_v6 }
 0xba2   :  { %7270 = vmatpush3.bf16.msra.mxu0 %v7269_v22 }
 0xba3   :  { %7271 = vmatprep.subr.bf16.mxu0 %v7483_v6 }
 0xba4   :  { %7282 = vmatpush3.bf16.msra.mxu1 %v7269_v22 }
 0xba5   :  { %7283 = vmatprep.subr.bf16.mxu1 %v7483_v6 }
 0xba6   :  { %7273 = vmatpush3.bf16.msra.mxu0 %v7272_v4 }
 0xba7   :  { %7286 = vmatprep.subr.bf16.mxu0 %v7483_v6 }
 0xba8   :  { %7285 = vmatpush3.bf16.msra.mxu1 %v7272_v4 }
 0xba9   :  { %6507 = vmatmul.mubr.msk.f32.vlgmr.msra.gmra.mrb[20].mxu0 %vm331_vm5, %v5242_v27  ;;  %7298 = vmatprep.subr.bf16.mxu1 %v7483_v6 }
 0xbaa   :  { %7288 = vmatpush3.bf16.msra.mxu0 %v7287_v25  ;;  %6544 = vmatprep.mubr.msk.f32.mxu0 %vm7484_vm7, %v7480_v3 }
 0xbab   :  { %6526 = vmatmul.mubr.msk.f32.vlgmr.msra.gmra.mrb[20].mxu1 %vm331_vm5, %v8990_v48  ;;  %7289 = vmatprep.subr.bf16.mxu0 %v7483_v6  ;;  %v6112_v48 = vld [vmem:[%s9233_s4 + $0x1f0] sm:$0xff] }
 0xbac   :  { %7300 = vmatpush3.bf16.msra.mxu1 %v7287_v25  ;;  %6563 = vmatprep.mubr.msk.f32.mxu1 %vm7484_vm7, %v7480_v3  ;;  %v7296_v56 = vpack.c.bf16 %v6113_v60, %v6112_v48  ;;  %v5405_v3 = vpop.permute.xlu1 %5404 }
 0xbad   :  { %7301 = vmatprep.subr.bf16.mxu1 %v7483_v6 }
 0xbae   :  { %7291 = vmatpush3.bf16.msra.mxu0 %v7290_v42 }
 0xbaf   :  { %7292 = vmatprep.subr.bf16.mxu0 %v7483_v6 }
 0xbb0   :  { %7303 = vmatpush3.bf16.msra.mxu1 %v7290_v42 }
 0xbb1   :  { %7304 = vmatprep.subr.bf16.mxu1 %v7483_v6 }
 0xbb2   :  { %7294 = vmatpush3.bf16.msra.mxu0 %v7293_v1 }
 0xbb3   :  { %7295 = vmatprep.subr.bf16.mxu0 %v7483_v6 }
 0xbb4   :  { %7306 = vmatpush3.bf16.msra.mxu1 %v7293_v1 }
 0xbb5   :  { %7307 = vmatprep.subr.bf16.mxu1 %v7483_v6 }
 0xbb6   :  { %7297 = vmatpush3.bf16.msra.mxu0 %v7296_v56 }
 0xbb8   :  { %7309 = vmatpush3.bf16.msra.mxu1 %v7296_v56 }
 0xbb9   :  { %6545 = vmatmul.mubr.msk.f32.vlgmr.msra.gmra.mrb[22].mxu0 %vm331_vm5, %v5405_v3 }
 0xbbb   :  { %6564 = vmatmul.mubr.msk.f32.vlgmr.msra.gmra.mrb[22].mxu1 %vm331_vm5, %v9001_v51 }
 0xc1c   :  { %v4347_v19 = vpop.f32.mrb[8].mxu0 }
 0xc1d   :  { %v6280_v23 = vpop.f32.mrb[9].mxu0 }
 0xc1e   :  { %v4423_v24 = vpop.f32.mrb[8].mxu1 }
 0xc1f   :  { %v4424_v8 = vadd.f32 %v4423_v24, %v4347_v19  ;;  %v6299_v30 = vpop.f32.mrb[9].mxu1 }
 0xc2c   :  { %v4499_v37 = vpop.f32.mrb[10].mxu0 }
 0xc2d   :  { %v6318_v12 = vpop.f32.mrb[11].mxu0 }
 0xc2e   :  { %v4573_v15 = vpop.f32.mrb[10].mxu1 }
 0xc2f   :  { %v4574_v63 = vadd.f32 %v4573_v15, %v4499_v37  ;;  %v6337_v38 = vpop.f32.mrb[11].mxu1 }
 0xc3c   :  { %v4659_v31 = vpop.f32.mrb[12].mxu0 }
 0xc3d   :  { %v4663_v6 = vadd.f32 %v4659_v31, %v4424_v8  ;;  %v6356_v36 = vpop.f32.mrb[13].mxu0 }
 0xc3e   :  { %v4735_v28 = vpop.f32.mrb[12].mxu1 }
 0xc3f   :  { %v4739_v29 = vadd.f32 %v4735_v28, %v4574_v63  ;;  %v6375_v39 = vpop.f32.mrb[13].mxu1 }
 0xc4c   :  { %v4822_v33 = vpop.f32.mrb[14].mxu0 }
 0xc4d   :  { %v4826_v34 = vadd.f32 %v4822_v33, %v4663_v6  ;;  %v6394_v55 = vpop.f32.mrb[15].mxu0 }
 0xc4e   :  { %v4898_v51 = vpop.f32.mrb[14].mxu1 }
 0xc4f   :  { %v4902_v40 = vadd.f32 %v4898_v51, %v4739_v29  ;;  %v6413_v41 = vpop.f32.mrb[15].mxu1 }
 0xc5c   :  { %v4985_v46 = vpop.f32.mrb[16].mxu0 }
 0xc5d   :  { %v4989_v47 = vadd.f32 %v4985_v46, %v4826_v34  ;;  %v6432_v7 = vpop.f32.mrb[17].mxu0 }
 0xc5e   :  { %v5061_v11 = vpop.f32.mrb[16].mxu1 }
 0xc5f   :  { %v5065_v18 = vadd.f32 %v5061_v11, %v4902_v40  ;;  %v6451_v0 = vpop.f32.mrb[17].mxu1 }
 0xc6c   :  { %v5148_v45 = vpop.f32.mrb[18].mxu0 }
 0xc6d   :  { %v5152_v10 = vadd.f32 %v5148_v45, %v4989_v47  ;;  %v6470_v61 = vpop.f32.mrb[19].mxu0 }
 0xc6e   :  { %v5224_v2 = vpop.f32.mrb[18].mxu1 }
 0xc6f   :  { %v5228_v16 = vadd.f32 %v5224_v2, %v5065_v18  ;;  %v6489_v32 = vpop.f32.mrb[19].mxu1 }
 0xc7c   :  { %v5311_v35 = vpop.f32.mrb[20].mxu0 }
 0xc7d   :  { %v5315_v62 = vadd.f32 %v5311_v35, %v5152_v10  ;;  %v6508_v57 = vpop.f32.mrb[21].mxu0 }
 0xc7e   :  { %v5387_v13 = vpop.f32.mrb[20].mxu1 }
 0xc7f   :  { %v5391_v43 = vadd.f32 %v5387_v13, %v5228_v16  ;;  %v6527_v44 = vpop.f32.mrb[21].mxu1 }
 0xc8c   :  { %v5474_v52 = vpop.f32.mrb[22].mxu0 }
 0xc8d   :  { %v5478_v49 = vadd.f32 %v5474_v52, %v5315_v62  ;;  %v6546_v9 = vpop.f32.mrb[23].mxu0 }
 0xc8e   :  { %v5550_v58 = vpop.f32.mrb[22].mxu1 }
 0xc8f   :  { %v5562_v20 = vadd.f32 %v6116_v53, %v5478_v49  ;;  %v5554_v22 = vadd.f32 %v5550_v58, %v5391_v43  ;;  %v6565_v21 = vpop.f32.mrb[23].mxu1 }
 0xc91   :  { %v5563_v59 = vmax.f32 %v5562_v20, 0.0  ;;  %v5566_v4 = vadd.f32 %v6116_v53, %v5554_v22 }
 0xc93   :  { %5565 = vst.msk [vmem:[%s9235_s6] sm:$0x3] %vm5564_vm9, %v5563_v59  ;;  %v5567_v5 = vmax.f32 %v5566_v4, 0.0 }
 0xc95   :  { %6117 = vst.msk [vmem:[%s9235_s6 + $0x2] sm:$0x3] %vm5564_vm9, %v5567_v5 }

</bundles_post_ra>
